<compile_context>
chip_gen: v7x
topology: tpu7x:2x2x1
jax: 0.10.0
libtpu: 0.0.40
codegen_flags: <defaults>
</compile_context>

<pallas_src>
import jax
import jax.numpy as jnp
from jax.experimental import pallas as pl
from jax.experimental.pallas import tpu as pltpu

# ----------------------------- config ---------------------------------------
FEAT_CH = 128                                   # cfg.RPN.FP_MLPS[0][-1]
CLS_FC = 128                                    # cfg.RPN.CLS_FC[0]
REG_FC = 128                                    # cfg.RPN.REG_FC[0]
PER_LOC_BIN_NUM = int(3.0 / 0.5) * 2            # 12
NUM_HEAD_BIN = 12
REG_CHANNEL = PER_LOC_BIN_NUM * 4 + NUM_HEAD_BIN * 2 + 3 + 1   # 76
HEAD_PAD = 128                                  # lane-dense head slab (1 + 76 -> 128)
HID2 = CLS_FC + REG_FC                          # 256 combined head hidden


# ----------------------------- fused Pallas kernel ---------------------------
def rpn_fused_kernel(xyz_ref,        # (1, 3, tm)        f32
                     w_bb1t_ref,     # (128, 3)          f32   (= bb_w1.T)
                     b_bb1_ref,      # (128, 1)          f32
                     w_bb2t_ref,     # (128, 128)        bf16  (= bb_w2.T)
                     b_bb2_ref,      # (128, 1)          f32
                     w_h1_ref,       # (128, 256)        bf16  [cls_w1 | reg_w1]
                     b_h1_ref,       # (1, 256)          f32
                     w_reg2_ref,     # (128, 128)        bf16  reg_w2 in lanes 1..76
                     b_h2_ref,       # (1, 128)          f32   lane0=cls bias, 1..76 reg bias
                     w_cls2_ref,     # (1, 128)          f32   cls_w2 row
                     feat_ncw_ref,   # (1, 128, tm)      out   backbone_features (NCW)
                     head_ref):      # (1, tm, 128)      out   lane0 cls, lanes 1..76 reg
    f32 = jnp.float32
    bf16 = jnp.bfloat16

    xc = xyz_ref[0]                                          # (3, tm)
    w1t = w_bb1t_ref[...]                                    # (128, 3)

    # Backbone layer 1 (3 -> 128): channels-major rank-1 FMAs on the VPU
    # (contraction depth 3 would be >95% padded on the MXU).
    h_t = (b_bb1_ref[...]
           + w1t[:, 0:1] * xc[0:1, :]
           + w1t[:, 1:2] * xc[1:2, :]
           + w1t[:, 2:3] * xc[2:3, :])                       # (128, tm) f32
    h_t = jnp.maximum(h_t, 0.0)

    # Backbone layer 2 (128 -> 128): bf16 MXU matmul, f32 accumulate, ReLU.
    feats_t = jnp.dot(w_bb2t_ref[...], h_t.astype(bf16),
                      preferred_element_type=f32) + b_bb2_ref[...]
    feats_t = jnp.maximum(feats_t, 0.0)                      # (128, tm) f32

    # backbone_features is already in NCW layout: direct store, no transpose.
    feats_bf_t = feats_t.astype(bf16)
    feat_ncw_ref[0] = feats_bf_t.astype(feat_ncw_ref.dtype)

    # One bf16 XLU transpose to switch to points-major for the head slab.
    feats = jnp.transpose(feats_bf_t)                        # (tm, 128) bf16

    # Combined cls+reg head, layer 1: (tm,128)@(128,256) bf16 MXU, ReLU.
    # (Dropout between layers is identity in eval mode.)
    hh = jnp.dot(feats, w_h1_ref[...],
                 preferred_element_type=f32) + b_h1_ref[...]
    hh = jnp.maximum(hh, 0.0)                                # (tm, 256) f32

    cls_hid = hh[:, :CLS_FC]                                 # (tm, 128)
    reg_hid = hh[:, CLS_FC:]                                 # (tm, 128)

    # Reg head layer 2 on the MXU: (tm,128)@(128,128); reg_w2 lives in lanes
    # 1..76, lane 0 is all-zero (the cls slot), remaining lanes zero pad.
    out = jnp.dot(reg_hid.astype(bf16), w_reg2_ref[...],
                  preferred_element_type=f32) + b_h2_ref[...]   # (tm, 128)

    # Cls logit (single output channel) on the VPU/XLU: multiply + lane-reduce,
    # then add into lane 0 (whose bias is already the cls bias).
    cls_logit = jnp.sum(cls_hid * w_cls2_ref[...], axis=-1, keepdims=True)  # (tm,1)
    lane = jax.lax.broadcasted_iota(jnp.int32, out.shape, dimension=1)
    out = jnp.where(lane == 0, out + cls_logit, out)

    head_ref[0] = out.astype(head_ref.dtype)                 # (tm, 128)


def rpn_fused(xyz_t,
              w_bb1t, b_bb1, w_bb2t, b_bb2,
              w_h1, b_h1, w_reg2, b_h2, w_cls2,
              *, tm=2048, out_dtype=jnp.bfloat16):
    """xyz_t: (B, 3, N) f32 (channel-major points).

    Returns (feat_ncw (B,128,n_pad), head (B,n_pad,128), n_pad).
    """
    B, three, N = xyz_t.shape
    assert three == 3

    # Row tile: multiple of 128, clamped for small N, capped at 2048 so the
    # double-buffered block budget stays well inside v7x's 64 MiB VMEM.
    tm = max(128, min(tm, pl.cdiv(N, 128) * 128))
    tm = (tm // 128) * 128
    n_pad = pl.cdiv(N, tm) * tm
    if n_pad != N:
        xyz_t = jnp.pad(xyz_t, ((0, 0), (0, 0), (0, n_pad - N)))

    grid = (B, n_pad // tm)

    weights = (w_bb1t, b_bb1, w_bb2t, b_bb2, w_h1, b_h1, w_reg2, b_h2, w_cls2)
    weight_bytes = sum(int(w.size) * jnp.dtype(w.dtype).itemsize for w in weights)
    out_itemsize = jnp.dtype(out_dtype).itemsize
    macs_per_pt = (3 * FEAT_CH + FEAT_CH * FEAT_CH + FEAT_CH * HID2
                   + REG_FC * HEAD_PAD + CLS_FC)
    cost = pl.CostEstimate(
        flops=2 * macs_per_pt * B * n_pad,
        transcendentals=0,
        bytes_accessed=(B * 3 * n_pad * 4
                        + (B * FEAT_CH * n_pad + B * n_pad * HEAD_PAD) * out_itemsize
                        + weight_bytes),
    )

    feat_ncw, head = pl.pallas_call(
        rpn_fused_kernel,
        out_shape=(
            jax.ShapeDtypeStruct((B, FEAT_CH, n_pad), out_dtype),
            jax.ShapeDtypeStruct((B, n_pad, HEAD_PAD), out_dtype),
        ),
        grid_spec=pltpu.PrefetchScalarGridSpec(
            num_scalar_prefetch=0,
            grid=grid,
            in_specs=[
                pl.BlockSpec((1, 3, tm), lambda b, i: (b, 0, i)),
                pl.BlockSpec((FEAT_CH, 3), lambda b, i: (0, 0)),
                pl.BlockSpec((FEAT_CH, 1), lambda b, i: (0, 0)),
                pl.BlockSpec((FEAT_CH, FEAT_CH), lambda b, i: (0, 0)),
                pl.BlockSpec((FEAT_CH, 1), lambda b, i: (0, 0)),
                pl.BlockSpec((FEAT_CH, HID2), lambda b, i: (0, 0)),
                pl.BlockSpec((1, HID2), lambda b, i: (0, 0)),
                pl.BlockSpec((REG_FC, HEAD_PAD), lambda b, i: (0, 0)),
                pl.BlockSpec((1, HEAD_PAD), lambda b, i: (0, 0)),
                pl.BlockSpec((1, CLS_FC), lambda b, i: (0, 0)),
            ],
            out_specs=(
                pl.BlockSpec((1, FEAT_CH, tm), lambda b, i: (b, 0, i)),
                pl.BlockSpec((1, tm, HEAD_PAD), lambda b, i: (b, i, 0)),
            ),
        ),
        compiler_params=pltpu.CompilerParams(
            dimension_semantics=("parallel", "parallel"),
            vmem_limit_bytes=48 * 1024 * 1024,
        ),
        cost_estimate=cost,
    )(xyz_t, w_bb1t, b_bb1, w_bb2t, b_bb2, w_h1, b_h1, w_reg2, b_h2, w_cls2)
    return feat_ncw, head, n_pad


# ----------------------------- parameter init --------------------------------
def init_params(key):
    ks = jax.random.split(key, 8)

    def dense(k, cin, cout, std=0.02):
        return std * jax.random.normal(k, (cin, cout), jnp.float32)

    return {
        # backbone stand-in: 3 -> 128 -> 128 shared MLP
        "bb_w1": dense(ks[0], 3, FEAT_CH),
        "bb_b1": jnp.zeros((1, FEAT_CH), jnp.float32),
        "bb_w2": dense(ks[1], FEAT_CH, FEAT_CH),
        "bb_b2": jnp.zeros((1, FEAT_CH), jnp.float32),
        # cls head: Conv1d(128,128,ReLU) -> Dropout -> Conv1d(128,1)
        "cls_w1": dense(ks[2], FEAT_CH, CLS_FC),
        "cls_b1": jnp.zeros((1, CLS_FC), jnp.float32),
        "cls_w2": dense(ks[3], CLS_FC, 1),
        # SigmoidFocalLoss init: bias = -log((1-pi)/pi), pi=0.01
        "cls_b2": jnp.full((1, 1), -jnp.log((1.0 - 0.01) / 0.01), jnp.float32),
        # reg head: Conv1d(128,128,ReLU) -> Dropout -> Conv1d(128,76)
        "reg_w1": dense(ks[4], FEAT_CH, REG_FC),
        "reg_b1": jnp.zeros((1, REG_FC), jnp.float32),
        # init_weights: last reg conv weight ~ N(0, 0.001)
        "reg_w2": 0.001 * jax.random.normal(ks[5], (REG_FC, REG_CHANNEL), jnp.float32),
        "reg_b2": jnp.zeros((1, REG_CHANNEL), jnp.float32),
    }


def _prepare_kernel_params(params):
    """Transpose / merge / pad weights into kernel layout (MXU weights in bf16)."""
    bf16 = jnp.bfloat16
    # Channels-major backbone weights.
    w_bb1t = params["bb_w1"].T                                   # (128, 3)  f32
    b_bb1 = params["bb_b1"].reshape(FEAT_CH, 1)                  # (128, 1)  f32
    w_bb2t = params["bb_w2"].T.astype(bf16)                      # (128,128) bf16
    b_bb2 = params["bb_b2"].reshape(FEAT_CH, 1)                  # (128, 1)  f32
    # Combined head layer 1: hidden = [cls_hidden | reg_hidden].
    w_h1 = jnp.concatenate([params["cls_w1"], params["reg_w1"]], axis=1).astype(bf16)
    b_h1 = jnp.concatenate([params["cls_b1"], params["reg_b1"]], axis=1)      # (1,256)
    # Reg layer 2 padded into lanes 1..76 of a 128-wide slab; lane 0 = cls slot.
    w_reg2 = jnp.zeros((REG_FC, HEAD_PAD), jnp.float32)
    w_reg2 = w_reg2.at[:, 1:1 + REG_CHANNEL].set(params["reg_w2"]).astype(bf16)
    b_h2 = jnp.zeros((1, HEAD_PAD), jnp.float32)
    b_h2 = b_h2.at[:, 0:1].set(params["cls_b2"])
    b_h2 = b_h2.at[:, 1:1 + REG_CHANNEL].set(params["reg_b2"])
    # Cls layer 2 as a VPU row (single output channel).
    w_cls2 = params["cls_w2"].reshape(1, CLS_FC)                 # (1, 128)  f32
    return w_bb1t, b_bb1, w_bb2t, b_bb2, w_h1, b_h1, w_reg2, b_h2, w_cls2


# ----------------------------- forward ----------------------------------------
def rpn_forward(params, pts_input, *, tm=2048, out_dtype=jnp.bfloat16):
    """pts_input: (B, N, 3[+extra]) float32.  Returns the PyTorch ret_dict."""
    B, N, _ = pts_input.shape
    backbone_xyz = pts_input[:, :, :3]                           # (B, N, 3)
    xyz_t = jnp.transpose(backbone_xyz, (0, 2, 1))               # (B, 3, N) — 12 B/pt

    kp = _prepare_kernel_params(params)
    feat_ncw, head, n_pad = rpn_fused(xyz_t, *kp, tm=tm, out_dtype=out_dtype)

    # NOTE(perf): when tm divides N (e.g. production N=16384 with tm=2048) no
    # padding happens and backbone_features is returned without an extra copy.
    # rpn_cls / rpn_reg below are thin lane-slices of the padded head slab;
    # downstream consumers that can index the 128-wide slab directly should do
    # so to avoid the extra HBM pass.
    backbone_features = feat_ncw if n_pad == N else feat_ncw[:, :, :N]   # (B, C, N)
    rpn_cls = head[:, :N, 0:1]                                   # (B, N, 1)
    rpn_reg = head[:, :N, 1:1 + REG_CHANNEL]                     # (B, N, 76)

    return {
        "rpn_cls": rpn_cls,
        "rpn_reg": rpn_reg,
        "backbone_xyz": backbone_xyz,
        "backbone_features": backbone_features,
    }


# ----------------------------- demo -------------------------------------------
if __name__ == "__main__":
    key = jax.random.PRNGKey(0)
    k_param, k_pts = jax.random.split(key)

    B, N = 2, 512            # small stand-in for (B, 16384, 3); tm divides N
    pts_input = jax.random.normal(k_pts, (B, N, 3), jnp.float32)
    params = init_params(k_param)

    out = jax.jit(rpn_forward)(params, pts_input)
    jax.block_until_ready(out)

    # sanity checks vs. a pure-JAX f32 reference of the same math
    def ref_mlp(x, w1, b1, w2, b2, relu_out=False):
        h = jnp.maximum(x @ w1 + b1, 0.0)
        y = h @ w2 + b2
        return jnp.maximum(y, 0.0) if relu_out else y

    x = pts_input[:, :, :3].reshape(B * N, 3)
    feats_ref = ref_mlp(x, params["bb_w1"], params["bb_b1"],
                        params["bb_w2"], params["bb_b2"], relu_out=True)
    cls_ref = ref_mlp(feats_ref, params["cls_w1"], params["cls_b1"],
                      params["cls_w2"], params["cls_b2"]).reshape(B, N, 1)
    reg_ref = ref_mlp(feats_ref, params["reg_w1"], params["reg_b1"],
                      params["reg_w2"], params["reg_b2"]).reshape(B, N, REG_CHANNEL)
    feats_ncw_ref = feats_ref.reshape(B, N, FEAT_CH).transpose(0, 2, 1)

    assert out["rpn_cls"].shape == (B, N, 1)
    assert out["rpn_reg"].shape == (B, N, REG_CHANNEL)
    assert out["backbone_features"].shape == (B, FEAT_CH, N)
    assert out["backbone_xyz"].shape == (B, N, 3)

    # bf16 MXU inputs + bf16 output storage -> relaxed tolerances (expected
    # precision trade per the performance review, not a bug).
    atol, rtol = 5e-3, 3e-2
    assert jnp.allclose(out["rpn_cls"].astype(jnp.float32), cls_ref, atol=atol, rtol=rtol)
    assert jnp.allclose(out["rpn_reg"].astype(jnp.float32), reg_ref, atol=atol, rtol=rtol)
    assert jnp.allclose(out["backbone_features"].astype(jnp.float32), feats_ncw_ref,
                        atol=atol, rtol=rtol)

    print("KERNEL_OK")
</pallas_src>

<mosaic_0001>
module attributes {stable_mosaic.version = 11 : i64} {
  func.func @rpn_fused_kernel(%arg0: i32, %arg1: i32, %arg2: memref<1x3x512xf32, #tpu.memory_space<vmem>>, %arg3: memref<128x3xf32, #tpu.memory_space<vmem>>, %arg4: memref<128x1xf32, #tpu.memory_space<vmem>>, %arg5: memref<128x128xbf16, #tpu.memory_space<vmem>>, %arg6: memref<128x1xf32, #tpu.memory_space<vmem>>, %arg7: memref<128x256xbf16, #tpu.memory_space<vmem>>, %arg8: memref<1x256xf32, #tpu.memory_space<vmem>>, %arg9: memref<128x128xbf16, #tpu.memory_space<vmem>>, %arg10: memref<1x128xf32, #tpu.memory_space<vmem>>, %arg11: memref<1x128xf32, #tpu.memory_space<vmem>>, %arg12: memref<1x128x512xbf16, #tpu.memory_space<vmem>>, %arg13: memref<1x512x128xbf16, #tpu.memory_space<vmem>>) attributes {dimension_semantics = [#tpu.dimension_semantics<parallel>, #tpu.dimension_semantics<parallel>], iteration_bounds = array<i64: 2, 1>, scalar_prefetch = 0 : i64, scratch_operands = 0 : i64, tpu.core_type = #tpu.core_type<tc>, window_params = [{transform_indices = @transform_0, window_bounds = array<i64: 1, 3, 512>}, {pipeline_mode = #tpu.pipeline_mode<synchronous>, transform_indices = @transform_1, window_bounds = array<i64: 128, 3>}, {pipeline_mode = #tpu.pipeline_mode<synchronous>, transform_indices = @transform_2, window_bounds = array<i64: 128, 1>}, {pipeline_mode = #tpu.pipeline_mode<synchronous>, transform_indices = @transform_3, window_bounds = array<i64: 128, 128>}, {pipeline_mode = #tpu.pipeline_mode<synchronous>, transform_indices = @transform_4, window_bounds = array<i64: 128, 1>}, {pipeline_mode = #tpu.pipeline_mode<synchronous>, transform_indices = @transform_5, window_bounds = array<i64: 128, 256>}, {pipeline_mode = #tpu.pipeline_mode<synchronous>, transform_indices = @transform_6, window_bounds = array<i64: 1, 256>}, {pipeline_mode = #tpu.pipeline_mode<synchronous>, transform_indices = @transform_7, window_bounds = array<i64: 128, 128>}, {pipeline_mode = #tpu.pipeline_mode<synchronous>, transform_indices = @transform_8, window_bounds = array<i64: 1, 128>}, {pipeline_mode = #tpu.pipeline_mode<synchronous>, transform_indices = @transform_9, window_bounds = array<i64: 1, 128>}, {transform_indices = @transform_10, window_bounds = array<i64: 1, 128, 512>}, {transform_indices = @transform_11, window_bounds = array<i64: 1, 512, 128>}]} {
    %c0 = arith.constant 0 : index
    %c0_0 = arith.constant 0 : index
    %c0_1 = arith.constant 0 : index
    %0 = vector.load %arg2[%c0, %c0_0, %c0_1] : memref<1x3x512xf32, #tpu.memory_space<vmem>>, vector<1x3x512xf32>
    %1 = vector.shape_cast %0 : vector<1x3x512xf32> to vector<3x512xf32>
    %c0_2 = arith.constant 0 : index
    %c0_3 = arith.constant 0 : index
    %2 = vector.load %arg3[%c0_2, %c0_3] : memref<128x3xf32, #tpu.memory_space<vmem>>, vector<128x3xf32>
    %c0_4 = arith.constant 0 : index
    %c0_5 = arith.constant 0 : index
    %3 = vector.load %arg4[%c0_4, %c0_5] : memref<128x1xf32, #tpu.memory_space<vmem>>, vector<128x1xf32>
    %4 = vector.extract_strided_slice %2 {offsets = [0, 0], sizes = [128, 1], strides = [1, 1]} : vector<128x3xf32> to vector<128x1xf32>
    %5 = vector.extract_strided_slice %1 {offsets = [0, 0], sizes = [1, 512], strides = [1, 1]} : vector<3x512xf32> to vector<1x512xf32>
    %6 = vector.broadcast %4 : vector<128x1xf32> to vector<128x512xf32>
    %7 = vector.broadcast %5 : vector<1x512xf32> to vector<128x512xf32>
    %8 = arith.mulf %6, %7 : vector<128x512xf32>
    %9 = vector.broadcast %3 : vector<128x1xf32> to vector<128x512xf32>
    %10 = arith.addf %9, %8 : vector<128x512xf32>
    %11 = vector.extract_strided_slice %2 {offsets = [0, 1], sizes = [128, 1], strides = [1, 1]} : vector<128x3xf32> to vector<128x1xf32>
    %12 = vector.extract_strided_slice %1 {offsets = [1, 0], sizes = [1, 512], strides = [1, 1]} : vector<3x512xf32> to vector<1x512xf32>
    %13 = vector.broadcast %11 : vector<128x1xf32> to vector<128x512xf32>
    %14 = vector.broadcast %12 : vector<1x512xf32> to vector<128x512xf32>
    %15 = arith.mulf %13, %14 : vector<128x512xf32>
    %16 = arith.addf %10, %15 : vector<128x512xf32>
    %17 = vector.extract_strided_slice %2 {offsets = [0, 2], sizes = [128, 1], strides = [1, 1]} : vector<128x3xf32> to vector<128x1xf32>
    %18 = vector.extract_strided_slice %1 {offsets = [2, 0], sizes = [1, 512], strides = [1, 1]} : vector<3x512xf32> to vector<1x512xf32>
    %19 = vector.broadcast %17 : vector<128x1xf32> to vector<128x512xf32>
    %20 = vector.broadcast %18 : vector<1x512xf32> to vector<128x512xf32>
    %21 = arith.mulf %19, %20 : vector<128x512xf32>
    %22 = arith.addf %16, %21 : vector<128x512xf32>
    %cst = arith.constant 0.000000e+00 : f32
    %23 = vector.broadcast %cst : f32 to vector<128x512xf32>
    %24 = arith.maximumf %22, %23 : vector<128x512xf32>
    %c0_6 = arith.constant 0 : index
    %c0_7 = arith.constant 0 : index
    %25 = vector.load %arg5[%c0_6, %c0_7] : memref<128x128xbf16, #tpu.memory_space<vmem>>, vector<128x128xbf16>
    %26 = arith.truncf %24 : vector<128x512xf32> to vector<128x512xbf16>
    %cst_8 = arith.constant dense<0.000000e+00> : vector<128x512xf32>
    %27 = tpu.matmul %25, %26, %cst_8 {dimension_numbers = #tpu.dot_dimension_numbers<[1], [0], [0], [1], [0, 0, 1, 1], [], []>} : vector<128x128xbf16>, vector<128x512xbf16>, vector<128x512xf32> -> vector<128x512xf32>
    %c0_9 = arith.constant 0 : index
    %c0_10 = arith.constant 0 : index
    %28 = vector.load %arg6[%c0_9, %c0_10] : memref<128x1xf32, #tpu.memory_space<vmem>>, vector<128x1xf32>
    %29 = vector.broadcast %28 : vector<128x1xf32> to vector<128x512xf32>
    %30 = arith.addf %27, %29 : vector<128x512xf32>
    %cst_11 = arith.constant 0.000000e+00 : f32
    %31 = vector.broadcast %cst_11 : f32 to vector<128x512xf32>
    %32 = arith.maximumf %30, %31 : vector<128x512xf32>
    %33 = arith.truncf %32 : vector<128x512xf32> to vector<128x512xbf16>
    %c0_12 = arith.constant 0 : index
    %c0_13 = arith.constant 0 : index
    %c0_14 = arith.constant 0 : index
    %34 = vector.load %arg12[%c0_12, %c0_13, %c0_14] : memref<1x128x512xbf16, #tpu.memory_space<vmem>>, vector<1x128x512xbf16>
    %35 = vector.shape_cast %34 : vector<1x128x512xbf16> to vector<128x512xbf16>
    %36 = vector.shape_cast %33 : vector<128x512xbf16> to vector<1x128x512xbf16>
    tpu.vector_store %arg12[%c0_12, %c0_13, %c0_14], %36 {strides = array<i32>} : memref<1x128x512xbf16, #tpu.memory_space<vmem>>, vector<1x128x512xbf16>,
    %37 = tpu.transpose %33, [1, 0] : vector<128x512xbf16> -> vector<512x128xbf16>
    %c0_15 = arith.constant 0 : index
    %c0_16 = arith.constant 0 : index
    %38 = vector.load %arg7[%c0_15, %c0_16] : memref<128x256xbf16, #tpu.memory_space<vmem>>, vector<128x256xbf16>
    %cst_17 = arith.constant dense<0.000000e+00> : vector<512x256xf32>
    %39 = tpu.matmul %37, %38, %cst_17 {dimension_numbers = #tpu.dot_dimension_numbers<[1], [0], [0], [1], [0, 0, 1, 1], [], []>} : vector<512x128xbf16>, vector<128x256xbf16>, vector<512x256xf32> -> vector<512x256xf32>
    %c0_18 = arith.constant 0 : index
    %c0_19 = arith.constant 0 : index
    %40 = vector.load %arg8[%c0_18, %c0_19] : memref<1x256xf32, #tpu.memory_space<vmem>>, vector<1x256xf32>
    %41 = vector.broadcast %40 : vector<1x256xf32> to vector<512x256xf32>
    %42 = arith.addf %39, %41 : vector<512x256xf32>
    %cst_20 = arith.constant 0.000000e+00 : f32
    %43 = vector.broadcast %cst_20 : f32 to vector<512x256xf32>
    %44 = arith.maximumf %42, %43 : vector<512x256xf32>
    %45 = vector.extract_strided_slice %44 {offsets = [0, 0], sizes = [512, 128], strides = [1, 1]} : vector<512x256xf32> to vector<512x128xf32>
    %46 = vector.extract_strided_slice %44 {offsets = [0, 128], sizes = [512, 128], strides = [1, 1]} : vector<512x256xf32> to vector<512x128xf32>
    %47 = arith.truncf %46 : vector<512x128xf32> to vector<512x128xbf16>
    %c0_21 = arith.constant 0 : index
    %c0_22 = arith.constant 0 : index
    %48 = vector.load %arg9[%c0_21, %c0_22] : memref<128x128xbf16, #tpu.memory_space<vmem>>, vector<128x128xbf16>
    %cst_23 = arith.constant dense<0.000000e+00> : vector<512x128xf32>
    %49 = tpu.matmul %47, %48, %cst_23 {dimension_numbers = #tpu.dot_dimension_numbers<[1], [0], [0], [1], [0, 0, 1, 1], [], []>} : vector<512x128xbf16>, vector<128x128xbf16>, vector<512x128xf32> -> vector<512x128xf32>
    %c0_24 = arith.constant 0 : index
    %c0_25 = arith.constant 0 : index
    %50 = vector.load %arg10[%c0_24, %c0_25] : memref<1x128xf32, #tpu.memory_space<vmem>>, vector<1x128xf32>
    %51 = vector.broadcast %50 : vector<1x128xf32> to vector<512x128xf32>
    %52 = arith.addf %49, %51 : vector<512x128xf32>
    %c0_26 = arith.constant 0 : index
    %c0_27 = arith.constant 0 : index
    %53 = vector.load %arg11[%c0_26, %c0_27] : memref<1x128xf32, #tpu.memory_space<vmem>>, vector<1x128xf32>
    %54 = vector.broadcast %53 : vector<1x128xf32> to vector<512x128xf32>
    %55 = arith.mulf %45, %54 : vector<512x128xf32>
    %cst_28 = arith.constant dense<0.000000e+00> : vector<512xf32>
    %56 = vector.multi_reduction <add>, %55, %cst_28 [1] : vector<512x128xf32> to vector<512xf32>
    %57 = vector.shape_cast %56 : vector<512xf32> to vector<512x1xf32>
    %58 = tpu.iota {dimensions = array<i32: 1>} : vector<512x128xi32>
    %c0_i32 = arith.constant 0 : i32
    %59 = vector.broadcast %c0_i32 : i32 to vector<512x128xi32>
    %60 = arith.cmpi eq, %58, %59 : vector<512x128xi32>
    %61 = vector.broadcast %57 : vector<512x1xf32> to vector<512x128xf32>
    %62 = arith.addf %52, %61 : vector<512x128xf32>
    %63 = arith.select %60, %62, %52 : vector<512x128xi1>, vector<512x128xf32>
    %64 = arith.truncf %63 : vector<512x128xf32> to vector<512x128xbf16>
    %c0_29 = arith.constant 0 : index
    %c0_30 = arith.constant 0 : index
    %c0_31 = arith.constant 0 : index
    %65 = vector.load %arg13[%c0_29, %c0_30, %c0_31] : memref<1x512x128xbf16, #tpu.memory_space<vmem>>, vector<1x512x128xbf16>
    %66 = vector.shape_cast %65 : vector<1x512x128xbf16> to vector<512x128xbf16>
    %67 = vector.shape_cast %64 : vector<512x128xbf16> to vector<1x512x128xbf16>
    tpu.vector_store %arg13[%c0_29, %c0_30, %c0_31], %67 {strides = array<i32>} : memref<1x512x128xbf16, #tpu.memory_space<vmem>>, vector<1x512x128xbf16>,
    return
  }
  func.func @transform_0(%arg0: i32, %arg1: i32) -> (i32, i32, i32) {
    %c0_i32 = arith.constant 0 : i32
    %c0_i32_0 = arith.constant 0 : i32
    return %arg0, %c0_i32, %arg1 : i32, i32, i32
  }
  func.func @transform_1(%arg0: i32, %arg1: i32) -> (i32, i32) {
    %c0_i32 = arith.constant 0 : i32
    %c0_i32_0 = arith.constant 0 : i32
    %c0_i32_1 = arith.constant 0 : i32
    return %c0_i32, %c0_i32_0 : i32, i32
  }
  func.func @transform_2(%arg0: i32, %arg1: i32) -> (i32, i32) {
    %c0_i32 = arith.constant 0 : i32
    %c0_i32_0 = arith.constant 0 : i32
    %c0_i32_1 = arith.constant 0 : i32
    return %c0_i32, %c0_i32_0 : i32, i32
  }
  func.func @transform_3(%arg0: i32, %arg1: i32) -> (i32, i32) {
    %c0_i32 = arith.constant 0 : i32
    %c0_i32_0 = arith.constant 0 : i32
    %c0_i32_1 = arith.constant 0 : i32
    return %c0_i32, %c0_i32_0 : i32, i32
  }
  func.func @transform_4(%arg0: i32, %arg1: i32) -> (i32, i32) {
    %c0_i32 = arith.constant 0 : i32
    %c0_i32_0 = arith.constant 0 : i32
    %c0_i32_1 = arith.constant 0 : i32
    return %c0_i32, %c0_i32_0 : i32, i32
  }
  func.func @transform_5(%arg0: i32, %arg1: i32) -> (i32, i32) {
    %c0_i32 = arith.constant 0 : i32
    %c0_i32_0 = arith.constant 0 : i32
    %c0_i32_1 = arith.constant 0 : i32
    return %c0_i32, %c0_i32_0 : i32, i32
  }
  func.func @transform_6(%arg0: i32, %arg1: i32) -> (i32, i32) {
    %c0_i32 = arith.constant 0 : i32
    %c0_i32_0 = arith.constant 0 : i32
    %c0_i32_1 = arith.constant 0 : i32
    return %c0_i32, %c0_i32_0 : i32, i32
  }
  func.func @transform_7(%arg0: i32, %arg1: i32) -> (i32, i32) {
    %c0_i32 = arith.constant 0 : i32
    %c0_i32_0 = arith.constant 0 : i32
    %c0_i32_1 = arith.constant 0 : i32
    return %c0_i32, %c0_i32_0 : i32, i32
  }
  func.func @transform_8(%arg0: i32, %arg1: i32) -> (i32, i32) {
    %c0_i32 = arith.constant 0 : i32
    %c0_i32_0 = arith.constant 0 : i32
    %c0_i32_1 = arith.constant 0 : i32
    return %c0_i32, %c0_i32_0 : i32, i32
  }
  func.func @transform_9(%arg0: i32, %arg1: i32) -> (i32, i32) {
    %c0_i32 = arith.constant 0 : i32
    %c0_i32_0 = arith.constant 0 : i32
    %c0_i32_1 = arith.constant 0 : i32
    return %c0_i32, %c0_i32_0 : i32, i32
  }
  func.func @transform_10(%arg0: i32, %arg1: i32) -> (i32, i32, i32) {
    %c0_i32 = arith.constant 0 : i32
    %c0_i32_0 = arith.constant 0 : i32
    return %arg0, %c0_i32, %arg1 : i32, i32, i32
  }
  func.func @transform_11(%arg0: i32, %arg1: i32) -> (i32, i32, i32) {
    %c0_i32 = arith.constant 0 : i32
    %c0_i32_0 = arith.constant 0 : i32
    return %arg0, %arg1, %c0_i32 : i32, i32, i32
  }
}

</mosaic_0001>

<bundles_post_ra>
// kernel: rpn_forward.1
= control target key start
LH: loop header
LB: loop body
LE: loop exit
PB: predicated region body
PF: predicated region fallthrough
CT: control target
= control target key end

     0   :  { %s6464_s0 = inlined_call_operand.vmem [shape: f32[2,3,512], index: 0, kind: input, shape index: {}]   ;;  %s6465_s1 = inlined_call_operand.vmem [shape: f32[128,3], index: 1, kind: input, shape index: {}]   ;;  %s6466_s2 = inlined_call_operand.vmem [shape: f32[128,1], index: 2, kind: input, shape index: {}]   ;;  %s6467_s3 = inlined_call_operand.vmem [shape: bf16[128,128], index: 3, kind: input, shape index: {}]   ;;  %s6468_s4 = inlined_call_operand.vmem [shape: f32[128,1], index: 4, kind: input, shape index: {}]   ;;  %s6469_s5 = inlined_call_operand.vmem [shape: bf16[128,256], index: 5, kind: input, shape index: {}]   ;;  %s6470_s6 = inlined_call_operand.vmem [shape: f32[1,256], index: 6, kind: input, shape index: {}]   ;;  %s6471_s7 = inlined_call_operand.vmem [shape: bf16[128,128], index: 7, kind: input, shape index: {}]   ;;  %s6472_s8 = inlined_call_operand.vmem [shape: f32[1,128], index: 8, kind: input, shape index: {}]   ;;  %s6473_s9 = inlined_call_operand.vmem [shape: f32[1,128], index: 9, kind: input, shape index: {}]   ;;  %s6474_s10 = inlined_call_operand.hbm [shape: bf16[2,128,512], index: 10, kind: output, shape index: {0}]   ;;  %s6475_s11 = inlined_call_operand.vmem [shape: bf16[2,512,128], index: 11, kind: output, shape index: {1}]  }
   0x1   :  { %6495 = sst [smem:[#allocation23_spill]] %s6464_s0 }
   0x2   :  { %6496 = sst [smem:[#allocation24_spill]] %s6465_s1 }
   0x3   :  { %17 = vsyncpa [#allocation3], 0 }
   0x4   :  { %19 = vsyncpa [#allocation3 + $0x1], 0  ;;  %s4705_s17 = smov 0   ;;  %s4707_s18 = smov 0  }
   0x5   :  { %s4709_s19 = smov 0   ;;  %s4711_s20 = smov 0  }
   0x6   :  { %s4713_s21 = smov 0   ;;  %s4715_s22 = smov 0  }
   0x7 LB: > { %s3867_s23 = sadd.s32 4294967295, %s4637_s22   ;;  %s3868_s24 = sadd.s32 4294967294, %s4637_s22   ;;  %s4637_s22 = sphi %s4715_s22, %s25_s22   ;;  %s4633_s21 = sphi %s4713_s21, %s6546_s21   ;;  %s4629_s20 = sphi %s4711_s20, %s6545_s20   ;;  %s4625_s19 = sphi %s4709_s19, %s6544_s19   ;;  %s4621_s18 = sphi %s4707_s18, %s6543_s18   ;;  %s4617_s17 = sphi %s4705_s17, %s6542_s17  }
   0x8   : > { %s37_s25 = sadd.s32 1, %s4633_s21  ;;  %s263_s26 = sadd.s32 1, %s4625_s19 }
   0x9   : > { %p39_p0 = scmp.ge.s32.totalorder %s37_s25, 2  ;;  %p273_p1 = scmp.ne.s32.totalorder %s4625_s19, %s4621_s18 }
   0xa   : > { %p274_p2 = scmp.eq.s32.totalorder %s3867_s23, 1  ;;  %p279_p3 = scmp.ne.s32.totalorder %s4621_s18, %s4617_s17 }
   0xb   : > { %s6548_s25 = smov (%p39_p0, %s37_s25), 0  ;;  %p280_p5 = scmp.eq.s32.totalorder %s3868_s24, 1 }
   0xc   : > { %p4745_p4 = por %p274_p2, %p273_p1  ;;  %s258_s28 = ssub.s32 %s4633_s21, %s6548_s25 }
   0xd   : > { %p3871_p6 = scmp.ge.s32.totalorder %s4637_s22, 1  ;;  %p261_p7 = scmp.eq.s32.totalorder %s258_s28, 0 }
   0xe   : > { %p4752_p8 = por %p280_p5, %p279_p3  ;;  %p366_p9 = scmp.lt.s32.totalorder %s4637_s22, 3 }
   0xf   : > { %s4758_s30 = scalar_select %p261_p7, %s4625_s19, %s263_s26  }
  0x10   : > { %p367_p10 = pnand %p3871_p6, %p366_p9 }
  0x12   : > { %370 = sbr.rel (%p367_p10) target bundleno = 1392 (0x570), region = 60 }
  0x19   : > { %v459_v0 = vld [vmem:[%s6466_s2] sm:$0xff]  ;;  %s6499_s1 = sld [smem:[#allocation24_spill]]  ;;  %v6476_v2 = vlaneseq  ;;  %v6477_v3 = vmov 0   ;;  %p420_p11 = scmp.lt.s32.totalorder %s4629_s20, 1  ;;  %v460_v5 = vld [vmem:[%s6466_s2 + $0x8] sm:$0xff]  ;;  %v4640_v13 = vmov 1  }
  0x1a   : > { %4483 = vset.pattern.permute.xlu1 %v6477_v3  ;;  %4482 = vset.pattern.permute.xlu0 %v6477_v3  ;;  %s6501_s0 = sld [smem:[#allocation23_spill]]  ;;  %v461_v14 = vld [vmem:[%s6466_s2 + $0x10] sm:$0xff]  ;;  %v463_v27 = vld [vmem:[%s6466_s2 + $0x20] sm:$0xff]  ;;  %v6479_v32 = vmov 2   ;;  %v462_v34 = vld [vmem:[%s6466_s2 + $0x18] sm:$0xff] }
  0x1b   : > { %659 = vperm.xlu1 %4483, %v459_v0   ;;  %v4773_v4 = vshrl.u32 %v6476_v2, 7  ;;  %s4782_s28 = scalar_select %p420_p11, %s4629_s20, 1  ;;  %1545 = vmatprep.mubr.bf16.mxu1 %v6477_v3  ;;  %v465_v35 = vld [vmem:[%s6466_s2 + $0x30] sm:$0xff]  ;;  %v467_v37 = vld [vmem:[%s6466_s2 + $0x40] sm:$0xff]  ;;  %v464_v42 = vld [vmem:[%s6466_s2 + $0x28] sm:$0xff] }
  0x1c   : > { %2231 = vmatprep.mubr.bf16.mxu0 %v6477_v3  ;;  %v469_v40 = vld [vmem:[%s6466_s2 + $0x50] sm:$0xff]  ;;  %v471_v43 = vld [vmem:[%s6466_s2 + $0x60] sm:$0xff]  ;;  %v466_v47 = vld [vmem:[%s6466_s2 + $0x38] sm:$0xff] }
  0x1d   : > { %s4012_s12 = sshll.u32 %s4782_s28, 4  ;;  %v4788_v7 = vsub.s32 0, %v4773_v4  ;;  %v563_v8 = vsub.s32 4, %v4773_v4  ;;  %v4800_v10 = vsub.s32 1, %v4773_v4  ;;  %v871_v12 = vsub.s32 5, %v4773_v4  ;;  %v473_v45 = vld [vmem:[%s6466_s2 + $0x70] sm:$0xff] }
  0x1e   : > { %v4838_v25 = vsub.s32 2, %v4773_v4  ;;  %v1099_v26 = vsub.s32 6, %v4773_v4  ;;  %v468_v52 = vld [vmem:[%s6466_s2 + $0x48] sm:$0xff]  ;;  %v470_v53 = vld [vmem:[%s6466_s2 + $0x58] sm:$0xff] }
  0x1f   : > { %v4766_v1 = vld [vmem:[%s6499_s1] sm:$0xff]  ;;  %v444_v6 = vld [vmem:[%s6499_s1 + $0x8] sm:$0xff]  ;;  %664 = vperm.xlu1 %4483, %v460_v5   ;;  %6500 = vst [vmem:[#allocation5_spill] sm:$0xff] %v4788_v7  ;;  %v446_v9 = vld [vmem:[%s6499_s1 + $0x18] sm:$0xff] }
  0x20   : > { %477 = vperm.xlu0 %4482, %v4766_v1   ;;  %s4794_s15 = scalar_lea.vmem %s6501_s0, %s4012_s12  ;;  %6502 = vst [vmem:[#allocation6_spill] sm:$0xff] %v4800_v10  ;;  %v4814_v17 = vld [vmem:[%s6499_s1 + $0x10] sm:$0xff]  ;;  %v4826_v21 = vld [vmem:[%s6499_s1 + $0x28] sm:$0xff]  ;;  %v4860_v33 = vld [vmem:[%s6499_s1 + $0x38] sm:$0xff]  ;;  %s6494_s0 = sand.u32 1, %s4621_s18  }
  0x21   : > { %v442_v11 = vld [vmem:[%s4794_s15 + $0x8] sm:$0x77]  ;;  %v447_v38 = vld [vmem:[%s6499_s1 + $0x20] sm:$0xff]  ;;  %v4887_v39 = vld [vmem:[%s6499_s1 + $0x58] sm:$0xff]  ;;  %s3872_s24 = sshll.u32 %s6494_s0, 8  ;;  %s4013_s0 = sshll.u32 %s4782_s28, 8 }
  0x22   : > { %v568_v15 = vrot.slane %v442_v11, %v4788_v7  ;;  %v572_v16 = vrot.slane %v442_v11, %v563_v8  ;;  %v876_v20 = vrot.slane %v442_v11, %v4800_v10  ;;  %v880_v22 = vrot.slane %v442_v11, %v871_v12  ;;  %v4873_v36 = vld [vmem:[%s6499_s1 + $0x48] sm:$0xff]  ;;  %v4911_v44 = vld [vmem:[%s6499_s1 + $0x78] sm:$0xff]  ;;  %v449_v46 = vld [vmem:[%s6499_s1 + $0x30] sm:$0xff]  ;;  %s5773_s14 = scalar_lea.vmem [#allocation2], %s3872_s24  ;;  %s6170_s16 = scalar_lea.vmem %s6475_s11, %s4013_s0 }
  0x23   : > { %4484 = vset.pattern.permute.xlu1 %v4640_v13  ;;  %v1104_v28 = vrot.slane %v442_v11, %v4838_v25  ;;  %v1108_v29 = vrot.slane %v442_v11, %v1099_v26  ;;  %v4898_v41 = vld [vmem:[%s6499_s1 + $0x68] sm:$0xff]  ;;  %v451_v48 = vld [vmem:[%s6499_s1 + $0x40] sm:$0xff]  ;;  %v453_v49 = vld [vmem:[%s6499_s1 + $0x50] sm:$0xff]  ;;  %s3747_s13 = sshll.u32 %s5773_s14, 4  ;;  %s6541_s0 = sand.u32 1, %s4621_s18   ;;  %s6302_s13 = int_to_ptr.vmem [resolvable:$true] %s3747_s13 }
  0x24   : > { %482 = vperm.xlu0 %4482, %v444_v6   ;;  %806 = vperm.xlu1 %4484, %v444_v6   ;;  %v4817_v18 = vrot.slane %v568_v15, %v4788_v7  ;;  %v4820_v19 = vrot.slane %v572_v16, %v4788_v7  ;;  %v4831_v23 = vrot.slane %v876_v20, %v4800_v10  ;;  %v4944_v50 = vld [vmem:[%s6499_s1 + $0x60] sm:$0xff]  ;;  %v4951_v51 = vld [vmem:[%s6499_s1 + $0x70] sm:$0xff]  ;;  %s6306_s24 = scalar_lea.sflag [#allocation3], %s6541_s0  ;;  %s4559_s28 = scalar_lea.vmem %s6302_s13, 4096 }
  0x25   : > { %v4835_v24 = vrot.slane %v880_v22, %v4800_v10  ;;  %v4850_v30 = vrot.slane %v1104_v28, %v4838_v25  ;;  %v4853_v31 = vrot.slane %v1108_v29, %v4838_v25  ;;  %p4560_p12 = scmp.ne.s32.totalorder %s6302_s13, %s4559_s28 }
  0x27   : > { %6503 = vst [vmem:[#allocation7_spill] sm:$0xff] %v4850_v30  ;;  %6504 = vst [vmem:[#allocation8_spill] sm:$0xff] %v4853_v31  ;;  %p4561_p13 = pnand %p4560_p12, %p4745_p4 }
  0x28   : > { %492 = vperm.xlu0 %4482, %v446_v9   ;;  %4485 = vset.pattern.permute.xlu1 %v6477_v3 }
  0x29   : > { %487 = vperm.xlu1 %4485, %v4814_v17   ;;  %p4562_p0 = pneg %p4561_p13 }
  0x2c   : > { %669 = vperm.xlu0 %4482, %v461_v14  }
  0x2d   : > { %4486 = vset.pattern.permute.xlu1 %v6479_v32 }
  0x2e   : > { %1030 = vperm.xlu1 %4486, %v4766_v1  }
  0x30   : > { %502 = vperm.xlu0 %4482, %v4826_v21  }
  0x32   : > { %1034 = vperm.xlu1 %4486, %v444_v6  }
  0x34   : > { %679 = vperm.xlu0 %4482, %v463_v27   ;;  %v472_v27 = vld [vmem:[%s6466_s2 + $0x68] sm:$0xff] }
  0x36   : > { %4487 = vset.pattern.permute.xlu1 %v6477_v3 }
  0x37   : > { %674 = vperm.xlu1 %4487, %v462_v34  }
  0x38   : > { %512 = vperm.xlu0 %4482, %v4860_v33  }
  0x3b   : > { %4488 = vset.pattern.permute.xlu1 %v4640_v13 }
  0x3c   : > { %689 = vperm.xlu0 %4482, %v465_v35   ;;  %814 = vperm.xlu1 %4488, %v446_v9  }
  0x40   : > { %522 = vperm.xlu0 %4482, %v4873_v36   ;;  %4489 = vset.pattern.permute.xlu1 %v6477_v3 }
  0x41   : > { %497 = vperm.xlu1 %4489, %v447_v38  }
  0x44   : > { %699 = vperm.xlu0 %4482, %v467_v37  }
  0x45   : > { %4490 = vset.pattern.permute.xlu1 %v6479_v32 }
  0x46   : > { %1038 = vperm.xlu1 %4490, %v4814_v17  }
  0x48   : > { %532 = vperm.xlu0 %4482, %v4887_v39  }
  0x4a   : > { %1042 = vperm.xlu1 %4490, %v446_v9  }
  0x4c   : > { %709 = vperm.xlu0 %4482, %v469_v40  }
  0x4e   : > { %4491 = vset.pattern.permute.xlu1 %v6477_v3 }
  0x4f   : > { %684 = vperm.xlu1 %4491, %v464_v42  }
  0x50   : > { %542 = vperm.xlu0 %4482, %v4898_v41  }
  0x53   : > { %4492 = vset.pattern.permute.xlu1 %v4640_v13 }
  0x54   : > { %719 = vperm.xlu0 %4482, %v471_v43   ;;  %822 = vperm.xlu1 %4492, %v4826_v21  }
  0x58   : > { %552 = vperm.xlu0 %4482, %v4911_v44   ;;  %4493 = vset.pattern.permute.xlu1 %v6477_v3 }
  0x59   : > { %507 = vperm.xlu1 %4493, %v449_v46  }
  0x5c   : > { %729 = vperm.xlu0 %4482, %v473_v45  }
  0x5d   : > { %4494 = vset.pattern.permute.xlu1 %v6479_v32 }
  0x5e   : > { %1046 = vperm.xlu1 %4494, %v447_v38  }
  0x60   : > { %4511 = vset.pattern.permute.xlu0 %v4640_v13 }
  0x61   : > { %802 = vperm.xlu0 %4511, %v4766_v1  }
  0x62   : > { %1050 = vperm.xlu1 %4494, %v4826_v21  }
  0x65   : > { %810 = vperm.xlu0 %4511, %v4814_v17  }
  0x66   : > { %4495 = vset.pattern.permute.xlu1 %v6477_v3 }
  0x67   : > { %694 = vperm.xlu1 %4495, %v466_v47  }
  0x69   : > { %818 = vperm.xlu0 %4511, %v447_v38  }
  0x6b   : > { %4496 = vset.pattern.permute.xlu1 %v4640_v13 }
  0x6c   : > { %830 = vperm.xlu1 %4496, %v4860_v33  }
  0x6d   : > { %826 = vperm.xlu0 %4511, %v449_v46  }
  0x70   : > { %4497 = vset.pattern.permute.xlu1 %v6477_v3 }
  0x71   : > { %834 = vperm.xlu0 %4511, %v451_v48   ;;  %517 = vperm.xlu1 %4497, %v451_v48  }
  0x75   : > { %842 = vperm.xlu0 %4511, %v453_v49   ;;  %4498 = vset.pattern.permute.xlu1 %v6479_v32 }
  0x76   : > { %1054 = vperm.xlu1 %4498, %v449_v46  }
  0x79   : > { %850 = vperm.xlu0 %4511, %v4944_v50  }
  0x7a   : > { %1058 = vperm.xlu1 %4498, %v4860_v33  }
  0x7d   : > { %858 = vperm.xlu0 %4511, %v4951_v51  }
  0x7e   : > { %4499 = vset.pattern.permute.xlu1 %v6477_v3 }
  0x7f   : > { %704 = vperm.xlu1 %4499, %v468_v52  }
  0x81   : > { %4515 = vset.pattern.permute.xlu0 %v6479_v32 }
  0x82   : > { %1090 = vperm.xlu0 %4515, %v4911_v44  }
  0x83   : > { %4500 = vset.pattern.permute.xlu1 %v4640_v13 }
  0x84   : > { %838 = vperm.xlu1 %4500, %v4873_v36  }
  0x86   : > { %4517 = vset.pattern.permute.xlu0 %v6477_v3 }
  0x88   : > { %4501 = vset.pattern.permute.xlu1 %v6477_v3 }
  0x89   : > { %527 = vperm.xlu1 %4501, %v453_v49  }
  0x8d   : > { %4502 = vset.pattern.permute.xlu1 %v6479_v32 }
  0x8e   : > { %1062 = vperm.xlu1 %4502, %v451_v48  }
  0x92   : > { %1066 = vperm.xlu1 %4502, %v4873_v36  }
  0x96   : > { %4503 = vset.pattern.permute.xlu1 %v6477_v3 }
  0x97   : > { %714 = vperm.xlu1 %4503, %v470_v53  }
  0x9a   : > { %v4971_v54 = vpop.permute.xlu1 %659 }
  0x9b   : > { %4504 = vset.pattern.permute.xlu1 %v4640_v13 }
  0x9c   : > { %846 = vperm.xlu1 %4504, %v4887_v39  }
  0x9e   : > { %v4987_v60 = vpop.permute.xlu1 %664 }
  0x9f   : > { %v4973_v55 = vpop.permute.xlu0 %477 }
  0xa0   : > { %v595_v56 = vmul.f32 %v4817_v18, %v4973_v55  ;;  %v596_v57 = vmul.f32 %v4820_v19, %v4973_v55  ;;  %4505 = vset.pattern.permute.xlu1 %v6477_v3 }
  0xa1   : > { %537 = vperm.xlu1 %4505, %v4944_v50  }
  0xa2   : > { %v4982_v58 = vadd.f32 %v4971_v54, %v595_v56  ;;  %v4985_v59 = vadd.f32 %v4971_v54, %v596_v57 }
  0xa3   : > { %v4989_v61 = vpop.permute.xlu0 %482  ;;  %v5001_v6 = vpop.permute.xlu1 %806 }
  0xa4   : > { %v599_v62 = vmul.f32 %v4817_v18, %v4989_v61  ;;  %v600_v63 = vmul.f32 %v4820_v19, %v4989_v61  ;;  %v907_v9 = vmul.f32 %v4831_v23, %v5001_v6  ;;  %v908_v11 = vmul.f32 %v4835_v24, %v5001_v6 }
  0xa5   : > { %4506 = vset.pattern.permute.xlu1 %v6479_v32 }
  0xa6   : > { %v743_v0 = vadd.f32 %v4987_v60, %v599_v62  ;;  %v744_v1 = vadd.f32 %v4987_v60, %v600_v63  ;;  %1070 = vperm.xlu1 %4506, %v453_v49  }
  0xa7   : > { %v4999_v5 = vpop.permute.xlu0 %492 }
  0xa8   : > { %v971_v14 = vadd.f32 %v907_v9, %v743_v0  ;;  %v972_v15 = vadd.f32 %v908_v11, %v744_v1  ;;  %v5010_v17 = vpop.permute.xlu1 %487  ;;  %v607_v45 = vmul.f32 %v4817_v18, %v4999_v5  ;;  %v608_v46 = vmul.f32 %v4820_v19, %v4999_v5 }
  0xa9   : > { %v5014_v20 = vmul.f32 %v4817_v18, %v5010_v17  ;;  %v5018_v21 = vmul.f32 %v4820_v19, %v5010_v17 }
  0xaa   : > { %1074 = vperm.xlu1 %4506, %v4887_v39  }
  0xab   : > { %v5008_v16 = vpop.permute.xlu0 %669 }
  0xad   : > { %v5026_v28 = vpop.permute.xlu1 %1030 }
  0xae   : > { %v5030_v29 = vmul.f32 %v4850_v30, %v5026_v28  ;;  %v5034_v33 = vmul.f32 %v4853_v31, %v5026_v28  ;;  %4507 = vset.pattern.permute.xlu1 %v6477_v3 }
  0xaf   : > { %v5021_v22 = vpop.permute.xlu0 %502  ;;  %724 = vperm.xlu1 %4507, %v472_v27  }
  0xb1   : > { %v5039_v35 = vpop.permute.xlu1 %1034 }
  0xb2   : > { %v1135_v36 = vmul.f32 %v4850_v30, %v5039_v35  ;;  %v1136_v37 = vmul.f32 %v4853_v31, %v5039_v35 }
  0xb3   : > { %v5037_v34 = vpop.permute.xlu0 %679  ;;  %4508 = vset.pattern.permute.xlu1 %v4640_v13 }
  0xb4   : > { %v5048_v39 = vadd.f32 %v1135_v36, %v971_v14  ;;  %854 = vperm.xlu1 %4508, %v4898_v41   ;;  %v5051_v40 = vadd.f32 %v1136_v37, %v972_v15  ;;  %v441_v14 = vld [vmem:[%s4794_s15] sm:$0x77]  ;;  %s4110_s15 = sshll.u32 %s4629_s20, 12  ;;  %s4642_s20 = smov [#allocation2]  }
  0xb5   : > { %v560_v27 = vrot.slane %v441_v14, %v4788_v7  ;;  %v868_v36 = vrot.slane %v441_v14, %v4800_v10  ;;  %s6299_s12 = scalar_lea.hbm %s6474_s10, %s4110_s15  ;;  %s4563_s1 = sshll.u32 %s4642_s20, 4  ;;  %s4564_s1 = int_to_ptr.vmem [resolvable:$false] %s4563_s1 }
  0xb6   : > { %v5053_v42 = vpop.permute.xlu1 %674  ;;  %s4565_s15 = scalar_lea.vmem %s4564_s1, 8192  ;;  %p4566_p1 = scmp.lt.s32.totalorder %s6302_s13, %s4564_s1 }
  0xb7   : > { %v5045_v38 = vpop.permute.xlu0 %512  ;;  %v751_v49 = vadd.f32 %v5053_v42, %v607_v45  ;;  %v752_v52 = vadd.f32 %v5053_v42, %v608_v46  ;;  %v872_v46 = vrot.slane %v441_v14, %v871_v12  ;;  %p4567_p2 = scmp.lt.s32.totalorder %s4565_s15, %s4559_s28 }
  0xb8   : > { %4509 = vset.pattern.permute.xlu1 %v6477_v3 }
  0xb9   : > { %547 = vperm.xlu1 %4509, %v4951_v51   ;;  %v5128_v12 = vrot.slane %v872_v46, %v4800_v10  ;;  %p4568_p3 = por %p4567_p2, %p4566_p1 }
  0xbb   : > { %v5055_v43 = vpop.permute.xlu0 %689  ;;  %v5065_v48 = vpop.permute.xlu1 %814  ;;  %p4569_p5 = pnand %p4568_p3, %p4562_p0 }
  0xbc   : > { %v915_v53 = vmul.f32 %v4831_v23, %v5065_v48  ;;  %v916_v56 = vmul.f32 %v4835_v24, %v5065_v48 }
  0xbd   : > { %4510 = vset.pattern.permute.xlu1 %v6479_v32 }
  0xbe   : > { %v979_v57 = vadd.f32 %v915_v53, %v751_v49  ;;  %v980_v62 = vadd.f32 %v916_v56, %v752_v52  ;;  %1078 = vperm.xlu1 %4510, %v4944_v50   ;;  %v474_v50 = vld [vmem:[%s6466_s2 + $0x78] sm:$0xff]  ;;  %v564_v49 = vrot.slane %v441_v14, %v563_v8  ;;  %v5116_v53 = vrot.slane %v560_v27, %v4788_v7 }
  0xbf   : > { %v5063_v47 = vpop.permute.xlu0 %522  ;;  %v5119_v56 = vrot.slane %v868_v36, %v4800_v10  ;;  %v616_v27 = vmul.f32 %v4820_v19, %v5021_v22  ;;  %v1096_v36 = vrot.slane %v441_v14, %v4838_v25 }
  0xc0   : > { %6505 = vst [vmem:[#allocation9_spill] sm:$0xff] %v5063_v47  ;;  %v5077_v0 = vpop.permute.xlu1 %497  ;;  %v5131_v8 = vrot.slane %v564_v49, %v4788_v7  ;;  %v747_v47 = vadd.f32 %v5008_v16, %v5014_v20 }
  0xc1   : > { %v5081_v1 = vmul.f32 %v4817_v18, %v5077_v0  ;;  %v5085_v9 = vmul.f32 %v4820_v19, %v5077_v0  ;;  %v913_v20 = vmul.f32 %v5119_v56, %v5065_v48 }
  0xc2   : > { %1082 = vperm.xlu1 %4510, %v4898_v41   ;;  %v598_v7 = vmul.f32 %v5131_v8, %v4989_v61 }
  0xc3   : > { %v5075_v63 = vpop.permute.xlu0 %699 }
  0xc4   : > { %6506 = vst [vmem:[#allocation10_spill] sm:$0xff] %v5075_v63 }
  0xc5   : > { %v5094_v15 = vpop.permute.xlu1 %1038 }
  0xc6   : > { %v5100_v37 = vmul.f32 %v4850_v30, %v5094_v15  ;;  %v5104_v41 = vmul.f32 %v4853_v31, %v5094_v15  ;;  %4512 = vset.pattern.permute.xlu1 %v6477_v3 }
  0xc7   : > { %v5088_v11 = vpop.permute.xlu0 %532  ;;  %734 = vperm.xlu1 %4512, %v474_v50   ;;  %v615_v50 = vmul.f32 %v4817_v18, %v5021_v22 }
  0xc8   : > { %6507 = vst [vmem:[#allocation11_spill] sm:$0xff] %v5088_v11  ;;  %6508 = vst [vmem:[#allocation12_spill] sm:$0xff] %v5100_v37  ;;  %v1100_v11 = vrot.slane %v441_v14, %v1099_v26  ;;  %v906_v26 = vmul.f32 %v5128_v12, %v5001_v6  ;;  %v601_v14 = vmul.f32 %v5116_v53, %v5010_v17 }
  0xc9   : > { %6509 = vst [vmem:[#allocation13_spill] sm:$0xff] %v5104_v41  ;;  %v5113_v52 = vpop.permute.xlu1 %1042  ;;  %v6515_v41 = vmov 0  }
  0xca   : > { %v1143_v2 = vmul.f32 %v4850_v30, %v5113_v52  ;;  %v1144_v3 = vmul.f32 %v4853_v31, %v5113_v52 }
  0xcb   : > { %v5107_v45 = vpop.permute.xlu0 %709  ;;  %4513 = vset.pattern.permute.xlu1 %v4640_v13  ;;  %v597_v13 = vmul.f32 %v5116_v53, %v4989_v61  ;;  %v6513_v61 = vmov 2  }
  0xcc   : > { %6510 = vst [vmem:[#allocation14_spill] sm:$0xff] %v5107_v45  ;;  %862 = vperm.xlu1 %4513, %v4911_v44   ;;  %v5144_v46 = vadd.f32 %v1144_v3, %v980_v62  ;;  %v905_v3 = vmul.f32 %v5119_v56, %v5001_v6  ;;  %v5163_v44 = vrot.slane %v1096_v36, %v4838_v25 }
  0xcd   : > { %v593_v62 = vmul.f32 %v5116_v53, %v4973_v55  ;;  %v605_v36 = vmul.f32 %v5116_v53, %v4999_v5 }
  0xce   : > { %v5148_v49 = vpop.permute.xlu1 %684  ;;  %v1133_v6 = vmul.f32 %v5163_v44, %v5039_v35 }
  0xcf   : > { %v5125_v32 = vpop.permute.xlu0 %542  ;;  %v759_v45 = vadd.f32 %v5148_v49, %v615_v50  ;;  %v760_v4 = vadd.f32 %v5148_v49, %v616_v27  ;;  %v602_v50 = vmul.f32 %v5131_v8, %v5010_v17  ;;  %v606_v17 = vmul.f32 %v5131_v8, %v4999_v5 }
  0xd0   : > { %6511 = vst [vmem:[#allocation15_spill] sm:$0xff] %v5125_v32  ;;  %v5141_v32 = vadd.f32 %v1143_v2, %v979_v57  ;;  %v594_v2 = vmul.f32 %v5131_v8, %v4973_v55  ;;  %v5166_v57 = vrot.slane %v1100_v11, %v4838_v25  ;;  %4514 = vset.pattern.permute.xlu1 %v6513_v61 }
  0xd1   : > { %1086 = vperm.xlu1 %4514, %v4951_v51   ;;  %v742_v25 = vadd.f32 %v4987_v60, %v598_v7  ;;  %v741_v55 = vadd.f32 %v4987_v60, %v597_v13  ;;  %v745_v60 = vadd.f32 %v5008_v16, %v601_v14  ;;  %v746_v13 = vadd.f32 %v5008_v16, %v602_v50 }
  0xd2   : > { %v1134_v11 = vmul.f32 %v5166_v57, %v5039_v35  ;;  %v738_v51 = vadd.f32 %v4971_v54, %v594_v2  ;;  %v737_v5 = vadd.f32 %v4971_v54, %v593_v62  ;;  %v914_v54 = vmul.f32 %v5128_v12, %v5065_v48 }
  0xd3   : > { %v5150_v10 = vpop.permute.xlu0 %719  ;;  %v5188_v61 = vpop.permute.xlu1 %822  ;;  %v969_v35 = vadd.f32 %v905_v3, %v741_v55  ;;  %v750_v62 = vadd.f32 %v5053_v42, %v606_v17  ;;  %v609_v14 = vmul.f32 %v5116_v53, %v5077_v0  ;;  %v610_v48 = vmul.f32 %v5131_v8, %v5077_v0 }
  0xd4   : > { %6512 = vst [vmem:[#allocation16_spill] sm:$0xff] %v5150_v10  ;;  %v924_v7 = vmul.f32 %v4835_v24, %v5188_v61  ;;  %v970_v10 = vadd.f32 %v906_v26, %v742_v25  ;;  %v5213_v26 = vadd.f32 %v5008_v16, %v5018_v21  ;;  %v614_v16 = vmul.f32 %v5131_v8, %v5021_v22 }
  0xd5   : > { %4516 = vset.pattern.permute.xlu1 %v6515_v41  ;;  %v5209_v3 = vadd.f32 %v1133_v6, %v969_v35  ;;  %v1141_v55 = vmul.f32 %v5163_v44, %v5113_v52 }
  0xd6   : > { %v5203_v31 = vadd.f32 %v924_v7, %v760_v4  ;;  %v5207_v30 = vadd.f32 %v1134_v11, %v970_v10  ;;  %v1129_v4 = vmul.f32 %v5163_v44, %v5026_v28  ;;  %v749_v10 = vadd.f32 %v5053_v42, %v605_v36 }
  0xd7   : > { %v5178_v27 = vpop.permute.xlu0 %552  ;;  %v5243_v42 = vmul.f32 %v5116_v53, %v5045_v38  ;;  %v1261_v25 = vmax.f32 %v5209_v3, 0.0  ;;  %v978_v11 = vadd.f32 %v914_v54, %v750_v62  ;;  %v1142_v36 = vmul.f32 %v5166_v57, %v5113_v52 }
  0xd8   : > { %6514 = vst [vmem:[#allocation17_spill] sm:$0xff] %v5178_v27  ;;  %v923_v27 = vmul.f32 %v4831_v23, %v5188_v61  ;;  %6517 = vst [vmem:[#allocation19_spill] sm:$0xff] %v5203_v31  ;;  %v5227_v21 = vpop.permute.xlu1 %507  ;;  %v977_v0 = vadd.f32 %v913_v20, %v749_v10  ;;  %v754_v3 = vadd.f32 %v5037_v34, %v610_v48 }
  0xd9   : > { %v5235_v50 = vmul.f32 %v4817_v18, %v5227_v21  ;;  %v5239_v6 = vmul.f32 %v4820_v19, %v5227_v21  ;;  %6520 = vst [vmem:[#allocation22_spill] sm:$0xff] %v5243_v42  ;;  %v755_v20 = vadd.f32 %v5037_v34, %v5081_v1  ;;  %v1137_v54 = vmul.f32 %v5163_v44, %v5094_v15 }
  0xda   : > { %v5201_v2 = vadd.f32 %v923_v27, %v759_v45  ;;  %v613_v45 = vmul.f32 %v5116_v53, %v5021_v22  ;;  %v1130_v22 = vmul.f32 %v5166_v57, %v5026_v28  ;;  %v1262_v27 = vmax.f32 %v5207_v30, 0.0 }
  0xdb   : > { %v5205_v63 = vpop.permute.xlu0 %729  ;;  %6519 = vst [vmem:[#allocation21_spill] sm:$0xff] %v5239_v6  ;;  %v753_v30 = vadd.f32 %v5037_v34, %v609_v14  ;;  %v1138_v10 = vmul.f32 %v5166_v57, %v5094_v15  ;;  %v1206_v48 = vadd.f32 %v1142_v36, %v978_v11  ;;  %v1205_v31 = vadd.f32 %v1141_v55, %v977_v0 }
  0xdc   : > { %6516 = vst [vmem:[#allocation18_spill] sm:$0xff] %v5201_v2  ;;  %6518 = vst [vmem:[#allocation20_spill] sm:$0xff] %v5205_v63  ;;  %v922_v42 = vmul.f32 %v5128_v12, %v5188_v61  ;;  %v758_v0 = vadd.f32 %v5148_v49, %v614_v16 }
  0xdd   : > { %v5263_v52 = vpop.permute.xlu1 %1046 }
  0xe0   : > { %v803_v17 = vpop.permute.xlu0 %802 }
  0xe1   : > { %v903_v7 = vmul.f32 %v4831_v23, %v803_v17  ;;  %v904_v35 = vmul.f32 %v4835_v24, %v803_v17  ;;  %v902_v41 = vmul.f32 %v5128_v12, %v803_v17  ;;  %v901_v28 = vmul.f32 %v5119_v56, %v803_v17 }
  0xe2   : > { %v757_v17 = vadd.f32 %v5148_v49, %v613_v45 }
  0xe3   : > { %v967_v62 = vadd.f32 %v903_v7, %v4982_v58  ;;  %v966_v63 = vadd.f32 %v902_v41, %v738_v51  ;;  %v965_v2 = vadd.f32 %v901_v28, %v737_v5  ;;  %v968_v1 = vadd.f32 %v904_v35, %v4985_v59  ;;  %v5280_v41 = vpop.permute.xlu1 %1050 }
  0xe4   : > { %v5269_v14 = vpop.permute.xlu0 %810  ;;  %v921_v7 = vmul.f32 %v5119_v56, %v5188_v61 }
  0xe5   : > { %v909_v6 = vmul.f32 %v5119_v56, %v5269_v14  ;;  %v910_v15 = vmul.f32 %v5128_v12, %v5269_v14  ;;  %v911_v58 = vmul.f32 %v4831_v23, %v5269_v14  ;;  %v1194_v51 = vadd.f32 %v1130_v22, %v966_v63 }
  0xe6   : > { %v1193_v5 = vadd.f32 %v1129_v4, %v965_v2  ;;  %v5283_v45 = vadd.f32 %v5034_v33, %v968_v1  ;;  %v5286_v59 = vadd.f32 %v5030_v29, %v967_v62  ;;  %v1150_v63 = vmul.f32 %v5166_v57, %v5280_v41 }
  0xe7   : > { %v5289_v11 = vadd.f32 %v911_v58, %v747_v47  ;;  %v974_v55 = vadd.f32 %v910_v15, %v746_v13  ;;  %v973_v36 = vadd.f32 %v909_v6, %v745_v60  ;;  %v1258_v28 = vmax.f32 %v1194_v51, 0.0  ;;  %v5300_v61 = vpop.permute.xlu1 %694 }
  0xe8   : > { %v819_v35 = vpop.permute.xlu0 %818  ;;  %v1257_v37 = vmax.f32 %v1193_v5, 0.0  ;;  %v986_v33 = vadd.f32 %v922_v42, %v758_v0  ;;  %v1149_v62 = vmul.f32 %v5163_v44, %v5280_v41  ;;  %v623_v42 = vmul.f32 %v4817_v18, %v5045_v38 }
  0xe9   : > { %v917_v2 = vmul.f32 %v5119_v56, %v819_v35  ;;  %v918_v29 = vmul.f32 %v5128_v12, %v819_v35  ;;  %v919_v49 = vmul.f32 %v4831_v23, %v819_v35  ;;  %v1338_v47 = vpack.c.bf16 %v1262_v27, %v1258_v28 }
  0xea   : > { %v1337_v4 = vpack.c.bf16 %v1261_v25, %v1257_v37  ;;  %v1202_v13 = vadd.f32 %v1138_v10, %v974_v55  ;;  %v1201_v60 = vadd.f32 %v1137_v54, %v973_v36  ;;  %v1270_v15 = vmax.f32 %v1206_v48, 0.0 }
  0xeb   : > { %v5298_v16 = vadd.f32 %v919_v49, %v755_v20  ;;  %v982_v6 = vadd.f32 %v918_v29, %v754_v3  ;;  %v981_v22 = vadd.f32 %v917_v2, %v753_v30  ;;  %1513 = vmatprep.subr.bf16.mxu1 %v1338_v47  ;;  %v1146_v37 = vmul.f32 %v5166_v57, %v5263_v52 }
  0xec   : > { %v5306_v1 = vpop.permute.xlu0 %826  ;;  %v1214_v27 = vadd.f32 %v1150_v63, %v986_v33  ;;  %v985_v25 = vadd.f32 %v921_v7, %v757_v17  ;;  %v763_v20 = vadd.f32 %v5055_v43, %v5235_v50  ;;  %1514 = vmatpush1.bf16.msra.mxu1 %v1337_v4  ;;  %v1145_v3 = vmul.f32 %v5163_v44, %v5263_v52  ;;  %v831_v50 = vpop.permute.xlu1 %830 }
  0xed   : > { %v927_v30 = vmul.f32 %v4831_v23, %v5306_v1  ;;  %v1266_v54 = vmax.f32 %v1202_v13, 0.0  ;;  %v1265_v10 = vmax.f32 %v1201_v60, 0.0  ;;  %v1269_v58 = vmax.f32 %v1205_v31, 0.0 }
  0xee   : > { %v1210_v51 = vadd.f32 %v1146_v37, %v982_v6  ;;  %v622_v48 = vmul.f32 %v5131_v8, %v5045_v38  ;;  %v1209_v17 = vadd.f32 %v1145_v3, %v981_v22  ;;  %v1213_v0 = vadd.f32 %v1149_v62, %v985_v25  ;;  %v6522_v3 = vld [vmem:[#allocation21_spill] sm:$0xff] }
  0xef   : > { %v5318_v5 = vadd.f32 %v927_v30, %v763_v20  ;;  %v1342_v55 = vpack.c.bf16 %v1270_v15, %v1266_v54  ;;  %v1341_v36 = vpack.c.bf16 %v1269_v58, %v1265_v10  ;;  %v1278_v28 = vmax.f32 %v1214_v27, 0.0  ;;  %v6523_v10 = vld [vmem:[#allocation7_spill] sm:$0xff] }
  0xf0   : > { %v1274_v7 = vmax.f32 %v1210_v51, 0.0  ;;  %v617_v63 = vmul.f32 %v5116_v53, %v5227_v21  ;;  %v618_v33 = vmul.f32 %v5131_v8, %v5227_v21  ;;  %v767_v31 = vadd.f32 %v5300_v61, %v623_v42  ;;  %v5335_v21 = vpop.permute.xlu0 %834  ;;  %v5345_v27 = vpop.permute.xlu1 %517  ;;  %v6524_v51 = vld [vmem:[#allocation10_spill] sm:$0xff] }
  0xf1   : > { %v931_v2 = vmul.f32 %v4831_v23, %v831_v50  ;;  %v5328_v29 = vmul.f32 %v4820_v19, %v5045_v38  ;;  %1515 = vmatprep.subr.bf16.mxu1 %v1342_v55  ;;  %v1273_v47 = vmax.f32 %v1209_v17, 0.0  ;;  %v1277_v4 = vmax.f32 %v1213_v0, 0.0 }
  0xf2   : > { %v1346_v49 = vpack.c.bf16 %v1278_v28, %v1274_v7  ;;  %v1263_v13 = vmax.f32 %v5048_v39, 0.0  ;;  %v912_v60 = vmul.f32 %v4835_v24, %v5269_v14  ;;  %1516 = vmatpush1.bf16.msra.mxu1 %v1341_v36  ;;  %v1264_v22 = vmax.f32 %v5051_v40, 0.0 }
  0xf3   : > { %v5333_v6 = vadd.f32 %v931_v2, %v767_v31  ;;  %v756_v38 = vadd.f32 %v5037_v34, %v5085_v9  ;;  %v920_v62 = vmul.f32 %v4835_v24, %v819_v35  ;;  %v1345_v42 = vpack.c.bf16 %v1277_v4, %v1273_v47  ;;  %v6526_v47 = vld [vmem:[#allocation13_spill] sm:$0xff] }
  0xf4   : > { %1517 = vmatprep.subr.bf16.mxu1 %v1346_v49  ;;  %v1260_v15 = vmax.f32 %v5283_v45, 0.0  ;;  %v1271_v39 = vmax.f32 %v5141_v32, 0.0  ;;  %v761_v14 = vadd.f32 %v5055_v43, %v617_v63  ;;  %v762_v37 = vadd.f32 %v5055_v43, %v618_v33 }
  0xf5   : > { %v1272_v25 = vmax.f32 %v5144_v46, 0.0  ;;  %v925_v40 = vmul.f32 %v5119_v56, %v5306_v1  ;;  %v926_v34 = vmul.f32 %v5128_v12, %v5306_v1  ;;  %v627_v9 = vmul.f32 %v4817_v18, %v5345_v27  ;;  %v6521_v46 = vld [vmem:[#allocation12_spill] sm:$0xff]  ;;  %v1055_v28 = vpop.permute.xlu1 %1054 }
  0xf6   : > { %v935_v32 = vmul.f32 %v4831_v23, %v5335_v21  ;;  %1518 = vmatpush1.bf16.msra.mxu1 %v1345_v42  ;;  %v5356_v45 = vpack.c.bf16 %v1264_v22, %v1260_v15  ;;  %v1259_v35 = vmax.f32 %v5286_v59, 0.0  ;;  %v976_v20 = vadd.f32 %v912_v60, %v5213_v26  ;;  %v6525_v26 = vld [vmem:[#allocation8_spill] sm:$0xff] }
  0xf7   : > { %v1203_v30 = vadd.f32 %v6521_v46, %v5289_v11  ;;  %v764_v54 = vadd.f32 %v5055_v43, %v6522_v3  ;;  %v1147_v58 = vmul.f32 %v6523_v10, %v5263_v52  ;;  %v771_v17 = vadd.f32 %v6524_v51, %v627_v9 }
  0xf8   : > { %v984_v0 = vadd.f32 %v920_v62, %v756_v38  ;;  %v1151_v55 = vmul.f32 %v6523_v10, %v5280_v41  ;;  %v766_v36 = vadd.f32 %v5300_v61, %v622_v48  ;;  %v930_v59 = vmul.f32 %v5128_v12, %v831_v50  ;;  %v6527_v38 = vld [vmem:[#allocation22_spill] sm:$0xff] }
  0xf9   : > { %v1148_v7 = vmul.f32 %v6525_v26, %v5263_v52  ;;  %v5373_v11 = vadd.f32 %v935_v32, %v771_v17  ;;  %v990_v43 = vadd.f32 %v926_v34, %v762_v37  ;;  %v989_v63 = vadd.f32 %v925_v40, %v761_v14  ;;  %v1059_v14 = vpop.permute.xlu1 %1058  ;;  %v6529_v17 = vld [vmem:[#allocation18_spill] sm:$0xff] }
  0xfa   : > { %v5375_v33 = vpack.c.bf16 %v1263_v13, %v1259_v35  ;;  %v929_v31 = vmul.f32 %v5119_v56, %v831_v50  ;;  %v1154_v2 = vmul.f32 %v5166_v57, %v1055_v28  ;;  %v1153_v49 = vmul.f32 %v5163_v44, %v1055_v28 }
  0xfb   : > { %v1204_v48 = vadd.f32 %v6526_v47, %v976_v20  ;;  %v1267_v4 = vmax.f32 %v1203_v30, 0.0  ;;  %v1152_v60 = vmul.f32 %v6525_v26, %v5280_v41  ;;  %v1212_v52 = vadd.f32 %v1148_v7, %v984_v0  ;;  %v6530_v47 = vld [vmem:[#allocation9_spill] sm:$0xff] }
  0xfc   : > { %v1211_v22 = vadd.f32 %v1147_v58, %v5298_v16  ;;  %v765_v62 = vadd.f32 %v5300_v61, %v6527_v38  ;;  %v928_v13 = vmul.f32 %v4835_v24, %v5306_v1  ;;  %v932_v42 = vmul.f32 %v4835_v24, %v831_v50  ;;  %v6528_v50 = vld [vmem:[#allocation19_spill] sm:$0xff] }
  0xfd   : > { %v994_v15 = vadd.f32 %v930_v59, %v766_v36  ;;  %v1218_v37 = vadd.f32 %v1154_v2, %v990_v43  ;;  %v1217_v40 = vadd.f32 %v1153_v49, %v989_v63  ;;  %v1268_v34 = vmax.f32 %v1204_v48, 0.0 }
  0xfe   : > { %v5389_v9 = vpack.c.bf16 %v1271_v39, %v1267_v4  ;;  %v628_v41 = vmul.f32 %v4820_v19, %v5345_v27  ;;  %v1158_v16 = vmul.f32 %v5166_v57, %v1059_v14  ;;  %v993_v32 = vadd.f32 %v929_v31, %v765_v62  ;;  %v5401_v63 = vpop.permute.xlu1 %704 }
  0xff   : > { %v1157_v35 = vmul.f32 %v5163_v44, %v1059_v14  ;;  %v1155_v20 = vmul.f32 %v6523_v10, %v1055_v28  ;;  %v5396_v1 = vpack.c.bf16 %v1272_v25, %v1268_v34  ;;  %v1216_v46 = vadd.f32 %v1152_v60, %v6528_v50 }
 0x100   : > { %v1276_v30 = vmax.f32 %v1212_v52, 0.0  ;;  %v1222_v3 = vadd.f32 %v1158_v16, %v994_v15  ;;  %v1215_v39 = vadd.f32 %v1151_v55, %v6529_v17  ;;  %v1275_v0 = vmax.f32 %v1211_v22, 0.0 }
 0x101   : > { %v1221_v58 = vadd.f32 %v1157_v35, %v993_v32  ;;  %v1159_v36 = vmul.f32 %v6523_v10, %v1059_v14  ;;  %v1282_v59 = vmax.f32 %v1218_v37, 0.0  ;;  %v1281_v7 = vmax.f32 %v1217_v40, 0.0 }
 0x102   : > { %v1280_v43 = vmax.f32 %v1216_v46, 0.0  ;;  %v1286_v31 = vmax.f32 %v1222_v3, 0.0  ;;  %v1279_v49 = vmax.f32 %v1215_v39, 0.0  ;;  %v992_v25 = vadd.f32 %v928_v13, %v764_v54 }
 0x103   : > { %v1285_v2 = vmax.f32 %v1221_v58, 0.0  ;;  %v631_v48 = vmul.f32 %v4817_v18, %v6530_v47  ;;  %v768_v4 = vadd.f32 %v5300_v61, %v5328_v29  ;;  %v936_v55 = vmul.f32 %v4835_v24, %v5335_v21  ;;  %v839_v34 = vpop.permute.xlu1 %838 }
 0x104   : > { %v1350_v60 = vpack.c.bf16 %v1286_v31, %v1282_v59  ;;  %v5409_v22 = vpack.c.bf16 %v1280_v43, %v1276_v30  ;;  %v5411_v38 = vpack.c.bf16 %v1279_v49, %v1275_v0  ;;  %v1156_v15 = vmul.f32 %v6525_v26, %v1055_v28  ;;  %v5424_v30 = vpop.permute.xlu0 %842 }
 0x105   : > { %v1349_v52 = vpack.c.bf16 %v1285_v2, %v1281_v7  ;;  %v996_v62 = vadd.f32 %v932_v42, %v768_v4  ;;  %v1160_v54 = vmul.f32 %v6525_v26, %v1059_v14  ;;  %v1219_v13 = vadd.f32 %v1155_v20, %v5318_v5  ;;  %v6531_v2 = vld [vmem:[#allocation14_spill] sm:$0xff] }
 0x106   : > { %v632_v37 = vmul.f32 %v4820_v19, %v6530_v47  ;;  %1519 = vmatprep.subr.bf16.mxu1 %v1350_v60  ;;  %v1223_v61 = vadd.f32 %v1159_v36, %v5333_v6  ;;  %v772_v29 = vadd.f32 %v6524_v51, %v628_v41  ;;  %v775_v40 = vadd.f32 %v5401_v63, %v631_v48 }
 0x107   : > { %1520 = vmatpush1.bf16.msra.mxu1 %v1349_v52  ;;  %v1220_v16 = vadd.f32 %v1156_v15, %v992_v25  ;;  %v1224_v42 = vadd.f32 %v1160_v54, %v996_v62  ;;  %v939_v14 = vmul.f32 %v4831_v23, %v839_v34  ;;  %v940_v5 = vmul.f32 %v4835_v24, %v839_v34 }
 0x108   : > { %v776_v28 = vadd.f32 %v5401_v63, %v632_v37  ;;  %v1283_v32 = vmax.f32 %v1219_v13, 0.0  ;;  %v1287_v50 = vmax.f32 %v1223_v61, 0.0  ;;  %v1000_v46 = vadd.f32 %v936_v55, %v772_v29  ;;  %v5434_v0 = vpop.permute.xlu1 %527 }
 0x109   : > { %v1284_v35 = vmax.f32 %v1220_v16, 0.0  ;;  %v1288_v20 = vmax.f32 %v1224_v42, 0.0  ;;  %v1003_v6 = vadd.f32 %v939_v14, %v775_v40  ;;  %v625_v3 = vmul.f32 %v5116_v53, %v5345_v27 }
 0x10a   : > { %v1004_v41 = vadd.f32 %v940_v5, %v776_v28  ;;  %v626_v58 = vmul.f32 %v5131_v8, %v5345_v27  ;;  %v5432_v39 = vpack.c.bf16 %v1287_v50, %v1283_v32  ;;  %v635_v36 = vmul.f32 %v4817_v18, %v5434_v0 }
 0x10b   : > { %v5430_v17 = vpack.c.bf16 %v1288_v20, %v1284_v35  ;;  %v636_v59 = vmul.f32 %v4820_v19, %v5434_v0  ;;  %v943_v7 = vmul.f32 %v4831_v23, %v5424_v30  ;;  %v944_v43 = vmul.f32 %v4835_v24, %v5424_v30 }
 0x10c   : > { %v933_v27 = vmul.f32 %v5119_v56, %v5335_v21  ;;  %v934_v31 = vmul.f32 %v5128_v12, %v5335_v21  ;;  %v779_v49 = vadd.f32 %v6531_v2, %v635_v36  ;;  %v770_v25 = vadd.f32 %v6524_v51, %v626_v58 }
 0x10d   : > { %v769_v48 = vadd.f32 %v6524_v51, %v625_v3  ;;  %v780_v4 = vadd.f32 %v6531_v2, %v636_v59  ;;  %v629_v55 = vmul.f32 %v5116_v53, %v6530_v47  ;;  %v630_v60 = vmul.f32 %v5131_v8, %v6530_v47  ;;  %v1063_v21 = vpop.permute.xlu1 %1062 }
 0x10e   : > { %v937_v52 = vmul.f32 %v5119_v56, %v839_v34  ;;  %v938_v62 = vmul.f32 %v5128_v12, %v839_v34  ;;  %v5458_v15 = vadd.f32 %v943_v7, %v779_v49  ;;  %v1163_v13 = vmul.f32 %v6523_v10, %v1063_v21 }
 0x10f   : > { %v5460_v54 = vadd.f32 %v944_v43, %v780_v4  ;;  %v1162_v51 = vmul.f32 %v5166_v57, %v1063_v21  ;;  %v1161_v37 = vmul.f32 %v5163_v44, %v1063_v21  ;;  %v1164_v61 = vmul.f32 %v6525_v26, %v1063_v21 }
 0x110   : > { %v774_v29 = vadd.f32 %v5401_v63, %v630_v60  ;;  %v998_v47 = vadd.f32 %v934_v31, %v770_v25  ;;  %v997_v40 = vadd.f32 %v933_v27, %v769_v48  ;;  %v773_v16 = vadd.f32 %v5401_v63, %v629_v55 }
 0x111   : > { %v1228_v34 = vadd.f32 %v1164_v61, %v1000_v46  ;;  %v1227_v42 = vadd.f32 %v1163_v13, %v5373_v11  ;;  %v1067_v28 = vpop.permute.xlu1 %1066 }
 0x112   : > { %v1002_v14 = vadd.f32 %v938_v62, %v774_v29  ;;  %v1226_v5 = vadd.f32 %v1162_v51, %v998_v47  ;;  %v1225_v32 = vadd.f32 %v1161_v37, %v997_v40  ;;  %v1167_v35 = vmul.f32 %v6523_v10, %v1067_v28  ;;  %v6532_v62 = vld [vmem:[#allocation11_spill] sm:$0xff]  ;;  %v5483_v40 = vpop.permute.xlu0 %850 }
 0x113   : > { %v1166_v20 = vmul.f32 %v5166_v57, %v1067_v28  ;;  %v1001_v50 = vadd.f32 %v937_v52, %v773_v16  ;;  %v1165_v3 = vmul.f32 %v5163_v44, %v1067_v28  ;;  %v1168_v58 = vmul.f32 %v6525_v26, %v1067_v28 }
 0x114   : > { %v1231_v7 = vadd.f32 %v1167_v35, %v1003_v6  ;;  %v1290_v63 = vmax.f32 %v1226_v5, 0.0  ;;  %v1289_v46 = vmax.f32 %v1225_v32, 0.0  ;;  %v1291_v49 = vmax.f32 %v1227_v42, 0.0 }
 0x115   : > { %v1230_v36 = vadd.f32 %v1166_v20, %v1002_v14  ;;  %v1229_v59 = vadd.f32 %v1165_v3, %v1001_v50  ;;  %v1232_v43 = vadd.f32 %v1168_v58, %v1004_v41  ;;  %v1292_v48 = vmax.f32 %v1228_v34, 0.0  ;;  %v6533_v50 = vld [vmem:[#allocation16_spill] sm:$0xff] }
 0x116   : > { %v715_v11 = vpop.permute.xlu1 %714  ;;  %v1295_v25 = vmax.f32 %v1231_v7, 0.0  ;;  %v639_v21 = vmul.f32 %v4817_v18, %v6532_v62  ;;  %v640_v6 = vmul.f32 %v4820_v19, %v6532_v62  ;;  %v633_v34 = vmul.f32 %v5116_v53, %v5434_v0 }
 0x117   : > { %v1294_v27 = vmax.f32 %v1230_v36, 0.0  ;;  %v1293_v31 = vmax.f32 %v1229_v59, 0.0  ;;  %v1296_v60 = vmax.f32 %v1232_v43, 0.0  ;;  %v634_v42 = vmul.f32 %v5131_v8, %v5434_v0 }
 0x118   : > { %v5473_v52 = vpack.c.bf16 %v1295_v25, %v1291_v49  ;;  %v783_v51 = vadd.f32 %v715_v11, %v639_v21  ;;  %v784_v37 = vadd.f32 %v715_v11, %v640_v6  ;;  %v951_v32 = vmul.f32 %v4831_v23, %v5483_v40 }
 0x119   : > { %v1354_v4 = vpack.c.bf16 %v1294_v27, %v1290_v63  ;;  %v1353_v55 = vpack.c.bf16 %v1293_v31, %v1289_v46  ;;  %v5479_v13 = vpack.c.bf16 %v1296_v60, %v1292_v48  ;;  %v952_v35 = vmul.f32 %v4835_v24, %v5483_v40 }
 0x11a   : > { %v941_v20 = vmul.f32 %v5119_v56, %v5424_v30  ;;  %v942_v0 = vmul.f32 %v5128_v12, %v5424_v30  ;;  %v778_v58 = vadd.f32 %v6531_v2, %v634_v42  ;;  %v777_v36 = vadd.f32 %v6531_v2, %v633_v34  ;;  %v1369_v2 = vld [vmem:[%s6468_s4] sm:$0xff] }
 0x11b   : > { %1521 = vmatprep.subr.bf16.mxu1 %v1354_v4  ;;  %v847_v41 = vpop.permute.xlu1 %846  ;;  %v637_v7 = vmul.f32 %v5116_v53, %v6532_v62  ;;  %v638_v63 = vmul.f32 %v5131_v8, %v6532_v62  ;;  %1387 = vperm.xlu1 %4516, %v1369_v2  }
 0x11c   : > { %1522 = vmatpush1.bf16.msra.mxu1 %v1353_v55  ;;  %v947_v61 = vmul.f32 %v4831_v23, %v847_v41  ;;  %v948_v29 = vmul.f32 %v4835_v24, %v847_v41  ;;  %v945_v46 = vmul.f32 %v5119_v56, %v847_v41  ;;  %v946_v43 = vmul.f32 %v5128_v12, %v847_v41 }
 0x11d   : > { %v782_v55 = vadd.f32 %v715_v11, %v638_v63  ;;  %v1006_v60 = vadd.f32 %v942_v0, %v778_v58  ;;  %v1005_v62 = vadd.f32 %v941_v20, %v777_v36  ;;  %v781_v21 = vadd.f32 %v715_v11, %v637_v7 }
 0x11e   : > { %v1011_v47 = vadd.f32 %v947_v61, %v783_v51  ;;  %v1012_v16 = vadd.f32 %v948_v29, %v784_v37 }
 0x11f   : > { %v1010_v37 = vadd.f32 %v946_v43, %v782_v55  ;;  %v1372_v43 = vld [vmem:[%s6468_s4 + $0x18] sm:$0xff] }
 0x120   : > { %v5489_v28 = vpop.permute.xlu1 %537 }
 0x121   : > { %v643_v14 = vmul.f32 %v4817_v18, %v5489_v28  ;;  %v644_v5 = vmul.f32 %v4820_v19, %v5489_v28 }
 0x123   : > { %v787_v3 = vadd.f32 %v6533_v50, %v643_v14  ;;  %v788_v59 = vadd.f32 %v6533_v50, %v644_v5  ;;  %v1009_v14 = vadd.f32 %v945_v46, %v781_v21 }
 0x125   : > { %v5513_v27 = vadd.f32 %v951_v32, %v787_v3  ;;  %v1071_v30 = vpop.permute.xlu1 %1070  ;;  %v5515_v31 = vadd.f32 %v952_v35, %v788_v59 }
 0x126   : > { %v1171_v49 = vmul.f32 %v6523_v10, %v1071_v30  ;;  %v1170_v25 = vmul.f32 %v5166_v57, %v1071_v30  ;;  %v1169_v48 = vmul.f32 %v5163_v44, %v1071_v30  ;;  %v1172_v4 = vmul.f32 %v6525_v26, %v1071_v30 }
 0x128   : > { %v1236_v6 = vadd.f32 %v1172_v4, %v5460_v54  ;;  %v1235_v41 = vadd.f32 %v1171_v49, %v5458_v15  ;;  %v1234_v61 = vadd.f32 %v1170_v25, %v1006_v60  ;;  %v1233_v29 = vadd.f32 %v1169_v48, %v1005_v62  ;;  %v1370_v15 = vld [vmem:[%s6468_s4 + $0x8] sm:$0xff]  ;;  %v6534_v49 = vld [vmem:[#allocation15_spill] sm:$0xff] }
 0x129   : > { %v1075_v51 = vpop.permute.xlu1 %1074  ;;  %1392 = vperm.xlu1 %4516, %v1370_v15   ;;  %v647_v25 = vmul.f32 %v4817_v18, %v6534_v49  ;;  %v648_v48 = vmul.f32 %v4820_v19, %v6534_v49 }
 0x12a   : > { %v1175_v34 = vmul.f32 %v6523_v10, %v1075_v51  ;;  %v1174_v42 = vmul.f32 %v5166_v57, %v1075_v51  ;;  %v1173_v5 = vmul.f32 %v5163_v44, %v1075_v51  ;;  %v1176_v32 = vmul.f32 %v6525_v26, %v1075_v51  ;;  %v1371_v51 = vld [vmem:[%s6468_s4 + $0x10] sm:$0xff] }
 0x12b   : > { %v1298_v0 = vmax.f32 %v1234_v61, 0.0  ;;  %v1297_v54 = vmax.f32 %v1233_v29, 0.0  ;;  %v1299_v7 = vmax.f32 %v1235_v41, 0.0  ;;  %v1300_v46 = vmax.f32 %v1236_v6, 0.0  ;;  %v1373_v41 = vld [vmem:[%s6468_s4 + $0x20] sm:$0xff]  ;;  %1397 = vperm.xlu0 %4517, %v1371_v51  }
 0x12c   : > { %v1238_v35 = vadd.f32 %v1174_v42, %v1010_v37  ;;  %v1237_v20 = vadd.f32 %v1173_v5, %v1009_v14  ;;  %v1239_v11 = vadd.f32 %v1175_v34, %v1011_v47  ;;  %v1240_v3 = vadd.f32 %v1176_v32, %v1012_v16  ;;  %v5562_v42 = vpop.permute.xlu0 %858  ;;  %v1375_v14 = vld [vmem:[%s6468_s4 + $0x30] sm:$0xff] }
 0x12d   : > { %1402 = vperm.xlu1 %4516, %v1372_v43   ;;  %v641_v29 = vmul.f32 %v5116_v53, %v5489_v28  ;;  %v642_v34 = vmul.f32 %v5131_v8, %v5489_v28  ;;  %v959_v28 = vmul.f32 %v4831_v23, %v5562_v42 }
 0x12e   : > { %v5533_v58 = vpop.permute.xlu1 %724  ;;  %v1302_v36 = vmax.f32 %v1238_v35, 0.0  ;;  %v1301_v59 = vmax.f32 %v1237_v20, 0.0  ;;  %v1303_v63 = vmax.f32 %v1239_v11, 0.0  ;;  %v1304_v2 = vmax.f32 %v1240_v3, 0.0 }
 0x12f   : > { %v791_v60 = vadd.f32 %v5533_v58, %v647_v25  ;;  %v792_v62 = vadd.f32 %v5533_v58, %v648_v48  ;;  %v949_v20 = vmul.f32 %v5119_v56, %v5483_v40  ;;  %v950_v11 = vmul.f32 %v5128_v12, %v5483_v40 }
 0x130   : > { %v1358_v47 = vpack.c.bf16 %v1302_v36, %v1298_v0  ;;  %v1357_v30 = vpack.c.bf16 %v1301_v59, %v1297_v54  ;;  %v5538_v16 = vpack.c.bf16 %v1303_v63, %v1299_v7  ;;  %v5544_v4 = vpack.c.bf16 %v1304_v2, %v1300_v46  ;;  %v6535_v54 = vld [vmem:[#allocation20_spill] sm:$0xff]  ;;  %v1374_v2 = vld [vmem:[%s6468_s4 + $0x28] sm:$0xff] }
 0x131   : > { %1407 = vperm.xlu1 %4516, %v1373_v41   ;;  %v960_v0 = vmul.f32 %v4835_v24, %v5562_v42  ;;  %v786_v15 = vadd.f32 %v6533_v50, %v642_v34  ;;  %v785_v36 = vadd.f32 %v6533_v50, %v641_v29  ;;  %v645_v7 = vmul.f32 %v5116_v53, %v6534_v49  ;;  %v1377_v50 = vld [vmem:[%s6468_s4 + $0x40] sm:$0xff]  ;;  %v1376_v34 = vld [vmem:[%s6468_s4 + $0x38] sm:$0xff] }
 0x132   : > { %1523 = vmatprep.subr.bf16.mxu1 %v1358_v47  ;;  %v646_v40 = vmul.f32 %v5131_v8, %v6534_v49  ;;  %1412 = vperm.xlu0 %4517, %v1374_v2  }
 0x133   : > { %v855_v55 = vpop.permute.xlu1 %854  ;;  %1524 = vmatpush1.bf16.msra.mxu1 %v1357_v30  ;;  %v789_v41 = vadd.f32 %v5533_v58, %v645_v7 }
 0x134   : > { %v955_v21 = vmul.f32 %v4831_v23, %v855_v55  ;;  %v956_v6 = vmul.f32 %v4835_v24, %v855_v55  ;;  %v953_v63 = vmul.f32 %v5119_v56, %v855_v55  ;;  %v954_v46 = vmul.f32 %v5128_v12, %v855_v55 }
 0x135   : > { %1417 = vperm.xlu1 %4516, %v1375_v14  }
 0x136   : > { %v1019_v37 = vadd.f32 %v955_v21, %v791_v60  ;;  %v5556_v61 = vadd.f32 %v956_v6, %v792_v62  ;;  %v790_v60 = vadd.f32 %v5533_v58, %v646_v40  ;;  %v1014_v62 = vadd.f32 %v950_v11, %v786_v15  ;;  %v1379_v6 = vld [vmem:[%s6468_s4 + $0x50] sm:$0xff]  ;;  %v6536_v58 = vld [vmem:[#allocation17_spill] sm:$0xff]  ;;  %1422 = vperm.xlu0 %4517, %v1376_v34   ;;  %v1091_v40 = vpop.permute.xlu0 %1090 }
 0x137   : > { %v1013_v21 = vadd.f32 %v949_v20, %v785_v36 }
 0x138   : > { %v548_v5 = vpop.permute.xlu1 %547 }
 0x139   : > { %v651_v32 = vmul.f32 %v4817_v18, %v548_v5  ;;  %v652_v35 = vmul.f32 %v4820_v19, %v548_v5  ;;  %1427 = vperm.xlu1 %4516, %v1377_v50   ;;  %v649_v36 = vmul.f32 %v5116_v53, %v548_v5 }
 0x13b   : > { %v795_v3 = vadd.f32 %v6535_v54, %v651_v32  ;;  %v796_v59 = vadd.f32 %v6535_v54, %v652_v35  ;;  %v1018_v32 = vadd.f32 %v954_v46, %v790_v60 }
 0x13d   : > { %v1079_v43 = vpop.permute.xlu1 %1078  ;;  %v5587_v47 = vadd.f32 %v960_v0, %v796_v59  ;;  %v5589_v30 = vadd.f32 %v959_v28, %v795_v3  ;;  %v1017_v0 = vadd.f32 %v953_v63, %v789_v41  ;;  %1437 = vperm.xlu1 %4516, %v1379_v6   ;;  %v650_v63 = vmul.f32 %v5131_v8, %v548_v5 }
 0x13e   : > { %v1179_v25 = vmul.f32 %v6523_v10, %v1079_v43  ;;  %v1178_v49 = vmul.f32 %v5166_v57, %v1079_v43  ;;  %v1177_v48 = vmul.f32 %v5163_v44, %v1079_v43  ;;  %v1180_v55 = vmul.f32 %v6525_v26, %v1079_v43 }
 0x140   : > { %v1244_v51 = vadd.f32 %v1180_v55, %v5515_v31  ;;  %v1243_v29 = vadd.f32 %v1179_v25, %v5513_v27  ;;  %v1242_v35 = vadd.f32 %v1178_v49, %v1014_v62  ;;  %v1241_v11 = vadd.f32 %v1177_v48, %v1013_v21  ;;  %v1381_v25 = vld [vmem:[%s6468_s4 + $0x60] sm:$0xff]  ;;  %v1378_v49 = vld [vmem:[%s6468_s4 + $0x48] sm:$0xff]  ;;  %v1383_v21 = vld [vmem:[%s6468_s4 + $0x70] sm:$0xff] }
 0x141   : > { %v1083_v14 = vpop.permute.xlu1 %1082  ;;  %v653_v31 = vmul.f32 %v5116_v53, %v6536_v58  ;;  %v654_v27 = vmul.f32 %v5131_v8, %v6536_v58  ;;  %1447 = vperm.xlu1 %4516, %v1381_v25   ;;  %v655_v8 = vmul.f32 %v4817_v18, %v6536_v58  ;;  %1432 = vperm.xlu0 %4517, %v1378_v49   ;;  %v1380_v18 = vld [vmem:[%s6468_s4 + $0x58] sm:$0xff] }
 0x142   : > { %v1183_v20 = vmul.f32 %v6523_v10, %v1083_v14  ;;  %v1182_v28 = vmul.f32 %v5166_v57, %v1083_v14  ;;  %v1181_v3 = vmul.f32 %v5163_v44, %v1083_v14  ;;  %v1184_v15 = vmul.f32 %v6525_v26, %v1083_v14 }
 0x143   : > { %v1306_v43 = vmax.f32 %v1242_v35, 0.0  ;;  %v1305_v50 = vmax.f32 %v1241_v11, 0.0  ;;  %v1307_v60 = vmax.f32 %v1243_v29, 0.0  ;;  %v1308_v5 = vmax.f32 %v1244_v51, 0.0 }
 0x144   : > { %v1246_v59 = vadd.f32 %v1182_v28, %v1018_v32  ;;  %v1245_v7 = vadd.f32 %v1181_v3, %v1017_v0  ;;  %v1247_v46 = vadd.f32 %v1183_v20, %v1019_v37  ;;  %v1248_v2 = vadd.f32 %v1184_v15, %v5556_v61 }
 0x145   : > { %v656_v37 = vmul.f32 %v4820_v19, %v6536_v58  ;;  %v1191_v61 = vmul.f32 %v6523_v10, %v1091_v40  ;;  %v794_v14 = vadd.f32 %v6535_v54, %v650_v63  ;;  %v1190_v19 = vmul.f32 %v5166_v57, %v1091_v40  ;;  %1457 = vperm.xlu1 %4516, %v1383_v21  }
 0x146   : > { %v735_v48 = vpop.permute.xlu1 %734  ;;  %v1310_v53 = vmax.f32 %v1246_v59, 0.0  ;;  %v1309_v55 = vmax.f32 %v1245_v7, 0.0  ;;  %v1311_v62 = vmax.f32 %v1247_v46, 0.0  ;;  %v1312_v34 = vmax.f32 %v1248_v2, 0.0  ;;  %1442 = vperm.xlu0 %4517, %v1380_v18  }
 0x147   : > { %v1189_v51 = vmul.f32 %v5163_v44, %v1091_v40  ;;  %v1192_v32 = vmul.f32 %v6525_v26, %v1091_v40  ;;  %v797_v35 = vadd.f32 %v735_v48, %v653_v31  ;;  %v793_v11 = vadd.f32 %v6535_v54, %v649_v36 }
 0x148   : > { %v1362_v6 = vpack.c.bf16 %v1310_v53, %v1306_v43  ;;  %v1361_v41 = vpack.c.bf16 %v1309_v55, %v1305_v50  ;;  %v5636_v29 = vpack.c.bf16 %v1311_v62, %v1307_v60  ;;  %v5646_v20 = vpack.c.bf16 %v1312_v34, %v1308_v5 }
 0x149   : > { %v798_v28 = vadd.f32 %v735_v48, %v654_v27  ;;  %v799_v0 = vadd.f32 %v735_v48, %v655_v8  ;;  %v800_v3 = vadd.f32 %v735_v48, %v656_v37  ;;  %v957_v54 = vmul.f32 %v5119_v56, %v5562_v42  ;;  %v1382_v27 = vld [vmem:[%s6468_s4 + $0x68] sm:$0xff] }
 0x14a   : > { %1525 = vmatprep.subr.bf16.mxu1 %v1362_v6  ;;  %v958_v36 = vmul.f32 %v5128_v12, %v5562_v42  ;;  %1452 = vperm.xlu0 %4517, %v1382_v27  }
 0x14b   : > { %v863_v58 = vpop.permute.xlu1 %862  ;;  %1526 = vmatpush1.bf16.msra.mxu1 %v1361_v41  ;;  %v1021_v2 = vadd.f32 %v957_v54, %v793_v11  ;;  %v4541_v54 = vld [vmem:[%s6469_s5 + $0x54] ss:$8 sps:$4 sm:$0xff]  }
 0x14c   : > { %v961_v15 = vmul.f32 %v5119_v56, %v863_v58  ;;  %v962_v59 = vmul.f32 %v5128_v12, %v863_v58  ;;  %v963_v7 = vmul.f32 %v4831_v23, %v863_v58  ;;  %v964_v31 = vmul.f32 %v4835_v24, %v863_v58  ;;  %v1384_v56 = vld [vmem:[%s6468_s4 + $0x78] sm:$0xff]  ;;  %v4538_v58 = vld [vmem:[%s6469_s5 + $0x44] ss:$8 sps:$4 sm:$0xff]  }
 0x14d   : > { %v1022_v50 = vadd.f32 %v958_v36, %v794_v14 }
 0x14e   : > { %v1027_v40 = vadd.f32 %v963_v7, %v799_v0  ;;  %v1026_v46 = vadd.f32 %v962_v59, %v798_v28  ;;  %v1025_v63 = vadd.f32 %v961_v15, %v797_v35  ;;  %v1028_v43 = vadd.f32 %v964_v31, %v800_v3  ;;  %1462 = vperm.xlu0 %4517, %v1384_v56   ;;  %v4537_v35 = vld [vmem:[%s6469_s5 + $0x30] ss:$8 sps:$4 sm:$0xff]   ;;  %v4540_v15 = vld [vmem:[%s6469_s5 + $0x40] ss:$8 sps:$4 sm:$0xff]  }
 0x150   : > { %v1087_v23 = vpop.permute.xlu1 %1086  ;;  %v1254_v25 = vadd.f32 %v1190_v19, %v1026_v46  ;;  %v1253_v24 = vadd.f32 %v1189_v51, %v1025_v63  ;;  %v1256_v49 = vadd.f32 %v1192_v32, %v1028_v43  ;;  %v1255_v48 = vadd.f32 %v1191_v61, %v1027_v40 }
 0x151   : > { %v1187_v12 = vmul.f32 %v6523_v10, %v1087_v23  ;;  %v1186_v42 = vmul.f32 %v5166_v57, %v1087_v23  ;;  %v1185_v53 = vmul.f32 %v5163_v44, %v1087_v23  ;;  %v1188_v55 = vmul.f32 %v6525_v26, %v1087_v23  ;;  %v4518_v26 = vld [vmem:[%s6467_s3] sm:$0xff]  }
 0x152   : > { %v1318_v61 = vmax.f32 %v1254_v25, 0.0  ;;  %v1317_v5 = vmax.f32 %v1253_v24, 0.0  ;;  %v1320_v21 = vmax.f32 %v1256_v49, 0.0  ;;  %v1319_v6 = vmax.f32 %v1255_v48, 0.0  ;;  %v4544_v23 = vld [vmem:[%s6469_s5 + $0x64] ss:$8 sps:$4 sm:$0xff]  }
 0x153   : > { %v1250_v60 = vadd.f32 %v1186_v42, %v1022_v50  ;;  %v1249_v62 = vadd.f32 %v1185_v53, %v1021_v2  ;;  %v1252_v8 = vadd.f32 %v1188_v55, %v5587_v47  ;;  %v1251_v37 = vadd.f32 %v1187_v12, %v5589_v30  ;;  %v4519_v30 = vld [vmem:[%s6467_s3 + $0x8] sm:$0xff]   ;;  %v4543_v50 = vld [vmem:[%s6469_s5 + $0x50] ss:$8 sps:$4 sm:$0xff]  }
 0x154   : > { %v6537_v47 = vmov 0   ;;  %v4546_v55 = vld [vmem:[%s6469_s5 + $0x60] ss:$8 sps:$4 sm:$0xff]  }
 0x155   : > { %v1314_v41 = vmax.f32 %v1250_v60, 0.0  ;;  %v1313_v34 = vmax.f32 %v1249_v62, 0.0  ;;  %v1316_v10 = vmax.f32 %v1252_v8, 0.0  ;;  %v1315_v18 = vmax.f32 %v1251_v37, 0.0  ;;  %v4547_v37 = vld [vmem:[%s6469_s5 + $0x74] ss:$8 sps:$4 sm:$0xff]  }
 0x157   : > { %v1366_v57 = vpack.c.bf16 %v1318_v61, %v1314_v41  ;;  %v1365_v14 = vpack.c.bf16 %v1317_v5, %v1313_v34  ;;  %v1368_v44 = vpack.c.bf16 %v1320_v21, %v1316_v10  ;;  %v1367_v19 = vpack.c.bf16 %v1319_v6, %v1315_v18  ;;  %v4549_v34 = vld [vmem:[%s6469_s5 + $0x70] ss:$8 sps:$4 sm:$0xff]  }
 0x159   : > { %1527 = vmatprep.subr.bf16.mxu1 %v1366_v57 }
 0x15a   : > { %1528 = vmatpush1.bf16.msra.mxu1 %v1365_v14 }
 0x15b   : > { %1626 = vmatprep.subr.bf16.mxu1 %v5356_v45  ;;  %v4520_v45 = vld [vmem:[%s6467_s3 + $0x10] sm:$0xff]  }
 0x15d   : > { %1546 = vmatmul.mubr.bf16.vlgmr.msra.gmra.mrb[0].mxu1 %v4518_v26 }
 0x15e   : > { %1627 = vmatpush1.bf16.msra.mxu1 %v5375_v33  ;;  %1555 = vmatprep.mubr.bf16.mxu1 %v6537_v47  ;;  %v4521_v33 = vld [vmem:[%s6467_s3 + $0x18] sm:$0xff]  }
 0x15f   : > { %1628 = vmatprep.subr.bf16.mxu1 %v5396_v1  ;;  %v4523_v1 = vld [vmem:[%s6467_s3 + $0x28] sm:$0xff]  }
 0x162   : > { %1629 = vmatpush1.bf16.msra.mxu1 %v5389_v9  ;;  %v4522_v9 = vld [vmem:[%s6467_s3 + $0x20] sm:$0xff]  }
 0x163   : > { %1630 = vmatprep.subr.bf16.mxu1 %v5409_v22  ;;  %v4524_v22 = vld [vmem:[%s6467_s3 + $0x30] sm:$0xff]  }
 0x165   : > { %1556 = vmatmul.mubr.bf16.gmra.mrb[4].mxu1 %v4519_v30 }
 0x166   : > { %1631 = vmatpush1.bf16.msra.mxu1 %v5411_v38  ;;  %1565 = vmatprep.mubr.bf16.mxu1 %v6537_v47  ;;  %v4525_v38 = vld [vmem:[%s6467_s3 + $0x38] sm:$0xff]  }
 0x167   : > { %1632 = vmatprep.subr.bf16.mxu1 %v5430_v17  ;;  %v4526_v17 = vld [vmem:[%s6469_s5 + $0x4] ss:$8 sps:$4 sm:$0xff]  }
 0x168   : > { %2199 = vmatprep.subr.bf16.mxu0 %v4526_v17 }
 0x16a   : > { %1633 = vmatpush1.bf16.msra.mxu1 %v5432_v39  ;;  %v4528_v39 = vld [vmem:[%s6469_s5] ss:$8 sps:$4 sm:$0xff]  }
 0x16b   : > { %1634 = vmatprep.subr.bf16.mxu1 %v5479_v13  ;;  %2200 = vmatpush1.bf16.msra.mxu0 %v4528_v39  ;;  %v4531_v13 = vld [vmem:[%s6469_s5 + $0x10] ss:$8 sps:$4 sm:$0xff]  }
 0x16d   : > { %1566 = vmatmul.mubr.bf16.gmra.mrb[8].mxu1 %v4520_v45 }
 0x16e   : > { %1635 = vmatpush1.bf16.msra.mxu1 %v5473_v52  ;;  %1575 = vmatprep.mubr.bf16.mxu1 %v6537_v47  ;;  %v4529_v52 = vld [vmem:[%s6469_s5 + $0x14] ss:$8 sps:$4 sm:$0xff]  }
 0x16f   : > { %1636 = vmatprep.subr.bf16.mxu1 %v5544_v4  ;;  %2201 = vmatprep.subr.bf16.mxu0 %v4529_v52  ;;  %v4534_v4 = vld [vmem:[%s6469_s5 + $0x20] ss:$8 sps:$4 sm:$0xff]  }
 0x170   : > { %2202 = vmatpush1.bf16.msra.mxu0 %v4531_v13 }
 0x172   : > { %1637 = vmatpush1.bf16.msra.mxu1 %v5538_v16  ;;  %v4532_v16 = vld [vmem:[%s6469_s5 + $0x24] ss:$8 sps:$4 sm:$0xff]  }
 0x173   : > { %1638 = vmatprep.subr.bf16.mxu1 %v5646_v20  ;;  %2203 = vmatprep.subr.bf16.mxu0 %v4532_v16 }
 0x174   : > { %2204 = vmatpush1.bf16.msra.mxu0 %v4534_v4 }
 0x175   : > { %1576 = vmatmul.mubr.bf16.gmra.mrb[12].mxu1 %v4521_v33 }
 0x176   : > { %1639 = vmatpush1.bf16.msra.mxu1 %v5636_v29  ;;  %1585 = vmatprep.mubr.bf16.mxu1 %v6537_v47  ;;  %v4535_v29 = vld [vmem:[%s6469_s5 + $0x34] ss:$8 sps:$4 sm:$0xff]  }
 0x177   : > { %1640 = vmatprep.subr.bf16.mxu1 %v1368_v44  ;;  %2205 = vmatprep.subr.bf16.mxu0 %v4535_v29 }
 0x178   : > { %2206 = vmatpush1.bf16.msra.mxu0 %v4537_v35 }
 0x179   : > { %2207 = vmatprep.subr.bf16.mxu0 %v4538_v58 }
 0x17a   : > { %1641 = vmatpush1.bf16.msra.mxu1 %v1367_v19 }
 0x17c   : > { %2208 = vmatpush1.bf16.msra.mxu0 %v4540_v15 }
 0x17d   : > { %1586 = vmatmul.mubr.bf16.gmra.mrb[16].mxu1 %v4522_v9  ;;  %2209 = vmatprep.subr.bf16.mxu0 %v4541_v54 }
 0x17e   : > { %1595 = vmatprep.mubr.bf16.mxu1 %v6537_v47 }
 0x180   : > { %2210 = vmatpush1.bf16.msra.mxu0 %v4543_v50 }
 0x181   : > { %2211 = vmatprep.subr.bf16.mxu0 %v4544_v23 }
 0x184   : > { %2212 = vmatpush1.bf16.msra.mxu0 %v4546_v55 }
 0x185   : > { %1596 = vmatmul.mubr.bf16.gmra.mrb[20].mxu1 %v4523_v1  ;;  %2213 = vmatprep.subr.bf16.mxu0 %v4547_v37 }
 0x186   : > { %1605 = vmatprep.mubr.bf16.mxu1 %v6537_v47 }
 0x188   : > { %2214 = vmatpush1.bf16.msra.mxu0 %v4549_v34 }
 0x18d   : > { %1606 = vmatmul.mubr.bf16.gmra.mrb[24].mxu1 %v4524_v22 }
 0x18e   : > { %1615 = vmatprep.mubr.bf16.mxu1 %v6537_v47 }
 0x195   : > { %1616 = vmatmul.mubr.bf16.gmra.mrb[28].mxu1 %v4525_v38 }
 0x196   : > { %1658 = vmatprep.mubr.bf16.mxu1 %v6537_v47 }
 0x19a   : > { %v5742_v51 = vpop.permute.xlu1 %1387 }
 0x19d   : > { %1659 = vmatmul.mubr.bf16.vlgmr.msra.gmra.mrb[32].mxu1 %v4518_v26 }
 0x19e   : > { %1668 = vmatprep.mubr.bf16.mxu1 %v6537_v47 }
 0x1a5   : > { %1669 = vmatmul.mubr.bf16.gmra.mrb[36].mxu1 %v4519_v30 }
 0x1a6   : > { %1678 = vmatprep.mubr.bf16.mxu1 %v6537_v47 }
 0x1a8   : > { %v5749_v28 = vpop.permute.xlu1 %1392 }
 0x1aa   : > { %v5765_v43 = vpop.permute.xlu0 %1397 }
 0x1ac   : > { %v5777_v12 = vpop.permute.xlu1 %1402 }
 0x1ad   : > { %1679 = vmatmul.mubr.bf16.gmra.mrb[40].mxu1 %v4520_v45 }
 0x1ae   : > { %1688 = vmatprep.mubr.bf16.mxu1 %v6537_v47 }
 0x1b0   : > { %v5792_v18 = vpop.permute.xlu1 %1407 }
 0x1b1   : > { %v5797_v30 = vpop.permute.xlu0 %1412 }
 0x1b4   : > { %v5802_v4 = vpop.permute.xlu1 %1417 }
 0x1b5   : > { %1689 = vmatmul.mubr.bf16.gmra.mrb[44].mxu1 %v4521_v33 }
 0x1b6   : > { %1698 = vmatprep.mubr.bf16.mxu1 %v6537_v47 }
 0x1bd   : > { %1699 = vmatmul.mubr.bf16.gmra.mrb[48].mxu1 %v4522_v9 }
 0x1be   : > { %1708 = vmatprep.mubr.bf16.mxu1 %v6537_v47 }
 0x1c5   : > { %1709 = vmatmul.mubr.bf16.gmra.mrb[52].mxu1 %v4523_v1 }
 0x1c6   : > { %1718 = vmatprep.mubr.bf16.mxu1 %v6537_v47 }
 0x1cd   : > { %1719 = vmatmul.mubr.bf16.gmra.mrb[56].mxu1 %v4524_v22 }
 0x1ce   : > { %1728 = vmatprep.mubr.bf16.mxu1 %v6537_v47 }
 0x1d5   : > { %1729 = vmatmul.mubr.bf16.gmra.mrb[60].mxu1 %v4525_v38 }
 0x230   : > { %v1547_v32 = vpop.f32.mrb[0].mxu1 }
 0x231   : > { %v1548_v11 = vadd.f32 %v1547_v32, %v5742_v51  ;;  %v1549_v20 = vpop.f32.mrb[1].mxu1 }
 0x232   : > { %v1550_v0 = vadd.f32 %v1549_v20, %v5742_v51  ;;  %v1551_v3 = vpop.f32.mrb[2].mxu1 }
 0x233   : > { %v1739_v59 = vmax.f32 %v1548_v11, 0.0  ;;  %v1552_v7 = vadd.f32 %v1551_v3, %v5749_v28  ;;  %v1553_v31 = vpop.f32.mrb[3].mxu1 }
 0x234   : > { %v1740_v36 = vmax.f32 %v1550_v0, 0.0  ;;  %v1554_v27 = vadd.f32 %v1553_v31, %v5749_v28  ;;  %v5806_v0 = vpop.permute.xlu0 %1422 }
 0x235   : > { %v1743_v40 = vmax.f32 %v1552_v7, 0.0 }
 0x236   : > { %v4014_v46 = vpack.c.bf16 %v1740_v36, %v1739_v59  ;;  %v1744_v63 = vmax.f32 %v1554_v27, 0.0 }
 0x237   : > { %v1803_v2 = vpack.c.bf16 %v1743_v40, %v1739_v59 }
 0x238   : > { %1995 = vst [vmem:[%s5773_s14] sm:$0xff] %v4014_v46  ;;  %v1804_v25 = vpack.c.bf16 %v1744_v63, %v1740_v36  ;;  %v4016_v24 = vpack.c.bf16 %v1744_v63, %v1743_v40  ;;  %v1557_v49 = vpop.f32.mrb[4].mxu1  ;;  %v5812_v63 = vpop.permute.xlu1 %1427 }
 0x239   : > { %v1558_v48 = vadd.f32 %v1557_v49, %v5765_v43  ;;  %v1559_v56 = vpop.f32.mrb[5].mxu1  ;;  %2027 = vxpose.xlu1.c.b16.start [1/8] %v1803_v2, 128  ;;  %v5816_v49 = vpop.permute.xlu0 %1432 }
 0x23a   : > { %1997 = vst [vmem:[%s5773_s14 + $0x10] sm:$0xff] %v4016_v24  ;;  %v1560_v42 = vadd.f32 %v1559_v56, %v5765_v43  ;;  %v1561_v53 = vpop.f32.mrb[6].mxu1  ;;  %2043 = vxpose.xlu0.c.b16.start [1/8] %v1804_v25, 128 }
 0x23b   : > { %v1747_v60 = vmax.f32 %v1558_v48, 0.0  ;;  %v1562_v62 = vadd.f32 %v1561_v53, %v5777_v12  ;;  %v1563_v8 = vpop.f32.mrb[7].mxu1 }
 0x23c   : > { %v1748_v61 = vmax.f32 %v1560_v42, 0.0  ;;  %v1564_v5 = vadd.f32 %v1563_v8, %v5777_v12 }
 0x23d   : > { %v1751_v21 = vmax.f32 %v1562_v62, 0.0 }
 0x23e   : > { %v4018_v6 = vpack.c.bf16 %v1748_v61, %v1747_v60  ;;  %v1752_v41 = vmax.f32 %v1564_v5, 0.0 }
 0x23f   : > { %v1807_v10 = vpack.c.bf16 %v1751_v21, %v1747_v60 }
 0x240   : > { %1999 = vst [vmem:[%s5773_s14 + $0x20] sm:$0xff] %v4018_v6  ;;  %v1808_v57 = vpack.c.bf16 %v1752_v41, %v1748_v61  ;;  %v4020_v14 = vpack.c.bf16 %v1752_v41, %v1751_v21  ;;  %v1567_v44 = vpop.f32.mrb[8].mxu1  ;;  %v5822_v21 = vpop.permute.xlu1 %1437 }
 0x241   : > { %v1568_v19 = vadd.f32 %v1567_v44, %v5792_v18  ;;  %v1569_v26 = vpop.f32.mrb[9].mxu1  ;;  %2028 = vxpose.xlu1.c.b16.cont [2/8] %v1807_v10, 128 }
 0x242   : > { %2001 = vst [vmem:[%s5773_s14 + $0x30] sm:$0xff] %v4020_v14  ;;  %v1570_v45 = vadd.f32 %v1569_v26, %v5792_v18  ;;  %v1571_v33 = vpop.f32.mrb[10].mxu1  ;;  %2044 = vxpose.xlu0.c.b16.cont [2/8] %v1808_v57, 128  ;;  %v5826_v14 = vpop.permute.xlu0 %1442 }
 0x243   : > { %v1755_v9 = vmax.f32 %v1568_v19, 0.0  ;;  %v1572_v1 = vadd.f32 %v1571_v33, %v5797_v30  ;;  %v1573_v22 = vpop.f32.mrb[11].mxu1 }
 0x244   : > { %v1756_v38 = vmax.f32 %v1570_v45, 0.0  ;;  %v1574_v17 = vadd.f32 %v1573_v22, %v5797_v30 }
 0x245   : > { %v1759_v39 = vmax.f32 %v1572_v1, 0.0 }
 0x246   : > { %v4022_v52 = vpack.c.bf16 %v1756_v38, %v1755_v9  ;;  %v1760_v13 = vmax.f32 %v1574_v17, 0.0 }
 0x247   : > { %v1811_v16 = vpack.c.bf16 %v1759_v39, %v1755_v9 }
 0x248   : > { %2003 = vst [vmem:[%s5773_s14 + $0x40] sm:$0xff] %v4022_v52  ;;  %v1812_v29 = vpack.c.bf16 %v1760_v13, %v1756_v38  ;;  %v4024_v32 = vpack.c.bf16 %v1760_v13, %v1759_v39  ;;  %v1577_v35 = vpop.f32.mrb[12].mxu1  ;;  %v5832_v52 = vpop.permute.xlu1 %1447 }
 0x249   : > { %v1578_v11 = vadd.f32 %v1577_v35, %v5802_v4  ;;  %v1579_v20 = vpop.f32.mrb[13].mxu1  ;;  %2029 = vxpose.xlu1.c.b16.cont [3/8] %v1811_v16, 128 }
 0x24a   : > { %2005 = vst [vmem:[%s5773_s14 + $0x50] sm:$0xff] %v4024_v32  ;;  %v1580_v3 = vadd.f32 %v1579_v20, %v5802_v4  ;;  %v1581_v58 = vpop.f32.mrb[14].mxu1  ;;  %2045 = vxpose.xlu0.c.b16.cont [3/8] %v1812_v29, 128 }
 0x24b   : > { %v1763_v15 = vmax.f32 %v1578_v11, 0.0  ;;  %v1582_v59 = vadd.f32 %v1581_v58, %v5806_v0  ;;  %v1583_v7 = vpop.f32.mrb[15].mxu1  ;;  %v5836_v11 = vpop.permute.xlu0 %1452 }
 0x24c   : > { %v1764_v31 = vmax.f32 %v1580_v3, 0.0  ;;  %v1584_v54 = vadd.f32 %v1583_v7, %v5806_v0 }
 0x24d   : > { %v1767_v36 = vmax.f32 %v1582_v59, 0.0 }
 0x24e   : > { %v4026_v27 = vpack.c.bf16 %v1764_v31, %v1763_v15  ;;  %v1768_v40 = vmax.f32 %v1584_v54, 0.0 }
 0x24f   : > { %v1815_v46 = vpack.c.bf16 %v1767_v36, %v1763_v15 }
 0x250   : > { %2007 = vst [vmem:[%s5773_s14 + $0x60] sm:$0xff] %v4026_v27  ;;  %v1816_v50 = vpack.c.bf16 %v1768_v40, %v1764_v31  ;;  %v4028_v2 = vpack.c.bf16 %v1768_v40, %v1767_v36  ;;  %v1587_v23 = vpop.f32.mrb[16].mxu1 }
 0x251   : > { %v1588_v25 = vadd.f32 %v1587_v23, %v5812_v63  ;;  %v1589_v24 = vpop.f32.mrb[17].mxu1  ;;  %2030 = vxpose.xlu1.c.b16.cont [4/8] %v1815_v46, 128  ;;  %v5842_v46 = vpop.permute.xlu1 %1457 }
 0x252   : > { %2009 = vst [vmem:[%s5773_s14 + $0x70] sm:$0xff] %v4028_v2  ;;  %v1590_v48 = vadd.f32 %v1589_v24, %v5812_v63  ;;  %v1591_v56 = vpop.f32.mrb[18].mxu1  ;;  %2046 = vxpose.xlu0.c.b16.cont [4/8] %v1816_v50, 128 }
 0x253   : > { %v1771_v42 = vmax.f32 %v1588_v25, 0.0  ;;  %v1592_v53 = vadd.f32 %v1591_v56, %v5816_v49  ;;  %v1593_v55 = vpop.f32.mrb[19].mxu1 }
 0x254   : > { %v1772_v60 = vmax.f32 %v1590_v48, 0.0  ;;  %v1594_v62 = vadd.f32 %v1593_v55, %v5816_v49  ;;  %v5846_v48 = vpop.permute.xlu0 %1462 }
 0x255   : > { %v1775_v8 = vmax.f32 %v1592_v53, 0.0 }
 0x256   : > { %v4030_v37 = vpack.c.bf16 %v1772_v60, %v1771_v42  ;;  %v1776_v61 = vmax.f32 %v1594_v62, 0.0 }
 0x257   : > { %v1819_v5 = vpack.c.bf16 %v1775_v8, %v1771_v42 }
 0x258   : > { %2011 = vst [vmem:[%s5773_s14 + $0x80] sm:$0xff] %v4030_v37  ;;  %v1820_v6 = vpack.c.bf16 %v1776_v61, %v1772_v60  ;;  %v4032_v41 = vpack.c.bf16 %v1776_v61, %v1775_v8  ;;  %v1597_v34 = vpop.f32.mrb[20].mxu1 }
 0x259   : > { %v1598_v10 = vadd.f32 %v1597_v34, %v5822_v21  ;;  %v1599_v57 = vpop.f32.mrb[21].mxu1  ;;  %2031 = vxpose.xlu1.c.b16.cont [5/8] %v1819_v5, 128 }
 0x25a   : > { %2013 = vst [vmem:[%s5773_s14 + $0x90] sm:$0xff] %v4032_v41  ;;  %v1600_v44 = vadd.f32 %v1599_v57, %v5822_v21  ;;  %v1601_v19 = vpop.f32.mrb[22].mxu1  ;;  %2047 = vxpose.xlu0.c.b16.cont [5/8] %v1820_v6, 128 }
 0x25b   : > { %v1779_v26 = vmax.f32 %v1598_v10, 0.0  ;;  %v1602_v45 = vadd.f32 %v1601_v19, %v5826_v14  ;;  %v1603_v33 = vpop.f32.mrb[23].mxu1 }
 0x25c   : > { %v1780_v9 = vmax.f32 %v1600_v44, 0.0  ;;  %v1604_v1 = vadd.f32 %v1603_v33, %v5826_v14 }
 0x25d   : > { %v1783_v22 = vmax.f32 %v1602_v45, 0.0 }
 0x25e   : > { %v4034_v38 = vpack.c.bf16 %v1780_v9, %v1779_v26  ;;  %v1784_v17 = vmax.f32 %v1604_v1, 0.0 }
 0x25f   : > { %v1823_v39 = vpack.c.bf16 %v1783_v22, %v1779_v26 }
 0x260   : > { %2015 = vst [vmem:[%s5773_s14 + $0xa0] sm:$0xff] %v4034_v38  ;;  %v1824_v13 = vpack.c.bf16 %v1784_v17, %v1780_v9  ;;  %v4036_v16 = vpack.c.bf16 %v1784_v17, %v1783_v22  ;;  %v1607_v29 = vpop.f32.mrb[24].mxu1 }
 0x261   : > { %v1608_v32 = vadd.f32 %v1607_v29, %v5832_v52  ;;  %v1609_v35 = vpop.f32.mrb[25].mxu1  ;;  %2032 = vxpose.xlu1.c.b16.cont [6/8] %v1823_v39, 128 }
 0x262   : > { %2017 = vst [vmem:[%s5773_s14 + $0xb0] sm:$0xff] %v4036_v16  ;;  %v1610_v20 = vadd.f32 %v1609_v35, %v5832_v52  ;;  %v1611_v3 = vpop.f32.mrb[26].mxu1  ;;  %2048 = vxpose.xlu0.c.b16.cont [6/8] %v1824_v13, 128 }
 0x263   : > { %v1787_v58 = vmax.f32 %v1608_v32, 0.0  ;;  %v1612_v15 = vadd.f32 %v1611_v3, %v5836_v11  ;;  %v1613_v59 = vpop.f32.mrb[27].mxu1 }
 0x264   : > { %v1788_v7 = vmax.f32 %v1610_v20, 0.0  ;;  %v1614_v31 = vadd.f32 %v1613_v59, %v5836_v11 }
 0x265   : > { %v1791_v54 = vmax.f32 %v1612_v15, 0.0 }
 0x266   : > { %v4038_v36 = vpack.c.bf16 %v1788_v7, %v1787_v58  ;;  %v1792_v27 = vmax.f32 %v1614_v31, 0.0 }
 0x267   : > { %v1827_v40 = vpack.c.bf16 %v1791_v54, %v1787_v58 }
 0x268   : > { %2019 = vst [vmem:[%s5773_s14 + $0xc0] sm:$0xff] %v4038_v36  ;;  %v1828_v50 = vpack.c.bf16 %v1792_v27, %v1788_v7  ;;  %v4040_v2 = vpack.c.bf16 %v1792_v27, %v1791_v54  ;;  %v1617_v23 = vpop.f32.mrb[28].mxu1 }
 0x269   : > { %v1618_v25 = vadd.f32 %v1617_v23, %v5842_v46  ;;  %v1619_v24 = vpop.f32.mrb[29].mxu1  ;;  %2033 = vxpose.xlu1.c.b16.cont [7/8] %v1827_v40, 128 }
 0x26a   : > { %2021 = vst [vmem:[%s5773_s14 + $0xd0] sm:$0xff] %v4040_v2  ;;  %v1620_v56 = vadd.f32 %v1619_v24, %v5842_v46  ;;  %v1621_v42 = vpop.f32.mrb[30].mxu1  ;;  %2049 = vxpose.xlu0.c.b16.cont [7/8] %v1828_v50, 128 }
 0x26b   : > { %v1795_v53 = vmax.f32 %v1618_v25, 0.0  ;;  %v1622_v55 = vadd.f32 %v1621_v42, %v5846_v48  ;;  %v1623_v60 = vpop.f32.mrb[31].mxu1 }
 0x26c   : > { %v1796_v62 = vmax.f32 %v1620_v56, 0.0  ;;  %v1624_v8 = vadd.f32 %v1623_v60, %v5846_v48 }
 0x26d   : > { %v1799_v37 = vmax.f32 %v1622_v55, 0.0 }
 0x26e   : > { %v4042_v61 = vpack.c.bf16 %v1796_v62, %v1795_v53  ;;  %v1800_v5 = vmax.f32 %v1624_v8, 0.0 }
 0x26f   : > { %v1831_v6 = vpack.c.bf16 %v1799_v37, %v1795_v53 }
 0x270   : > { %2023 = vst [vmem:[%s5773_s14 + $0xe0] sm:$0xff] %v4042_v61  ;;  %v1832_v41 = vpack.c.bf16 %v1800_v5, %v1796_v62  ;;  %v4044_v34 = vpack.c.bf16 %v1800_v5, %v1799_v37  ;;  %v1660_v10 = vpop.f32.mrb[32].mxu1 }
 0x271   : > { %v1661_v57 = vadd.f32 %v1660_v10, %v5742_v51  ;;  %v1662_v44 = vpop.f32.mrb[33].mxu1  ;;  %2034 = vxpose.xlu1.c.b16.end [8/8] %v1831_v6, 128 }
 0x272   : > { %2025 = vst [vmem:[%s5773_s14 + $0xf0] sm:$0xff] %v4044_v34  ;;  %v1663_v19 = vadd.f32 %v1662_v44, %v5742_v51  ;;  %v1664_v26 = vpop.f32.mrb[34].mxu1  ;;  %2050 = vxpose.xlu0.c.b16.end [8/8] %v1832_v41, 128 }
 0x273   : > { %v1741_v45 = vmax.f32 %v1661_v57, 0.0  ;;  %v1665_v33 = vadd.f32 %v1664_v26, %v5749_v28  ;;  %v1666_v9 = vpop.f32.mrb[35].mxu1 }
 0x274   : > { %v1742_v1 = vmax.f32 %v1663_v19, 0.0  ;;  %v1667_v22 = vadd.f32 %v1666_v9, %v5749_v28 }
 0x275   : > { %v1745_v38 = vmax.f32 %v1665_v33, 0.0 }
 0x276   : > { %v4015_v17 = vpack.c.bf16 %v1742_v1, %v1741_v45  ;;  %v1746_v39 = vmax.f32 %v1667_v22, 0.0 }
 0x277   : > { %v1805_v13 = vpack.c.bf16 %v1745_v38, %v1741_v45 }
 0x278   : > { %1996 = vst [vmem:[%s5773_s14 + $0x8] sm:$0xff] %v4015_v17  ;;  %v1806_v16 = vpack.c.bf16 %v1746_v39, %v1742_v1  ;;  %v4017_v29 = vpack.c.bf16 %v1746_v39, %v1745_v38  ;;  %v1670_v32 = vpop.f32.mrb[36].mxu1 }
 0x279   : > { %v1671_v51 = vadd.f32 %v1670_v32, %v5765_v43  ;;  %v1672_v35 = vpop.f32.mrb[37].mxu1  ;;  %2059 = vxpose.xlu0.c.b16.start [1/8] %v1805_v13, 128 }
 0x27a   : > { %1998 = vst [vmem:[%s5773_s14 + $0x18] sm:$0xff] %v4017_v29  ;;  %v1673_v20 = vadd.f32 %v1672_v35, %v5765_v43  ;;  %v1674_v3 = vpop.f32.mrb[38].mxu1  ;;  %2075 = vxpose.xlu1.c.b16.start [1/8] %v1806_v16, 128 }
 0x27b   : > { %v1749_v58 = vmax.f32 %v1671_v51, 0.0  ;;  %v1675_v28 = vadd.f32 %v1674_v3, %v5777_v12  ;;  %v1676_v15 = vpop.f32.mrb[39].mxu1 }
 0x27c   : > { %v1750_v59 = vmax.f32 %v1673_v20, 0.0  ;;  %v1677_v7 = vadd.f32 %v1676_v15, %v5777_v12 }
 0x27d   : > { %v1753_v31 = vmax.f32 %v1675_v28, 0.0 }
 0x27e   : > { %v4019_v54 = vpack.c.bf16 %v1750_v59, %v1749_v58  ;;  %v1754_v36 = vmax.f32 %v1677_v7, 0.0 }
 0x27f   : > { %v1809_v27 = vpack.c.bf16 %v1753_v31, %v1749_v58 }
 0x280   : > { %2000 = vst [vmem:[%s5773_s14 + $0x28] sm:$0xff] %v4019_v54  ;;  %v1810_v40 = vpack.c.bf16 %v1754_v36, %v1750_v59  ;;  %v4021_v50 = vpack.c.bf16 %v1754_v36, %v1753_v31  ;;  %v1680_v2 = vpop.f32.mrb[40].mxu1 }
 0x281   : > { %v1681_v43 = vadd.f32 %v1680_v2, %v5792_v18  ;;  %v1682_v23 = vpop.f32.mrb[41].mxu1  ;;  %2060 = vxpose.xlu0.c.b16.cont [2/8] %v1809_v27, 128 }
 0x282   : > { %2002 = vst [vmem:[%s5773_s14 + $0x38] sm:$0xff] %v4021_v50  ;;  %v1683_v25 = vadd.f32 %v1682_v23, %v5792_v18  ;;  %v1684_v24 = vpop.f32.mrb[42].mxu1  ;;  %2076 = vxpose.xlu1.c.b16.cont [2/8] %v1810_v40, 128 }
 0x283   : > { %v1757_v56 = vmax.f32 %v1681_v43, 0.0  ;;  %v1685_v12 = vadd.f32 %v1684_v24, %v5797_v30  ;;  %v1686_v42 = vpop.f32.mrb[43].mxu1 }
 0x284   : > { %v1758_v53 = vmax.f32 %v1683_v25, 0.0  ;;  %v1687_v55 = vadd.f32 %v1686_v42, %v5797_v30 }
 0x285   : > { %v1761_v60 = vmax.f32 %v1685_v12, 0.0 }
 0x286   : > { %v4023_v62 = vpack.c.bf16 %v1758_v53, %v1757_v56  ;;  %v1762_v8 = vmax.f32 %v1687_v55, 0.0 }
 0x287   : > { %v1813_v37 = vpack.c.bf16 %v1761_v60, %v1757_v56 }
 0x288   : > { %2004 = vst [vmem:[%s5773_s14 + $0x48] sm:$0xff] %v4023_v62  ;;  %v1814_v61 = vpack.c.bf16 %v1762_v8, %v1758_v53  ;;  %v4025_v5 = vpack.c.bf16 %v1762_v8, %v1761_v60  ;;  %v1690_v6 = vpop.f32.mrb[44].mxu1 }
 0x289   : > { %v1691_v18 = vadd.f32 %v1690_v6, %v5802_v4  ;;  %v1692_v41 = vpop.f32.mrb[45].mxu1  ;;  %2061 = vxpose.xlu0.c.b16.cont [3/8] %v1813_v37, 128 }
 0x28a   : > { %2006 = vst [vmem:[%s5773_s14 + $0x58] sm:$0xff] %v4025_v5  ;;  %v1693_v34 = vadd.f32 %v1692_v41, %v5802_v4  ;;  %v1694_v10 = vpop.f32.mrb[46].mxu1  ;;  %2077 = vxpose.xlu1.c.b16.cont [3/8] %v1814_v61, 128 }
 0x28b   : > { %v1765_v57 = vmax.f32 %v1691_v18, 0.0  ;;  %v1695_v30 = vadd.f32 %v1694_v10, %v5806_v0  ;;  %v1696_v44 = vpop.f32.mrb[47].mxu1 }
 0x28c   : > { %v1766_v19 = vmax.f32 %v1693_v34, 0.0  ;;  %v1697_v26 = vadd.f32 %v1696_v44, %v5806_v0 }
 0x28d   : > { %v1769_v45 = vmax.f32 %v1695_v30, 0.0 }
 0x28e   : > { %v4027_v33 = vpack.c.bf16 %v1766_v19, %v1765_v57  ;;  %v1770_v9 = vmax.f32 %v1697_v26, 0.0 }
 0x28f   : > { %v1817_v1 = vpack.c.bf16 %v1769_v45, %v1765_v57 }
 0x290   : > { %2008 = vst [vmem:[%s5773_s14 + $0x68] sm:$0xff] %v4027_v33  ;;  %v1818_v22 = vpack.c.bf16 %v1770_v9, %v1766_v19  ;;  %v4029_v38 = vpack.c.bf16 %v1770_v9, %v1769_v45  ;;  %v1700_v17 = vpop.f32.mrb[48].mxu1 }
 0x291   : > { %v1701_v4 = vadd.f32 %v1700_v17, %v5812_v63  ;;  %v1702_v39 = vpop.f32.mrb[49].mxu1  ;;  %2062 = vxpose.xlu0.c.b16.cont [4/8] %v1817_v1, 128 }
 0x292   : > { %2010 = vst [vmem:[%s5773_s14 + $0x78] sm:$0xff] %v4029_v38  ;;  %v1703_v13 = vadd.f32 %v1702_v39, %v5812_v63  ;;  %v1704_v16 = vpop.f32.mrb[50].mxu1  ;;  %2078 = vxpose.xlu1.c.b16.cont [4/8] %v1818_v22, 128 }
 0x293   : > { %v1773_v29 = vmax.f32 %v1701_v4, 0.0  ;;  %v1705_v0 = vadd.f32 %v1704_v16, %v5816_v49  ;;  %v1706_v32 = vpop.f32.mrb[51].mxu1 }
 0x294   : > { %v1774_v51 = vmax.f32 %v1703_v13, 0.0  ;;  %v1707_v35 = vadd.f32 %v1706_v32, %v5816_v49 }
 0x295   : > { %v1777_v20 = vmax.f32 %v1705_v0, 0.0 }
 0x296   : > { %v4031_v3 = vpack.c.bf16 %v1774_v51, %v1773_v29  ;;  %v1778_v58 = vmax.f32 %v1707_v35, 0.0 }
 0x297   : > { %v1821_v28 = vpack.c.bf16 %v1777_v20, %v1773_v29 }
 0x298   : > { %2012 = vst [vmem:[%s5773_s14 + $0x88] sm:$0xff] %v4031_v3  ;;  %v1822_v15 = vpack.c.bf16 %v1778_v58, %v1774_v51  ;;  %v4033_v59 = vpack.c.bf16 %v1778_v58, %v1777_v20  ;;  %v1710_v7 = vpop.f32.mrb[52].mxu1  ;;  %v4550_v20 = vld [vmem:[%s6471_s7] sm:$0xff]   ;;  %v4551_v58 = vld [vmem:[%s6471_s7 + $0x8] sm:$0xff]  }
 0x299   : > { %v1711_v63 = vadd.f32 %v1710_v7, %v5822_v21  ;;  %v1712_v31 = vpop.f32.mrb[53].mxu1  ;;  %2063 = vxpose.xlu0.c.b16.cont [5/8] %v1821_v28, 128  ;;  %4342 = vmatprep.subr.bf16.mxu1 %v4550_v20  ;;  %v4552_v28 = vld [vmem:[%s6471_s7 + $0x10] sm:$0xff]  }
 0x29a   : > { %2014 = vst [vmem:[%s5773_s14 + $0x98] sm:$0xff] %v4033_v59  ;;  %v1713_v54 = vadd.f32 %v1712_v31, %v5822_v21  ;;  %v1714_v36 = vpop.f32.mrb[54].mxu1  ;;  %2079 = vxpose.xlu1.c.b16.cont [5/8] %v1822_v15, 128  ;;  %4343 = vmatpush3.bf16.msra.mxu1 %v4550_v20  ;;  %v4553_v59 = vld [vmem:[%s6471_s7 + $0x18] sm:$0xff]   ;;  %v4555_v31 = vld [vmem:[%s6471_s7 + $0x28] sm:$0xff]  }
 0x29b   : > { %v1781_v27 = vmax.f32 %v1711_v63, 0.0  ;;  %v1715_v49 = vadd.f32 %v1714_v36, %v5826_v14  ;;  %v1716_v40 = vpop.f32.mrb[55].mxu1  ;;  %4344 = vmatprep.subr.bf16.mxu1 %v4551_v58  ;;  %v4554_v63 = vld [vmem:[%s6471_s7 + $0x20] sm:$0xff]   ;;  %v4556_v36 = vld [vmem:[%s6471_s7 + $0x30] sm:$0xff]  }
 0x29c   : > { %v1782_v50 = vmax.f32 %v1713_v54, 0.0  ;;  %v1717_v2 = vadd.f32 %v1716_v40, %v5826_v14 }
 0x29d   : > { %v1785_v43 = vmax.f32 %v1715_v49, 0.0 }
 0x29e   : > { %v4035_v23 = vpack.c.bf16 %v1782_v50, %v1781_v27  ;;  %v1786_v25 = vmax.f32 %v1717_v2, 0.0  ;;  %4345 = vmatpush3.bf16.msra.mxu1 %v4551_v58 }
 0x29f   : > { %v1825_v24 = vpack.c.bf16 %v1785_v43, %v1781_v27  ;;  %4346 = vmatprep.subr.bf16.mxu1 %v4552_v28  ;;  %v4557_v27 = vld [vmem:[%s6471_s7 + $0x38] sm:$0xff]  }
 0x2a0   : > { %2016 = vst [vmem:[%s5773_s14 + $0xa8] sm:$0xff] %v4035_v23  ;;  %v1826_v56 = vpack.c.bf16 %v1786_v25, %v1782_v50  ;;  %v4037_v12 = vpack.c.bf16 %v1786_v25, %v1785_v43  ;;  %v1720_v42 = vpop.f32.mrb[56].mxu1 }
 0x2a1   : > { %v1721_v21 = vadd.f32 %v1720_v42, %v5832_v52  ;;  %v1722_v53 = vpop.f32.mrb[57].mxu1  ;;  %2064 = vxpose.xlu0.c.b16.cont [6/8] %v1825_v24, 128 }
 0x2a2   : > { %2018 = vst [vmem:[%s5773_s14 + $0xb8] sm:$0xff] %v4037_v12  ;;  %v1723_v55 = vadd.f32 %v1722_v53, %v5832_v52  ;;  %v1724_v60 = vpop.f32.mrb[58].mxu1  ;;  %2080 = vxpose.xlu1.c.b16.cont [6/8] %v1826_v56, 128  ;;  %4347 = vmatpush3.bf16.msra.mxu1 %v4552_v28 }
 0x2a3   : > { %v1789_v62 = vmax.f32 %v1721_v21, 0.0  ;;  %v1725_v14 = vadd.f32 %v1724_v60, %v5836_v11  ;;  %v1726_v8 = vpop.f32.mrb[59].mxu1  ;;  %4348 = vmatprep.subr.bf16.mxu1 %v4553_v59 }
 0x2a4   : > { %v1790_v37 = vmax.f32 %v1723_v55, 0.0  ;;  %v1727_v61 = vadd.f32 %v1726_v8, %v5836_v11  ;;  %v2107_v55 = vld [vmem:[%s6470_s6] sm:$0x3]  ;;  %v6539_v8 = vld [vmem:[#allocation6_spill] sm:$0xff] }
 0x2a5   : > { %v1793_v5 = vmax.f32 %v1725_v14, 0.0 }
 0x2a6   : > { %v4039_v6 = vpack.c.bf16 %v1790_v37, %v1789_v62  ;;  %v1794_v18 = vmax.f32 %v1727_v61, 0.0  ;;  %4349 = vmatpush3.bf16.msra.mxu1 %v4553_v59 }
 0x2a7   : > { %v1829_v41 = vpack.c.bf16 %v1793_v5, %v1789_v62  ;;  %4350 = vmatprep.subr.bf16.mxu1 %v4554_v63  ;;  %v6538_v62 = vld [vmem:[#allocation5_spill] sm:$0xff] }
 0x2a8   : > { %2020 = vst [vmem:[%s5773_s14 + $0xc8] sm:$0xff] %v4039_v6  ;;  %v1830_v34 = vpack.c.bf16 %v1794_v18, %v1790_v37  ;;  %v4041_v10 = vpack.c.bf16 %v1794_v18, %v1793_v5  ;;  %v1730_v57 = vpop.f32.mrb[60].mxu1  ;;  %v5956_v14 = vrot.slane %v2107_v55, %v6538_v62  ;;  %v5959_v37 = vrot.slane %v2107_v55, %v6539_v8 }
 0x2a9   : > { %v1731_v52 = vadd.f32 %v1730_v57, %v5842_v46  ;;  %v1732_v30 = vpop.f32.mrb[61].mxu1  ;;  %2065 = vxpose.xlu0.c.b16.cont [7/8] %v1829_v41, 128 }
 0x2aa   : > { %2022 = vst [vmem:[%s5773_s14 + $0xd8] sm:$0xff] %v4041_v10  ;;  %v1733_v44 = vadd.f32 %v1732_v30, %v5842_v46  ;;  %v1734_v19 = vpop.f32.mrb[62].mxu1  ;;  %2081 = vxpose.xlu1.c.b16.cont [7/8] %v1830_v34, 128  ;;  %4351 = vmatpush3.bf16.msra.mxu1 %v4554_v63  ;;  %v5967_v34 = vld [vmem:[%s6473_s9] ss:$0 sm:$0xff] }
 0x2ab   : > { %v1797_v11 = vmax.f32 %v1731_v52, 0.0  ;;  %v1735_v26 = vadd.f32 %v1734_v19, %v5846_v48  ;;  %v1736_v45 = vpop.f32.mrb[63].mxu1  ;;  %4352 = vmatprep.subr.bf16.mxu1 %v4555_v31 }
 0x2ac   : > { %v1798_v33 = vmax.f32 %v1733_v44, 0.0  ;;  %v1737_v9 = vadd.f32 %v1736_v45, %v5846_v48 }
 0x2ad   : > { %v1801_v1 = vmax.f32 %v1735_v26, 0.0 }
 0x2ae   : > { %v4043_v22 = vpack.c.bf16 %v1798_v33, %v1797_v11  ;;  %v1802_v38 = vmax.f32 %v1737_v9, 0.0  ;;  %4353 = vmatpush3.bf16.msra.mxu1 %v4555_v31 }
 0x2af   : > { %v1833_v17 = vpack.c.bf16 %v1801_v1, %v1797_v11  ;;  %4354 = vmatprep.subr.bf16.mxu1 %v4556_v36 }
 0x2b0   : > { %2024 = vst [vmem:[%s5773_s14 + $0xe8] sm:$0xff] %v4043_v22  ;;  %v1834_v4 = vpack.c.bf16 %v1802_v38, %v1798_v33  ;;  %v4045_v39 = vpack.c.bf16 %v1802_v38, %v1801_v1 }
 0x2b1   : > { %2066 = vxpose.xlu0.c.b16.end [8/8] %v1833_v17, 128 }
 0x2b2   : > { %2026 = vst [vmem:[%s5773_s14 + $0xf8] sm:$0xff] %v4045_v39  ;;  %2082 = vxpose.xlu1.c.b16.end [8/8] %v1834_v4, 128  ;;  %4355 = vmatpush3.bf16.msra.mxu1 %v4556_v36 }
 0x2b3   : > { %4356 = vmatprep.subr.bf16.mxu1 %v4557_v27 }
 0x2b6   : > { %4357 = vmatpush3.bf16.msra.mxu1 %v4557_v27 }
 0x2bb   : > { %v2035_v46 = vpop.trf.xlu1 }
 0x2bc   : > { %2232 = vmatmul.mubr.bf16.vlgmr.msra.gmra.mrb[0].mxu0 %v2035_v46  ;;  %v2051_v35 = vpop.trf.xlu0 }
 0x2bd   : > { %2241 = vmatprep.mubr.bf16.mxu0 %v6537_v47 }
 0x2bf   : > { %v2036_v13 = vpop.trf.xlu1 }
 0x2c0   : > { %v2052_v3 = vpop.trf.xlu0 }
 0x2c3   : > { %v2037_v16 = vpop.trf.xlu1 }
 0x2c4   : > { %2242 = vmatmul.mubr.bf16.gmra.mrb[4].mxu0 %v2036_v13  ;;  %v2053_v15 = vpop.trf.xlu0 }
 0x2c5   : > { %2251 = vmatprep.mubr.bf16.mxu0 %v6537_v47 }
 0x2c7   : > { %v2038_v48 = vpop.trf.xlu1 }
 0x2c8   : > { %v2054_v7 = vpop.trf.xlu0 }
 0x2cb   : > { %v2039_v29 = vpop.trf.xlu1 }
 0x2cc   : > { %2252 = vmatmul.mubr.bf16.gmra.mrb[8].mxu0 %v2037_v16  ;;  %v2055_v54 = vpop.trf.xlu0 }
 0x2cd   : > { %2261 = vmatprep.mubr.bf16.mxu0 %v6537_v47 }
 0x2cf   : > { %v2040_v0 = vpop.trf.xlu1 }
 0x2d0   : > { %v2056_v49 = vpop.trf.xlu0 }
 0x2d3   : > { %v2041_v32 = vpop.trf.xlu1 }
 0x2d4   : > { %2262 = vmatmul.mubr.bf16.gmra.mrb[12].mxu0 %v2038_v48  ;;  %v2057_v40 = vpop.trf.xlu0 }
 0x2d5   : > { %2271 = vmatprep.mubr.bf16.mxu0 %v6537_v47 }
 0x2d7   : > { %v2042_v51 = vpop.trf.xlu1 }
 0x2d8   : > { %v2058_v50 = vpop.trf.xlu0 }
 0x2dc   : > { %2272 = vmatmul.mubr.bf16.gmra.mrb[16].mxu0 %v2039_v29 }
 0x2dd   : > { %2281 = vmatprep.mubr.bf16.mxu0 %v6537_v47 }
 0x2e4   : > { %2282 = vmatmul.mubr.bf16.gmra.mrb[20].mxu0 %v2040_v0 }
 0x2e5   : > { %2291 = vmatprep.mubr.bf16.mxu0 %v6537_v47 }
 0x2ec   : > { %2292 = vmatmul.mubr.bf16.gmra.mrb[24].mxu0 %v2041_v32 }
 0x2ed   : > { %2301 = vmatprep.mubr.bf16.mxu0 %v6537_v47 }
 0x2f4   : > { %2302 = vmatmul.mubr.bf16.gmra.mrb[28].mxu0 %v2042_v51 }
 0x2f5   : > { %2311 = vmatprep.mubr.bf16.mxu0 %v6537_v47 }
 0x2fb   : > { %v2067_v2 = vpop.trf.xlu0 }
 0x2fc   : > { %2312 = vmatmul.mubr.bf16.gmra.mrb[32].mxu0 %v2051_v35  ;;  %v2083_v21 = vpop.trf.xlu1 }
 0x2fd   : > { %2321 = vmatprep.mubr.bf16.mxu0 %v6537_v47 }
 0x2ff   : > { %v2068_v43 = vpop.trf.xlu0 }
 0x300   : > { %v2084_v53 = vpop.trf.xlu1 }
 0x303   : > { %v2069_v23 = vpop.trf.xlu0 }
 0x304   : > { %2322 = vmatmul.mubr.bf16.gmra.mrb[36].mxu0 %v2052_v3  ;;  %v2085_v60 = vpop.trf.xlu1 }
 0x305   : > { %2331 = vmatprep.mubr.bf16.mxu0 %v6537_v47 }
 0x307   : > { %v2070_v25 = vpop.trf.xlu0 }
 0x308   : > { %v2086_v10 = vpop.trf.xlu1 }
 0x30b   : > { %v2071_v24 = vpop.trf.xlu0 }
 0x30c   : > { %2332 = vmatmul.mubr.bf16.gmra.mrb[40].mxu0 %v2053_v15  ;;  %v2087_v39 = vpop.trf.xlu1 }
 0x30d   : > { %2341 = vmatprep.mubr.bf16.mxu0 %v6537_v47 }
 0x30f   : > { %v2072_v56 = vpop.trf.xlu0 }
 0x313   : > { %v2073_v12 = vpop.trf.xlu0 }
 0x314   : > { %2342 = vmatmul.mubr.bf16.gmra.mrb[44].mxu0 %v2054_v7  ;;  %v2088_v7 = vpop.trf.xlu1 }
 0x315   : > { %2351 = vmatprep.mubr.bf16.mxu0 %v6537_v47 }
 0x317   : > { %v2074_v42 = vpop.trf.xlu0 }
 0x31c   : > { %2352 = vmatmul.mubr.bf16.gmra.mrb[48].mxu0 %v2055_v54 }
 0x31d   : > { %2361 = vmatprep.mubr.bf16.mxu0 %v6537_v47 }
 0x324   : > { %2362 = vmatmul.mubr.bf16.gmra.mrb[52].mxu0 %v2056_v49 }
 0x325   : > { %2371 = vmatprep.mubr.bf16.mxu0 %v6537_v47 }
 0x32c   : > { %2372 = vmatmul.mubr.bf16.gmra.mrb[56].mxu0 %v2057_v40 }
 0x32d   : > { %2381 = vmatprep.mubr.bf16.mxu0 %v6537_v47 }
 0x334   : > { %2382 = vmatmul.mubr.bf16.gmra.mrb[60].mxu0 %v2058_v50 }
 0x335   : > { %2391 = vmatprep.mubr.bf16.mxu0 %v6537_v47 }
 0x33c   : > { %2392 = vmatmul.mubr.bf16.gmra.mrb[64].mxu0 %v2067_v2 }
 0x33d   : > { %2401 = vmatprep.mubr.bf16.mxu0 %v6537_v47 }
 0x344   : > { %2402 = vmatmul.mubr.bf16.gmra.mrb[68].mxu0 %v2068_v43 }
 0x345   : > { %2411 = vmatprep.mubr.bf16.mxu0 %v6537_v47 }
 0x34c   : > { %2412 = vmatmul.mubr.bf16.gmra.mrb[72].mxu0 %v2069_v23 }
 0x34d   : > { %2421 = vmatprep.mubr.bf16.mxu0 %v6537_v47 }
 0x354   : > { %2422 = vmatmul.mubr.bf16.gmra.mrb[76].mxu0 %v2070_v25 }
 0x355   : > { %2431 = vmatprep.mubr.bf16.mxu0 %v6537_v47 }
 0x35c   : > { %2432 = vmatmul.mubr.bf16.gmra.mrb[80].mxu0 %v2071_v24 }
 0x35d   : > { %2441 = vmatprep.mubr.bf16.mxu0 %v6537_v47 }
 0x364   : > { %2442 = vmatmul.mubr.bf16.gmra.mrb[84].mxu0 %v2072_v56 }
 0x365   : > { %2451 = vmatprep.mubr.bf16.mxu0 %v6537_v47 }
 0x36c   : > { %2452 = vmatmul.mubr.bf16.gmra.mrb[88].mxu0 %v2073_v12 }
 0x36d   : > { %2461 = vmatprep.mubr.bf16.mxu0 %v6537_v47 }
 0x374   : > { %2462 = vmatmul.mubr.bf16.gmra.mrb[92].mxu0 %v2074_v42  ;;  %v2089_v42 = vpop.trf.xlu1 }
 0x375   : > { %2471 = vmatprep.mubr.bf16.mxu0 %v6537_v47 }
 0x37c   : > { %2472 = vmatmul.mubr.bf16.gmra.mrb[96].mxu0 %v2083_v21 }
 0x37d   : > { %2481 = vmatprep.mubr.bf16.mxu0 %v6537_v47 }
 0x384   : > { %2482 = vmatmul.mubr.bf16.gmra.mrb[100].mxu0 %v2084_v53 }
 0x385   : > { %2491 = vmatprep.mubr.bf16.mxu0 %v6537_v47 }
 0x38c   : > { %2492 = vmatmul.mubr.bf16.gmra.mrb[104].mxu0 %v2085_v60 }
 0x38d   : > { %2501 = vmatprep.mubr.bf16.mxu0 %v6537_v47 }
 0x38f   : > { %v2233_v61 = vpop.f32.mrb[0].mxu0 }
 0x390   : > { %v2234_v5 = vadd.f32 %v2233_v61, %v5956_v14  ;;  %v2235_v6 = vpop.f32.mrb[1].mxu0 }
 0x391   : > { %v2236_v18 = vadd.f32 %v2235_v6, %v5959_v37  ;;  %v2237_v41 = vpop.f32.mrb[2].mxu0 }
 0x392   : > { %v2552_v57 = vmax.f32 %v2234_v5, 0.0  ;;  %v2238_v52 = vadd.f32 %v2237_v41, %v5956_v14  ;;  %v2239_v30 = vpop.f32.mrb[3].mxu0 }
 0x393   : > { %v2240_v44 = vadd.f32 %v2239_v30, %v5959_v37  ;;  %v2553_v26 = vmax.f32 %v2236_v18, 0.0 }
 0x394   : > { %v2554_v19 = vmax.f32 %v2238_v52, 0.0  ;;  %2502 = vmatmul.mubr.bf16.gmra.mrb[108].mxu0 %v2086_v10  ;;  %v3079_v11 = vmul.f32 %v5967_v34, %v2552_v57 }
 0x395   : > { %v2555_v45 = vmax.f32 %v2240_v44, 0.0  ;;  %2511 = vmatprep.mubr.bf16.mxu0 %v6537_v47  ;;  %v2090_v44 = vpop.trf.xlu1 }
 0x396   : > { %v3080_v33 = vmul.f32 %v5967_v34, %v2554_v19  ;;  %3143 = vadd.xlane.f32.xlu0 %v3079_v11 }
 0x397   : > { %v2680_v9 = vpack.c.bf16 %v2555_v45, %v2553_v26  ;;  %v2243_v1 = vpop.f32.mrb[4].mxu0 }
 0x398   : > { %v2244_v22 = vadd.f32 %v2243_v1, %v5956_v14  ;;  %3145 = vadd.xlane.f32.xlu1 %v3080_v33  ;;  %v2245_v38 = vpop.f32.mrb[5].mxu0 }
 0x399   : > { %v2246_v17 = vadd.f32 %v2245_v38, %v5959_v37  ;;  %v2247_v4 = vpop.f32.mrb[6].mxu0  ;;  %4358 = vmatprep.mubr.bf16.mxu1 %v2680_v9 }
 0x39a   : > { %v2556_v46 = vmax.f32 %v2244_v22, 0.0  ;;  %v2248_v13 = vadd.f32 %v2247_v4, %v5956_v14  ;;  %v2249_v16 = vpop.f32.mrb[7].mxu0 }
 0x39b   : > { %v2250_v48 = vadd.f32 %v2249_v16, %v5959_v37  ;;  %v2557_v32 = vmax.f32 %v2246_v17, 0.0 }
 0x39c   : > { %v3081_v29 = vmul.f32 %v5967_v34, %v2556_v46  ;;  %v2558_v0 = vmax.f32 %v2248_v13, 0.0  ;;  %2512 = vmatmul.mubr.bf16.gmra.mrb[112].mxu0 %v2087_v39 }
 0x39d   : > { %v2559_v51 = vmax.f32 %v2250_v48, 0.0  ;;  %2521 = vmatprep.mubr.bf16.mxu0 %v6537_v47 }
 0x39e   : > { %v3082_v35 = vmul.f32 %v5967_v34, %v2558_v0  ;;  %3147 = vadd.xlane.f32.xlu0 %v3081_v29 }
 0x39f   : > { %v2681_v20 = vpack.c.bf16 %v2559_v51, %v2557_v32  ;;  %v2253_v3 = vpop.f32.mrb[8].mxu0 }
 0x3a0   : > { %v2254_v58 = vadd.f32 %v2253_v3, %v5956_v14  ;;  %3149 = vadd.xlane.f32.xlu1 %v3082_v35  ;;  %v2255_v28 = vpop.f32.mrb[9].mxu0 }
 0x3a1   : > { %v2256_v15 = vadd.f32 %v2255_v28, %v5959_v37  ;;  %v2257_v59 = vpop.f32.mrb[10].mxu0  ;;  %4359 = vmatmul.mubr.bf16.vlgmr.msra.gmra.mrb[64].mxu1 %v2681_v20 }
 0x3a2   : > { %v2560_v63 = vmax.f32 %v2254_v58, 0.0  ;;  %v2258_v31 = vadd.f32 %v2257_v59, %v5956_v14  ;;  %v2259_v54 = vpop.f32.mrb[11].mxu0 }
 0x3a3   : > { %v2260_v36 = vadd.f32 %v2259_v54, %v5959_v37  ;;  %v2561_v40 = vmax.f32 %v2256_v15, 0.0 }
 0x3a4   : > { %v3083_v27 = vmul.f32 %v5967_v34, %v2560_v63  ;;  %v2562_v49 = vmax.f32 %v2258_v31, 0.0  ;;  %2522 = vmatmul.mubr.bf16.gmra.mrb[116].mxu0 %v2088_v7 }
 0x3a5   : > { %v2563_v50 = vmax.f32 %v2260_v36, 0.0  ;;  %2531 = vmatprep.mubr.bf16.mxu0 %v6537_v47 }
 0x3a6   : > { %v3084_v2 = vmul.f32 %v5967_v34, %v2562_v49  ;;  %3151 = vadd.xlane.f32.xlu0 %v3083_v27 }
 0x3a7   : > { %v2682_v43 = vpack.c.bf16 %v2563_v50, %v2561_v40  ;;  %v2263_v23 = vpop.f32.mrb[12].mxu0 }
 0x3a8   : > { %v2264_v25 = vadd.f32 %v2263_v23, %v5956_v14  ;;  %3153 = vadd.xlane.f32.xlu1 %v3084_v2  ;;  %v2265_v24 = vpop.f32.mrb[13].mxu0 }
 0x3a9   : > { %v2266_v56 = vadd.f32 %v2265_v24, %v5959_v37  ;;  %v2267_v12 = vpop.f32.mrb[14].mxu0  ;;  %4362 = vmatprep.mubr.bf16.mxu1 %v2682_v43 }
 0x3aa   : > { %v2564_v21 = vmax.f32 %v2264_v25, 0.0  ;;  %v2268_v53 = vadd.f32 %v2267_v12, %v5956_v14  ;;  %v2269_v55 = vpop.f32.mrb[15].mxu0 }
 0x3ab   : > { %v2270_v60 = vadd.f32 %v2269_v55, %v5959_v37  ;;  %v2565_v61 = vmax.f32 %v2266_v56, 0.0 }
 0x3ac   : > { %v3085_v62 = vmul.f32 %v5967_v34, %v2564_v21  ;;  %v2566_v8 = vmax.f32 %v2268_v53, 0.0  ;;  %2532 = vmatmul.mubr.bf16.gmra.mrb[120].mxu0 %v2089_v42 }
 0x3ad   : > { %v2567_v5 = vmax.f32 %v2270_v60, 0.0  ;;  %2541 = vmatprep.mubr.bf16.mxu0 %v6537_v47 }
 0x3ae   : > { %v3086_v6 = vmul.f32 %v5967_v34, %v2566_v8  ;;  %3155 = vadd.xlane.f32.xlu0 %v3085_v62 }
 0x3af   : > { %v2683_v18 = vpack.c.bf16 %v2567_v5, %v2565_v61  ;;  %v2273_v41 = vpop.f32.mrb[16].mxu0 }
 0x3b0   : > { %v2274_v10 = vadd.f32 %v2273_v41, %v5956_v14  ;;  %3157 = vadd.xlane.f32.xlu1 %v3086_v6  ;;  %v2275_v57 = vpop.f32.mrb[17].mxu0 }
 0x3b1   : > { %v2276_v52 = vadd.f32 %v2275_v57, %v5959_v37  ;;  %v2277_v30 = vpop.f32.mrb[18].mxu0  ;;  %4363 = vmatmul.mubr.bf16.gmra.mrb[68].mxu1 %v2683_v18 }
 0x3b2   : > { %v2568_v19 = vmax.f32 %v2274_v10, 0.0  ;;  %v2278_v11 = vadd.f32 %v2277_v30, %v5956_v14  ;;  %v2279_v26 = vpop.f32.mrb[19].mxu0 }
 0x3b3   : > { %v2280_v47 = vadd.f32 %v2279_v26, %v5959_v37  ;;  %v2569_v9 = vmax.f32 %v2276_v52, 0.0 }
 0x3b4   : > { %v3087_v45 = vmul.f32 %v5967_v34, %v2568_v19  ;;  %v2570_v33 = vmax.f32 %v2278_v11, 0.0  ;;  %2542 = vmatmul.mubr.bf16.gmra.mrb[124].mxu0 %v2090_v44 }
 0x3b5   : > { %v2571_v1 = vmax.f32 %v2280_v47, 0.0 }
 0x3b6   : > { %v3088_v22 = vmul.f32 %v5967_v34, %v2570_v33  ;;  %3159 = vadd.xlane.f32.xlu0 %v3087_v45 }
 0x3b7   : > { %v2684_v38 = vpack.c.bf16 %v2571_v1, %v2569_v9  ;;  %v2283_v17 = vpop.f32.mrb[20].mxu0 }
 0x3b8   : > { %v2284_v4 = vadd.f32 %v2283_v17, %v5956_v14  ;;  %3161 = vadd.xlane.f32.xlu1 %v3088_v22  ;;  %v2285_v39 = vpop.f32.mrb[21].mxu0 }
 0x3b9   : > { %v2286_v46 = vadd.f32 %v2285_v39, %v5959_v37  ;;  %v2287_v13 = vpop.f32.mrb[22].mxu0  ;;  %4366 = vmatprep.mubr.bf16.mxu1 %v2684_v38 }
 0x3ba   : > { %v2572_v16 = vmax.f32 %v2284_v4, 0.0  ;;  %v2288_v48 = vadd.f32 %v2287_v13, %v5956_v14  ;;  %v2289_v29 = vpop.f32.mrb[23].mxu0 }
 0x3bb   : > { %v2290_v0 = vadd.f32 %v2289_v29, %v5959_v37  ;;  %v2573_v35 = vmax.f32 %v2286_v46, 0.0 }
 0x3bc   : > { %v3089_v32 = vmul.f32 %v5967_v34, %v2572_v16  ;;  %v2574_v51 = vmax.f32 %v2288_v48, 0.0 }
 0x3bd   : > { %v2575_v20 = vmax.f32 %v2290_v0, 0.0 }
 0x3be   : > { %v3090_v3 = vmul.f32 %v5967_v34, %v2574_v51  ;;  %3163 = vadd.xlane.f32.xlu0 %v3089_v32 }
 0x3bf   : > { %v2685_v58 = vpack.c.bf16 %v2575_v20, %v2573_v35  ;;  %v2293_v28 = vpop.f32.mrb[24].mxu0 }
 0x3c0   : > { %v2294_v15 = vadd.f32 %v2293_v28, %v5956_v14  ;;  %3165 = vadd.xlane.f32.xlu1 %v3090_v3  ;;  %v2295_v59 = vpop.f32.mrb[25].mxu0 }
 0x3c1   : > { %v2296_v7 = vadd.f32 %v2295_v59, %v5959_v37  ;;  %v2297_v63 = vpop.f32.mrb[26].mxu0  ;;  %4367 = vmatmul.mubr.bf16.gmra.mrb[72].mxu1 %v2685_v58 }
 0x3c2   : > { %v2576_v31 = vmax.f32 %v2294_v15, 0.0  ;;  %v2298_v54 = vadd.f32 %v2297_v63, %v5956_v14  ;;  %v2299_v36 = vpop.f32.mrb[27].mxu0 }
 0x3c3   : > { %v2300_v27 = vadd.f32 %v2299_v36, %v5959_v37  ;;  %v2577_v50 = vmax.f32 %v2296_v7, 0.0 }
 0x3c4   : > { %v3091_v49 = vmul.f32 %v5967_v34, %v2576_v31  ;;  %v2578_v40 = vmax.f32 %v2298_v54, 0.0 }
 0x3c5   : > { %v2579_v2 = vmax.f32 %v2300_v27, 0.0 }
 0x3c6   : > { %v3092_v43 = vmul.f32 %v5967_v34, %v2578_v40  ;;  %3167 = vadd.xlane.f32.xlu0 %v3091_v49 }
 0x3c7   : > { %v2686_v23 = vpack.c.bf16 %v2579_v2, %v2577_v50  ;;  %v2303_v25 = vpop.f32.mrb[28].mxu0 }
 0x3c8   : > { %v2304_v24 = vadd.f32 %v2303_v25, %v5956_v14  ;;  %3169 = vadd.xlane.f32.xlu1 %v3092_v43  ;;  %v2305_v56 = vpop.f32.mrb[29].mxu0 }
 0x3c9   : > { %v2306_v12 = vadd.f32 %v2305_v56, %v5959_v37  ;;  %v2307_v42 = vpop.f32.mrb[30].mxu0  ;;  %4370 = vmatprep.mubr.bf16.mxu1 %v2686_v23 }
 0x3ca   : > { %v2580_v21 = vmax.f32 %v2304_v24, 0.0  ;;  %v2308_v53 = vadd.f32 %v2307_v42, %v5956_v14  ;;  %v2309_v55 = vpop.f32.mrb[31].mxu0 }
 0x3cb   : > { %v2310_v60 = vadd.f32 %v2309_v55, %v5959_v37  ;;  %v2581_v61 = vmax.f32 %v2306_v12, 0.0 }
 0x3cc   : > { %v3093_v62 = vmul.f32 %v5967_v34, %v2580_v21  ;;  %v2582_v8 = vmax.f32 %v2308_v53, 0.0 }
 0x3cd   : > { %v2583_v5 = vmax.f32 %v2310_v60, 0.0 }
 0x3ce   : > { %v3094_v6 = vmul.f32 %v5967_v34, %v2582_v8  ;;  %3171 = vadd.xlane.f32.xlu0 %v3093_v62 }
 0x3cf   : > { %v2687_v18 = vpack.c.bf16 %v2583_v5, %v2581_v61  ;;  %v2313_v41 = vpop.f32.mrb[32].mxu0 }
 0x3d0   : > { %v2314_v10 = vadd.f32 %v2313_v41, %v5956_v14  ;;  %v2315_v57 = vpop.f32.mrb[33].mxu0  ;;  %3173 = vadd.xlane.f32.xlu1 %v3094_v6 }
 0x3d1   : > { %v2316_v52 = vadd.f32 %v2315_v57, %v5959_v37  ;;  %v2317_v30 = vpop.f32.mrb[34].mxu0  ;;  %4371 = vmatmul.mubr.bf16.gmra.mrb[76].mxu1 %v2687_v18 }
 0x3d2   : > { %v2584_v44 = vmax.f32 %v2314_v10, 0.0  ;;  %v2318_v19 = vadd.f32 %v2317_v30, %v5956_v14  ;;  %v2319_v11 = vpop.f32.mrb[35].mxu0 }
 0x3d3   : > { %v2320_v26 = vadd.f32 %v2319_v11, %v5959_v37  ;;  %v2585_v33 = vmax.f32 %v2316_v52, 0.0 }
 0x3d4   : > { %v3095_v47 = vmul.f32 %v5967_v34, %v2584_v44  ;;  %v2586_v45 = vmax.f32 %v2318_v19, 0.0 }
 0x3d5   : > { %v2587_v9 = vmax.f32 %v2320_v26, 0.0 }
 0x3d6   : > { %v3096_v1 = vmul.f32 %v5967_v34, %v2586_v45  ;;  %3175 = vadd.xlane.f32.xlu0 %v3095_v47 }
 0x3d7   : > { %v2688_v22 = vpack.c.bf16 %v2587_v9, %v2585_v33  ;;  %v2323_v38 = vpop.f32.mrb[36].mxu0 }
 0x3d8   : > { %v2324_v17 = vadd.f32 %v2323_v38, %v5956_v14  ;;  %v2325_v4 = vpop.f32.mrb[37].mxu0  ;;  %3177 = vadd.xlane.f32.xlu1 %v3096_v1 }
 0x3d9   : > { %v2326_v39 = vadd.f32 %v2325_v4, %v5959_v37  ;;  %v2327_v46 = vpop.f32.mrb[38].mxu0  ;;  %4374 = vmatprep.mubr.bf16.mxu1 %v2688_v22 }
 0x3da   : > { %v2588_v13 = vmax.f32 %v2324_v17, 0.0  ;;  %v2328_v16 = vadd.f32 %v2327_v46, %v5956_v14  ;;  %v2329_v48 = vpop.f32.mrb[39].mxu0 }
 0x3db   : > { %v2330_v29 = vadd.f32 %v2329_v48, %v5959_v37  ;;  %v2589_v51 = vmax.f32 %v2326_v39, 0.0 }
 0x3dc   : > { %v3097_v0 = vmul.f32 %v5967_v34, %v2588_v13  ;;  %v2590_v32 = vmax.f32 %v2328_v16, 0.0 }
 0x3dd   : > { %v2591_v35 = vmax.f32 %v2330_v29, 0.0 }
 0x3de   : > { %v3098_v20 = vmul.f32 %v5967_v34, %v2590_v32  ;;  %3179 = vadd.xlane.f32.xlu0 %v3097_v0 }
 0x3df   : > { %v2689_v3 = vpack.c.bf16 %v2591_v35, %v2589_v51  ;;  %v2333_v58 = vpop.f32.mrb[40].mxu0 }
 0x3e0   : > { %v2334_v28 = vadd.f32 %v2333_v58, %v5956_v14  ;;  %v2335_v15 = vpop.f32.mrb[41].mxu0  ;;  %3181 = vadd.xlane.f32.xlu1 %v3098_v20 }
 0x3e1   : > { %v2336_v59 = vadd.f32 %v2335_v15, %v5959_v37  ;;  %v2337_v7 = vpop.f32.mrb[42].mxu0  ;;  %4375 = vmatmul.mubr.bf16.gmra.mrb[80].mxu1 %v2689_v3 }
 0x3e2   : > { %v2592_v63 = vmax.f32 %v2334_v28, 0.0  ;;  %v2338_v31 = vadd.f32 %v2337_v7, %v5956_v14  ;;  %v2339_v54 = vpop.f32.mrb[43].mxu0 }
 0x3e3   : > { %v2340_v36 = vadd.f32 %v2339_v54, %v5959_v37  ;;  %v2593_v40 = vmax.f32 %v2336_v59, 0.0 }
 0x3e4   : > { %v3099_v27 = vmul.f32 %v5967_v34, %v2592_v63  ;;  %v2594_v49 = vmax.f32 %v2338_v31, 0.0 }
 0x3e5   : > { %v2595_v50 = vmax.f32 %v2340_v36, 0.0 }
 0x3e6   : > { %v3100_v2 = vmul.f32 %v5967_v34, %v2594_v49  ;;  %3183 = vadd.xlane.f32.xlu0 %v3099_v27 }
 0x3e7   : > { %v2690_v43 = vpack.c.bf16 %v2595_v50, %v2593_v40  ;;  %v2343_v23 = vpop.f32.mrb[44].mxu0 }
 0x3e8   : > { %v2344_v25 = vadd.f32 %v2343_v23, %v5956_v14  ;;  %v2345_v24 = vpop.f32.mrb[45].mxu0  ;;  %3185 = vadd.xlane.f32.xlu1 %v3100_v2 }
 0x3e9   : > { %v2346_v56 = vadd.f32 %v2345_v24, %v5959_v37  ;;  %v2347_v12 = vpop.f32.mrb[46].mxu0  ;;  %4378 = vmatprep.mubr.bf16.mxu1 %v2690_v43 }
 0x3ea   : > { %v2596_v42 = vmax.f32 %v2344_v25, 0.0  ;;  %v2348_v21 = vadd.f32 %v2347_v12, %v5956_v14  ;;  %v2349_v53 = vpop.f32.mrb[47].mxu0 }
 0x3eb   : > { %v2350_v55 = vadd.f32 %v2349_v53, %v5959_v37  ;;  %v2597_v8 = vmax.f32 %v2346_v56, 0.0 }
 0x3ec   : > { %v3101_v60 = vmul.f32 %v5967_v34, %v2596_v42  ;;  %v2598_v62 = vmax.f32 %v2348_v21, 0.0 }
 0x3ed   : > { %v2599_v61 = vmax.f32 %v2350_v55, 0.0 }
 0x3ee   : > { %v3102_v5 = vmul.f32 %v5967_v34, %v2598_v62  ;;  %3187 = vadd.xlane.f32.xlu0 %v3101_v60 }
 0x3ef   : > { %v2691_v6 = vpack.c.bf16 %v2599_v61, %v2597_v8  ;;  %v2353_v18 = vpop.f32.mrb[48].mxu0 }
 0x3f0   : > { %v2354_v41 = vadd.f32 %v2353_v18, %v5956_v14  ;;  %v2355_v10 = vpop.f32.mrb[49].mxu0  ;;  %3189 = vadd.xlane.f32.xlu1 %v3102_v5 }
 0x3f1   : > { %v2356_v57 = vadd.f32 %v2355_v10, %v5959_v37  ;;  %v2357_v52 = vpop.f32.mrb[50].mxu0  ;;  %4379 = vmatmul.mubr.bf16.gmra.mrb[84].mxu1 %v2691_v6 }
 0x3f2   : > { %v2600_v30 = vmax.f32 %v2354_v41, 0.0  ;;  %v2358_v44 = vadd.f32 %v2357_v52, %v5956_v14  ;;  %v2359_v19 = vpop.f32.mrb[51].mxu0 }
 0x3f3   : > { %v2360_v11 = vadd.f32 %v2359_v19, %v5959_v37  ;;  %v2601_v45 = vmax.f32 %v2356_v57, 0.0 }
 0x3f4   : > { %v3103_v26 = vmul.f32 %v5967_v34, %v2600_v30  ;;  %v2602_v47 = vmax.f32 %v2358_v44, 0.0 }
 0x3f5   : > { %v2603_v33 = vmax.f32 %v2360_v11, 0.0 }
 0x3f6   : > { %v3104_v9 = vmul.f32 %v5967_v34, %v2602_v47  ;;  %3191 = vadd.xlane.f32.xlu0 %v3103_v26 }
 0x3f7   : > { %v2692_v1 = vpack.c.bf16 %v2603_v33, %v2601_v45  ;;  %v2363_v22 = vpop.f32.mrb[52].mxu0 }
 0x3f8   : > { %v2364_v38 = vadd.f32 %v2363_v22, %v5956_v14  ;;  %v2365_v17 = vpop.f32.mrb[53].mxu0  ;;  %3193 = vadd.xlane.f32.xlu1 %v3104_v9 }
 0x3f9   : > { %v2366_v4 = vadd.f32 %v2365_v17, %v5959_v37  ;;  %v2367_v39 = vpop.f32.mrb[54].mxu0  ;;  %4382 = vmatprep.mubr.bf16.mxu1 %v2692_v1 }
 0x3fa   : > { %v2604_v46 = vmax.f32 %v2364_v38, 0.0  ;;  %v2368_v13 = vadd.f32 %v2367_v39, %v5956_v14  ;;  %v2369_v16 = vpop.f32.mrb[55].mxu0 }
 0x3fb   : > { %v2370_v48 = vadd.f32 %v2369_v16, %v5959_v37  ;;  %v2605_v32 = vmax.f32 %v2366_v4, 0.0 }
 0x3fc   : > { %v3105_v29 = vmul.f32 %v5967_v34, %v2604_v46  ;;  %v2606_v0 = vmax.f32 %v2368_v13, 0.0 }
 0x3fd   : > { %v2607_v51 = vmax.f32 %v2370_v48, 0.0 }
 0x3fe   : > { %v3106_v35 = vmul.f32 %v5967_v34, %v2606_v0  ;;  %3195 = vadd.xlane.f32.xlu0 %v3105_v29 }
 0x3ff   : > { %v2693_v20 = vpack.c.bf16 %v2607_v51, %v2605_v32  ;;  %v2373_v3 = vpop.f32.mrb[56].mxu0 }
 0x400   : > { %v2374_v58 = vadd.f32 %v2373_v3, %v5956_v14  ;;  %v2375_v28 = vpop.f32.mrb[57].mxu0  ;;  %3197 = vadd.xlane.f32.xlu1 %v3106_v35 }
 0x401   : > { %v2376_v15 = vadd.f32 %v2375_v28, %v5959_v37  ;;  %v2377_v59 = vpop.f32.mrb[58].mxu0  ;;  %4383 = vmatmul.mubr.bf16.gmra.mrb[88].mxu1 %v2693_v20 }
 0x402   : > { %v2608_v7 = vmax.f32 %v2374_v58, 0.0  ;;  %v2378_v63 = vadd.f32 %v2377_v59, %v5956_v14  ;;  %v2379_v31 = vpop.f32.mrb[59].mxu0 }
 0x403   : > { %v2380_v54 = vadd.f32 %v2379_v31, %v5959_v37  ;;  %v2609_v49 = vmax.f32 %v2376_v15, 0.0 }
 0x404   : > { %v3107_v36 = vmul.f32 %v5967_v34, %v2608_v7  ;;  %v2610_v27 = vmax.f32 %v2378_v63, 0.0 }
 0x405   : > { %v2611_v40 = vmax.f32 %v2380_v54, 0.0 }
 0x406   : > { %v3108_v50 = vmul.f32 %v5967_v34, %v2610_v27  ;;  %3199 = vadd.xlane.f32.xlu0 %v3107_v36 }
 0x407   : > { %v2694_v2 = vpack.c.bf16 %v2611_v40, %v2609_v49  ;;  %v2383_v43 = vpop.f32.mrb[60].mxu0 }
 0x408   : > { %v2384_v23 = vadd.f32 %v2383_v43, %v5956_v14  ;;  %v2385_v25 = vpop.f32.mrb[61].mxu0  ;;  %3201 = vadd.xlane.f32.xlu1 %v3108_v50 }
 0x409   : > { %v2386_v24 = vadd.f32 %v2385_v25, %v5959_v37  ;;  %v2387_v56 = vpop.f32.mrb[62].mxu0  ;;  %4386 = vmatprep.mubr.bf16.mxu1 %v2694_v2 }
 0x40a   : > { %v2612_v12 = vmax.f32 %v2384_v23, 0.0  ;;  %v2388_v42 = vadd.f32 %v2387_v56, %v5956_v14  ;;  %v2389_v21 = vpop.f32.mrb[63].mxu0 }
 0x40b   : > { %v2390_v53 = vadd.f32 %v2389_v21, %v5959_v37  ;;  %v2613_v62 = vmax.f32 %v2386_v24, 0.0 }
 0x40c   : > { %v3109_v55 = vmul.f32 %v5967_v34, %v2612_v12  ;;  %v2614_v60 = vmax.f32 %v2388_v42, 0.0 }
 0x40d   : > { %v2615_v8 = vmax.f32 %v2390_v53, 0.0 }
 0x40e   : > { %v3110_v61 = vmul.f32 %v5967_v34, %v2614_v60  ;;  %3203 = vadd.xlane.f32.xlu0 %v3109_v55 }
 0x40f   : > { %v2695_v5 = vpack.c.bf16 %v2615_v8, %v2613_v62  ;;  %v2393_v6 = vpop.f32.mrb[64].mxu0 }
 0x410   : > { %v2394_v18 = vadd.f32 %v2393_v6, %v5956_v14  ;;  %v2395_v41 = vpop.f32.mrb[65].mxu0  ;;  %3205 = vadd.xlane.f32.xlu1 %v3110_v61 }
 0x411   : > { %v2396_v10 = vadd.f32 %v2395_v41, %v5959_v37  ;;  %v2397_v57 = vpop.f32.mrb[66].mxu0  ;;  %4387 = vmatmul.mubr.bf16.gmra.mrb[92].mxu1 %v2695_v5 }
 0x412   : > { %v2616_v52 = vmax.f32 %v2394_v18, 0.0  ;;  %v2398_v30 = vadd.f32 %v2397_v57, %v5956_v14  ;;  %v2399_v44 = vpop.f32.mrb[67].mxu0 }
 0x413   : > { %v2400_v19 = vadd.f32 %v2399_v44, %v5959_v37  ;;  %v2617_v47 = vmax.f32 %v2396_v10, 0.0 }
 0x414   : > { %v3111_v11 = vmul.f32 %v5967_v34, %v2616_v52  ;;  %v2618_v26 = vmax.f32 %v2398_v30, 0.0 }
 0x415   : > { %v2619_v45 = vmax.f32 %v2400_v19, 0.0 }
 0x416   : > { %v3112_v33 = vmul.f32 %v5967_v34, %v2618_v26  ;;  %3207 = vadd.xlane.f32.xlu0 %v3111_v11 }
 0x417   : > { %v2696_v9 = vpack.c.bf16 %v2619_v45, %v2617_v47  ;;  %v2403_v1 = vpop.f32.mrb[68].mxu0 }
 0x418   : > { %v2404_v22 = vadd.f32 %v2403_v1, %v5956_v14  ;;  %v2405_v38 = vpop.f32.mrb[69].mxu0  ;;  %3209 = vadd.xlane.f32.xlu1 %v3112_v33 }
 0x419   : > { %v2406_v17 = vadd.f32 %v2405_v38, %v5959_v37  ;;  %v2407_v4 = vpop.f32.mrb[70].mxu0  ;;  %4390 = vmatprep.mubr.bf16.mxu1 %v2696_v9 }
 0x41a   : > { %v2620_v39 = vmax.f32 %v2404_v22, 0.0  ;;  %v2408_v46 = vadd.f32 %v2407_v4, %v5956_v14  ;;  %v2409_v13 = vpop.f32.mrb[71].mxu0 }
 0x41b   : > { %v2410_v16 = vadd.f32 %v2409_v13, %v5959_v37  ;;  %v2621_v0 = vmax.f32 %v2406_v17, 0.0 }
 0x41c   : > { %v3113_v48 = vmul.f32 %v5967_v34, %v2620_v39  ;;  %v2622_v29 = vmax.f32 %v2408_v46, 0.0 }
 0x41d   : > { %v2623_v32 = vmax.f32 %v2410_v16, 0.0 }
 0x41e   : > { %v3114_v51 = vmul.f32 %v5967_v34, %v2622_v29  ;;  %3211 = vadd.xlane.f32.xlu0 %v3113_v48 }
 0x41f   : > { %v2697_v35 = vpack.c.bf16 %v2623_v32, %v2621_v0  ;;  %v2413_v20 = vpop.f32.mrb[72].mxu0 }
 0x420   : > { %v2414_v3 = vadd.f32 %v2413_v20, %v5956_v14  ;;  %v2415_v58 = vpop.f32.mrb[73].mxu0  ;;  %3213 = vadd.xlane.f32.xlu1 %v3114_v51 }
 0x421   : > { %v2416_v28 = vadd.f32 %v2415_v58, %v5959_v37  ;;  %v2417_v15 = vpop.f32.mrb[74].mxu0  ;;  %4391 = vmatmul.mubr.bf16.gmra.mrb[96].mxu1 %v2697_v35 }
 0x422   : > { %v2624_v59 = vmax.f32 %v2414_v3, 0.0  ;;  %v2418_v7 = vadd.f32 %v2417_v15, %v5956_v14  ;;  %v2419_v63 = vpop.f32.mrb[75].mxu0 }
 0x423   : > { %v2420_v31 = vadd.f32 %v2419_v63, %v5959_v37  ;;  %v2625_v27 = vmax.f32 %v2416_v28, 0.0 }
 0x424   : > { %v3115_v54 = vmul.f32 %v5967_v34, %v2624_v59  ;;  %v2626_v36 = vmax.f32 %v2418_v7, 0.0 }
 0x425   : > { %v2627_v49 = vmax.f32 %v2420_v31, 0.0 }
 0x426   : > { %v3116_v40 = vmul.f32 %v5967_v34, %v2626_v36  ;;  %3215 = vadd.xlane.f32.xlu0 %v3115_v54 }
 0x427   : > { %v2698_v50 = vpack.c.bf16 %v2627_v49, %v2625_v27  ;;  %v2423_v2 = vpop.f32.mrb[76].mxu0 }
 0x428   : > { %v2424_v43 = vadd.f32 %v2423_v2, %v5956_v14  ;;  %v2425_v23 = vpop.f32.mrb[77].mxu0  ;;  %3217 = vadd.xlane.f32.xlu1 %v3116_v40 }
 0x429   : > { %v2426_v25 = vadd.f32 %v2425_v23, %v5959_v37  ;;  %v2427_v24 = vpop.f32.mrb[78].mxu0  ;;  %4394 = vmatprep.mubr.bf16.mxu1 %v2698_v50 }
 0x42a   : > { %v2628_v56 = vmax.f32 %v2424_v43, 0.0  ;;  %v2428_v12 = vadd.f32 %v2427_v24, %v5956_v14  ;;  %v2429_v42 = vpop.f32.mrb[79].mxu0 }
 0x42b   : > { %v2430_v21 = vadd.f32 %v2429_v42, %v5959_v37  ;;  %v2629_v60 = vmax.f32 %v2426_v25, 0.0 }
 0x42c   : > { %v3117_v53 = vmul.f32 %v5967_v34, %v2628_v56  ;;  %v2630_v55 = vmax.f32 %v2428_v12, 0.0 }
 0x42d   : > { %v2631_v62 = vmax.f32 %v2430_v21, 0.0 }
 0x42e   : > { %v3118_v8 = vmul.f32 %v5967_v34, %v2630_v55  ;;  %3219 = vadd.xlane.f32.xlu0 %v3117_v53 }
 0x42f   : > { %v2699_v61 = vpack.c.bf16 %v2631_v62, %v2629_v60  ;;  %v2433_v5 = vpop.f32.mrb[80].mxu0 }
 0x430   : > { %v2434_v6 = vadd.f32 %v2433_v5, %v5956_v14  ;;  %v2435_v18 = vpop.f32.mrb[81].mxu0  ;;  %3221 = vadd.xlane.f32.xlu1 %v3118_v8 }
 0x431   : > { %v2436_v41 = vadd.f32 %v2435_v18, %v5959_v37  ;;  %v2437_v10 = vpop.f32.mrb[82].mxu0  ;;  %4395 = vmatmul.mubr.bf16.gmra.mrb[100].mxu1 %v2699_v61 }
 0x432   : > { %v2632_v57 = vmax.f32 %v2434_v6, 0.0  ;;  %v2438_v52 = vadd.f32 %v2437_v10, %v5956_v14  ;;  %v2439_v30 = vpop.f32.mrb[83].mxu0 }
 0x433   : > { %v2440_v44 = vadd.f32 %v2439_v30, %v5959_v37  ;;  %v2633_v26 = vmax.f32 %v2436_v41, 0.0 }
 0x434   : > { %v3119_v19 = vmul.f32 %v5967_v34, %v2632_v57  ;;  %v2634_v11 = vmax.f32 %v2438_v52, 0.0 }
 0x435   : > { %v2635_v47 = vmax.f32 %v2440_v44, 0.0 }
 0x436   : > { %v3120_v45 = vmul.f32 %v5967_v34, %v2634_v11  ;;  %3223 = vadd.xlane.f32.xlu0 %v3119_v19 }
 0x437   : > { %v2700_v33 = vpack.c.bf16 %v2635_v47, %v2633_v26  ;;  %v2443_v9 = vpop.f32.mrb[84].mxu0 }
 0x438   : > { %v2444_v1 = vadd.f32 %v2443_v9, %v5956_v14  ;;  %v2445_v22 = vpop.f32.mrb[85].mxu0  ;;  %3225 = vadd.xlane.f32.xlu1 %v3120_v45 }
 0x439   : > { %v2446_v38 = vadd.f32 %v2445_v22, %v5959_v37  ;;  %v2447_v17 = vpop.f32.mrb[86].mxu0  ;;  %4398 = vmatprep.mubr.bf16.mxu1 %v2700_v33 }
 0x43a   : > { %v2636_v4 = vmax.f32 %v2444_v1, 0.0  ;;  %v2448_v39 = vadd.f32 %v2447_v17, %v5956_v14  ;;  %v2449_v46 = vpop.f32.mrb[87].mxu0 }
 0x43b   : > { %v2450_v13 = vadd.f32 %v2449_v46, %v5959_v37  ;;  %v2637_v29 = vmax.f32 %v2446_v38, 0.0 }
 0x43c   : > { %v3121_v16 = vmul.f32 %v5967_v34, %v2636_v4  ;;  %v2638_v48 = vmax.f32 %v2448_v39, 0.0 }
 0x43d   : > { %v2639_v0 = vmax.f32 %v2450_v13, 0.0 }
 0x43e   : > { %v3122_v32 = vmul.f32 %v5967_v34, %v2638_v48  ;;  %3227 = vadd.xlane.f32.xlu0 %v3121_v16 }
 0x43f   : > { %v2701_v51 = vpack.c.bf16 %v2639_v0, %v2637_v29  ;;  %v2453_v35 = vpop.f32.mrb[88].mxu0 }
 0x440   : > { %v2454_v20 = vadd.f32 %v2453_v35, %v5956_v14  ;;  %v2455_v3 = vpop.f32.mrb[89].mxu0  ;;  %3229 = vadd.xlane.f32.xlu1 %v3122_v32 }
 0x441   : > { %v2456_v58 = vadd.f32 %v2455_v3, %v5959_v37  ;;  %v2457_v28 = vpop.f32.mrb[90].mxu0  ;;  %4399 = vmatmul.mubr.bf16.gmra.mrb[104].mxu1 %v2701_v51 }
 0x442   : > { %v2640_v15 = vmax.f32 %v2454_v20, 0.0  ;;  %v2458_v59 = vadd.f32 %v2457_v28, %v5956_v14  ;;  %v2459_v7 = vpop.f32.mrb[91].mxu0 }
 0x443   : > { %v2460_v63 = vadd.f32 %v2459_v7, %v5959_v37  ;;  %v2641_v36 = vmax.f32 %v2456_v58, 0.0 }
 0x444   : > { %v3123_v31 = vmul.f32 %v5967_v34, %v2640_v15  ;;  %v2642_v54 = vmax.f32 %v2458_v59, 0.0 }
 0x445   : > { %v2643_v27 = vmax.f32 %v2460_v63, 0.0 }
 0x446   : > { %v3124_v49 = vmul.f32 %v5967_v34, %v2642_v54  ;;  %3231 = vadd.xlane.f32.xlu0 %v3123_v31 }
 0x447   : > { %v2702_v40 = vpack.c.bf16 %v2643_v27, %v2641_v36  ;;  %v2463_v50 = vpop.f32.mrb[92].mxu0 }
 0x448   : > { %v2464_v2 = vadd.f32 %v2463_v50, %v5956_v14  ;;  %v2465_v43 = vpop.f32.mrb[93].mxu0  ;;  %3233 = vadd.xlane.f32.xlu1 %v3124_v49 }
 0x449   : > { %v2466_v23 = vadd.f32 %v2465_v43, %v5959_v37  ;;  %v2467_v25 = vpop.f32.mrb[94].mxu0  ;;  %4402 = vmatprep.mubr.bf16.mxu1 %v2702_v40 }
 0x44a   : > { %v2644_v24 = vmax.f32 %v2464_v2, 0.0  ;;  %v2468_v56 = vadd.f32 %v2467_v25, %v5956_v14  ;;  %v2469_v12 = vpop.f32.mrb[95].mxu0 }
 0x44b   : > { %v2470_v42 = vadd.f32 %v2469_v12, %v5959_v37  ;;  %v2645_v55 = vmax.f32 %v2466_v23, 0.0 }
 0x44c   : > { %v3125_v21 = vmul.f32 %v5967_v34, %v2644_v24  ;;  %v2646_v53 = vmax.f32 %v2468_v56, 0.0 }
 0x44d   : > { %v2647_v60 = vmax.f32 %v2470_v42, 0.0 }
 0x44e   : > { %v3126_v62 = vmul.f32 %v5967_v34, %v2646_v53  ;;  %3235 = vadd.xlane.f32.xlu0 %v3125_v21 }
 0x44f   : > { %v2703_v8 = vpack.c.bf16 %v2647_v60, %v2645_v55  ;;  %v2473_v61 = vpop.f32.mrb[96].mxu0 }
 0x450   : > { %v2474_v5 = vadd.f32 %v2473_v61, %v5956_v14  ;;  %3237 = vadd.xlane.f32.xlu1 %v3126_v62  ;;  %v2475_v6 = vpop.f32.mrb[97].mxu0 }
 0x451   : > { %v2476_v18 = vadd.f32 %v2475_v6, %v5959_v37  ;;  %v2477_v41 = vpop.f32.mrb[98].mxu0  ;;  %4403 = vmatmul.mubr.bf16.gmra.mrb[108].mxu1 %v2703_v8 }
 0x452   : > { %v2648_v10 = vmax.f32 %v2474_v5, 0.0  ;;  %v2478_v57 = vadd.f32 %v2477_v41, %v5956_v14  ;;  %v2479_v52 = vpop.f32.mrb[99].mxu0  ;;  %v3144_v41 = vpop.xlane.xlu0 %3143 }
 0x453   : > { %v2480_v30 = vadd.f32 %v2479_v52, %v5959_v37  ;;  %v2649_v11 = vmax.f32 %v2476_v18, 0.0 }
 0x454   : > { %v3127_v44 = vmul.f32 %v5967_v34, %v2648_v10  ;;  %v2650_v19 = vmax.f32 %v2478_v57, 0.0 }
 0x455   : > { %v2651_v26 = vmax.f32 %v2480_v30, 0.0 }
 0x456   : > { %v3128_v47 = vmul.f32 %v5967_v34, %v2650_v19  ;;  %3239 = vadd.xlane.f32.xlu0 %v3127_v44  ;;  %v6540_v44 = vlaneseq }
 0x457   : > { %v2704_v45 = vpack.c.bf16 %v2651_v26, %v2649_v11  ;;  %v2483_v33 = vpop.f32.mrb[100].mxu0  ;;  %v3146_v11 = vpop.xlane.xlu1 %3145  ;;  %v6154_v26 = vld [vmem:[%s6473_s9] ss:$0 sm:$0xff] }
 0x458   : > { %v2484_v9 = vadd.f32 %v2483_v33, %v5956_v14  ;;  %3241 = vadd.xlane.f32.xlu1 %v3128_v47  ;;  %v2485_v1 = vpop.f32.mrb[101].mxu0  ;;  %v6149_v19 = vand.u32 127, %v6540_v44 }
 0x459   : > { %v2486_v22 = vadd.f32 %v2485_v1, %v5959_v37  ;;  %v2487_v38 = vpop.f32.mrb[102].mxu0  ;;  %4406 = vmatprep.mubr.bf16.mxu1 %v2704_v45 }
 0x45a   : > { %v2652_v17 = vmax.f32 %v2484_v9, 0.0  ;;  %v2488_v4 = vadd.f32 %v2487_v38, %v5956_v14  ;;  %v2489_v39 = vpop.f32.mrb[103].mxu0  ;;  %vm3273_vm0 = vcmp.eq.s32.totalorder %v6149_v19, 0 }
 0x45b   : > { %v2490_v46 = vadd.f32 %v2489_v39, %v5959_v37  ;;  %v2653_v48 = vmax.f32 %v2486_v22, 0.0 }
 0x45c   : > { %v3129_v13 = vmul.f32 %v5967_v34, %v2652_v17  ;;  %v2654_v16 = vmax.f32 %v2488_v4, 0.0  ;;  %v3148_v17 = vpop.xlane.xlu0 %3147 }
 0x45d   : > { %v2655_v29 = vmax.f32 %v2490_v46, 0.0 }
 0x45e   : > { %v3130_v0 = vmul.f32 %v5967_v34, %v2654_v16  ;;  %3243 = vadd.xlane.f32.xlu0 %v3129_v13 }
 0x45f   : > { %v2705_v32 = vpack.c.bf16 %v2655_v29, %v2653_v48  ;;  %v2493_v51 = vpop.f32.mrb[104].mxu0 }
 0x460   : > { %v2494_v35 = vadd.f32 %v2493_v51, %v5956_v14  ;;  %3245 = vadd.xlane.f32.xlu1 %v3130_v0  ;;  %v2495_v20 = vpop.f32.mrb[105].mxu0 }
 0x461   : > { %v2496_v3 = vadd.f32 %v2495_v20, %v5959_v37  ;;  %v2497_v58 = vpop.f32.mrb[106].mxu0  ;;  %4407 = vmatmul.mubr.bf16.gmra.mrb[112].mxu1 %v2705_v32  ;;  %v3150_v32 = vpop.xlane.xlu1 %3149 }
 0x462   : > { %v2656_v28 = vmax.f32 %v2494_v35, 0.0  ;;  %v2498_v15 = vadd.f32 %v2497_v58, %v5956_v14  ;;  %v2499_v59 = vpop.f32.mrb[107].mxu0 }
 0x463   : > { %v2500_v7 = vadd.f32 %v2499_v59, %v5959_v37  ;;  %v2657_v54 = vmax.f32 %v2496_v3, 0.0 }
 0x464   : > { %v3131_v63 = vmul.f32 %v5967_v34, %v2656_v28  ;;  %v2658_v31 = vmax.f32 %v2498_v15, 0.0 }
 0x465   : > { %v2659_v36 = vmax.f32 %v2500_v7, 0.0 }
 0x466   : > { %v3132_v27 = vmul.f32 %v5967_v34, %v2658_v31  ;;  %3247 = vadd.xlane.f32.xlu0 %v3131_v63 }
 0x467   : > { %v2706_v49 = vpack.c.bf16 %v2659_v36, %v2657_v54  ;;  %v2503_v40 = vpop.f32.mrb[108].mxu0 }
 0x468   : > { %v2504_v50 = vadd.f32 %v2503_v40, %v5956_v14  ;;  %3249 = vadd.xlane.f32.xlu1 %v3132_v27  ;;  %v2505_v2 = vpop.f32.mrb[109].mxu0 }
 0x469   : > { %v2506_v43 = vadd.f32 %v2505_v2, %v5959_v37  ;;  %v2507_v23 = vpop.f32.mrb[110].mxu0  ;;  %4410 = vmatprep.mubr.bf16.mxu1 %v2706_v49 }
 0x46a   : > { %v2660_v25 = vmax.f32 %v2504_v50, 0.0  ;;  %v2508_v24 = vadd.f32 %v2507_v23, %v5956_v14  ;;  %v2509_v56 = vpop.f32.mrb[111].mxu0 }
 0x46b   : > { %v2510_v12 = vadd.f32 %v2509_v56, %v5959_v37  ;;  %v2661_v53 = vmax.f32 %v2506_v43, 0.0 }
 0x46c   : > { %v3133_v42 = vmul.f32 %v5967_v34, %v2660_v25  ;;  %v2662_v21 = vmax.f32 %v2508_v24, 0.0 }
 0x46d   : > { %v2663_v55 = vmax.f32 %v2510_v12, 0.0 }
 0x46e   : > { %v3134_v60 = vmul.f32 %v5967_v34, %v2662_v21  ;;  %3251 = vadd.xlane.f32.xlu0 %v3133_v42  ;;  %v6145_v34 = vld [vmem:[%s6472_s8] ss:$0 sm:$0xff] }
 0x46f   : > { %v2707_v62 = vpack.c.bf16 %v2663_v55, %v2661_v53  ;;  %v2513_v8 = vpop.f32.mrb[112].mxu0 }
 0x470   : > { %v2514_v61 = vadd.f32 %v2513_v8, %v5956_v14  ;;  %3253 = vadd.xlane.f32.xlu1 %v3134_v60  ;;  %v2515_v5 = vpop.f32.mrb[113].mxu0 }
 0x471   : > { %v2516_v6 = vadd.f32 %v2515_v5, %v5959_v37  ;;  %v2517_v18 = vpop.f32.mrb[114].mxu0  ;;  %4411 = vmatmul.mubr.bf16.gmra.mrb[116].mxu1 %v2707_v62  ;;  %v3152_v62 = vpop.xlane.xlu0 %3151 }
 0x472   : > { %v2664_v10 = vmax.f32 %v2514_v61, 0.0  ;;  %v2518_v57 = vadd.f32 %v2517_v18, %v5956_v14  ;;  %v2519_v52 = vpop.f32.mrb[115].mxu0  ;;  %v3154_v18 = vpop.xlane.xlu1 %3153 }
 0x473   : > { %v2520_v30 = vadd.f32 %v2519_v52, %v5959_v37  ;;  %v2665_v9 = vmax.f32 %v2516_v6, 0.0 }
 0x474   : > { %v3135_v47 = vmul.f32 %v6154_v26, %v2664_v10  ;;  %v2666_v45 = vmax.f32 %v2518_v57, 0.0  ;;  %v4360_v33 = vpop.f32.mrb[64].mxu1 }
 0x475   : > { %v2667_v1 = vmax.f32 %v2520_v30, 0.0  ;;  %v2826_v22 = vadd.f32 %v4360_v33, %v6145_v34  ;;  %v2817_v38 = vpop.f32.mrb[65].mxu1 }
 0x476   : > { %v3136_v4 = vmul.f32 %v6154_v26, %v2666_v45  ;;  %v2818_v39 = vadd.f32 %v6145_v34, %v2817_v38  ;;  %v4361_v46 = vpop.f32.mrb[66].mxu1  ;;  %3255 = vadd.xlane.f32.xlu0 %v3135_v47  ;;  %v3156_v47 = vpop.xlane.xlu0 %3155 }
 0x477   : > { %v2708_v13 = vpack.c.bf16 %v2667_v1, %v2665_v9  ;;  %v3276_v16 = vadd.f32 %v3148_v17, %v2826_v22  ;;  %v2829_v48 = vadd.f32 %v4361_v46, %v6145_v34  ;;  %v2523_v29 = vpop.f32.mrb[116].mxu0  ;;  %v2820_v0 = vpop.f32.mrb[67].mxu1 }
 0x478   : > { %v3274_v51 = vadd.f32 %v3144_v41, %v2818_v39  ;;  %v2524_v35 = vadd.f32 %v2523_v29, %v5956_v14  ;;  %v2821_v20 = vadd.f32 %v6145_v34, %v2820_v0  ;;  %3257 = vadd.xlane.f32.xlu1 %v3136_v4  ;;  %v2525_v3 = vpop.f32.mrb[117].mxu0 }
 0x479   : > { %v3277_v58 = vadd.f32 %v3150_v32, %v2829_v48  ;;  %v2526_v28 = vadd.f32 %v2525_v3, %v5959_v37  ;;  %v2527_v15 = vpop.f32.mrb[118].mxu0  ;;  %4414 = vmatprep.mubr.bf16.mxu1 %v2708_v13  ;;  %v3340_v54 = vsel %vm3273_vm0, %v3276_v16, %v2826_v22 }
 0x47a   : > { %v2668_v59 = vmax.f32 %v2524_v35, 0.0  ;;  %v3275_v7 = vadd.f32 %v3146_v11, %v2821_v20  ;;  %v2528_v63 = vadd.f32 %v2527_v15, %v5956_v14  ;;  %v2529_v31 = vpop.f32.mrb[119].mxu0  ;;  %v3338_v36 = vsel %vm3273_vm0, %v3274_v51, %v2818_v39  ;;  %v3158_v39 = vpop.xlane.xlu1 %3157 }
 0x47b   : > { %v3341_v27 = vsel %vm3273_vm0, %v3277_v58, %v2829_v48  ;;  %v2530_v49 = vadd.f32 %v2529_v31, %v5959_v37  ;;  %v2669_v25 = vmax.f32 %v2526_v28, 0.0 }
 0x47c   : > { %v4119_v40 = vpack.c.bf16 %v3341_v27, %v3340_v54  ;;  %v3137_v50 = vmul.f32 %v6154_v26, %v2668_v59  ;;  %v3339_v2 = vsel %vm3273_vm0, %v3275_v7, %v2821_v20  ;;  %v2670_v43 = vmax.f32 %v2528_v63, 0.0 }
 0x47d   : > { %v4114_v23 = vpack.c.bf16 %v3339_v2, %v3338_v36  ;;  %v2671_v24 = vmax.f32 %v2530_v49, 0.0 }
 0x47e   : > { %4271 = vst [vmem:[%s6170_s16 + $0x8] sm:$0xff] %v4119_v40   ;;  %v3138_v56 = vmul.f32 %v6154_v26, %v2670_v43  ;;  %3259 = vadd.xlane.f32.xlu0 %v3137_v50  ;;  %v3160_v50 = vpop.xlane.xlu0 %3159 }
 0x47f   : > { %4115 = vst [vmem:[%s6170_s16] sm:$0xff] %v4114_v23   ;;  %v2709_v12 = vpack.c.bf16 %v2671_v24, %v2669_v25  ;;  %v2533_v42 = vpop.f32.mrb[120].mxu0 }
 0x480   : > { %v2534_v21 = vadd.f32 %v2533_v42, %v5956_v14  ;;  %3261 = vadd.xlane.f32.xlu1 %v3138_v56  ;;  %v2535_v53 = vpop.f32.mrb[121].mxu0 }
 0x481   : > { %v2536_v55 = vadd.f32 %v2535_v53, %v5959_v37  ;;  %v2537_v60 = vpop.f32.mrb[122].mxu0  ;;  %4415 = vmatmul.mubr.bf16.gmra.mrb[120].mxu1 %v2709_v12 }
 0x482   : > { %v2672_v8 = vmax.f32 %v2534_v21, 0.0  ;;  %v2538_v61 = vadd.f32 %v2537_v60, %v5956_v14  ;;  %v2539_v5 = vpop.f32.mrb[123].mxu0  ;;  %v3164_v25 = vpop.xlane.xlu0 %3163 }
 0x483   : > { %v2540_v6 = vadd.f32 %v2539_v5, %v5959_v37  ;;  %v2673_v52 = vmax.f32 %v2536_v55, 0.0 }
 0x484   : > { %v3139_v41 = vmul.f32 %v6154_v26, %v2672_v8  ;;  %v2674_v10 = vmax.f32 %v2538_v61, 0.0  ;;  %v4364_v57 = vpop.f32.mrb[68].mxu1 }
 0x485   : > { %v2675_v30 = vmax.f32 %v2540_v6, 0.0  ;;  %v2842_v44 = vadd.f32 %v4364_v57, %v6145_v34  ;;  %v2833_v11 = vpop.f32.mrb[69].mxu1 }
 0x486   : > { %v3140_v45 = vmul.f32 %v6154_v26, %v2674_v10  ;;  %v2834_v33 = vadd.f32 %v6145_v34, %v2833_v11  ;;  %v4365_v9 = vpop.f32.mrb[70].mxu1  ;;  %3263 = vadd.xlane.f32.xlu0 %v3139_v41  ;;  %v3168_v10 = vpop.xlane.xlu0 %3167 }
 0x487   : > { %v2710_v1 = vpack.c.bf16 %v2675_v30, %v2673_v52  ;;  %v3280_v22 = vadd.f32 %v3156_v47, %v2842_v44  ;;  %v2845_v38 = vadd.f32 %v4365_v9, %v6145_v34  ;;  %v2543_v17 = vpop.f32.mrb[124].mxu0  ;;  %v2836_v4 = vpop.f32.mrb[71].mxu1 }
 0x488   : > { %v3278_v46 = vadd.f32 %v3152_v62, %v2834_v33  ;;  %v2544_v13 = vadd.f32 %v2543_v17, %v5956_v14  ;;  %v2837_v16 = vadd.f32 %v6145_v34, %v2836_v4  ;;  %3265 = vadd.xlane.f32.xlu1 %v3140_v45  ;;  %v2545_v48 = vpop.f32.mrb[125].mxu0 }
 0x489   : > { %v3281_v29 = vadd.f32 %v3158_v39, %v2845_v38  ;;  %v2546_v0 = vadd.f32 %v2545_v48, %v5959_v37  ;;  %v2547_v32 = vpop.f32.mrb[126].mxu0  ;;  %4418 = vmatprep.mubr.bf16.mxu1 %v2710_v1  ;;  %v3344_v58 = vsel %vm3273_vm0, %v3280_v22, %v2842_v44 }
 0x48a   : > { %v2676_v51 = vmax.f32 %v2544_v13, 0.0  ;;  %v3279_v35 = vadd.f32 %v3154_v18, %v2837_v16  ;;  %v2548_v20 = vadd.f32 %v2547_v32, %v5956_v14  ;;  %v2549_v3 = vpop.f32.mrb[127].mxu0  ;;  %v3342_v28 = vsel %vm3273_vm0, %v3278_v46, %v2834_v33  ;;  %v3172_v11 = vpop.xlane.xlu0 %3171 }
 0x48b   : > { %v3345_v15 = vsel %vm3273_vm0, %v3281_v29, %v2845_v38  ;;  %v2550_v59 = vadd.f32 %v2549_v3, %v5959_v37  ;;  %v2677_v36 = vmax.f32 %v2546_v0, 0.0  ;;  %v3162_v37 = vpop.xlane.xlu1 %3161 }
 0x48c   : > { %v4129_v7 = vpack.c.bf16 %v3345_v15, %v3344_v58  ;;  %v3141_v63 = vmul.f32 %v6154_v26, %v2676_v51  ;;  %v3343_v31 = vsel %vm3273_vm0, %v3279_v35, %v2837_v16  ;;  %v2678_v14 = vmax.f32 %v2548_v20, 0.0 }
 0x48d   : > { %v4124_v54 = vpack.c.bf16 %v3343_v31, %v3342_v28  ;;  %v2679_v27 = vmax.f32 %v2550_v59, 0.0 }
 0x48e   : > { %4273 = vst [vmem:[%s6170_s16 + $0x18] sm:$0xff] %v4129_v7   ;;  %v3142_v49 = vmul.f32 %v6154_v26, %v2678_v14  ;;  %3267 = vadd.xlane.f32.xlu0 %v3141_v63  ;;  %v3176_v32 = vpop.xlane.xlu0 %3175 }
 0x48f   : > { %4272 = vst [vmem:[%s6170_s16 + $0x10] sm:$0xff] %v4124_v54   ;;  %v2711_v40 = vpack.c.bf16 %v2679_v27, %v2677_v36  ;;  %v3166_v21 = vpop.xlane.xlu1 %3165 }
 0x490   : > { %3269 = vadd.xlane.f32.xlu1 %v3142_v49 }
 0x491   : > { %4419 = vmatmul.mubr.bf16.gmra.mrb[124].mxu1 %v2711_v40 }
 0x492   : > { %v3180_v58 = vpop.xlane.xlu0 %3179 }
 0x493   : > { %v3170_v57 = vpop.xlane.xlu1 %3169 }
 0x494   : > { %v4368_v2 = vpop.f32.mrb[72].mxu1 }
 0x495   : > { %v2858_v43 = vadd.f32 %v4368_v2, %v6145_v34  ;;  %v2849_v23 = vpop.f32.mrb[73].mxu1 }
 0x496   : > { %v2850_v24 = vadd.f32 %v6145_v34, %v2849_v23  ;;  %v4369_v56 = vpop.f32.mrb[74].mxu1  ;;  %v3184_v23 = vpop.xlane.xlu0 %3183 }
 0x497   : > { %v3284_v12 = vadd.f32 %v3164_v25, %v2858_v43  ;;  %v2861_v26 = vadd.f32 %v4369_v56, %v6145_v34  ;;  %v2852_v42 = vpop.f32.mrb[75].mxu1  ;;  %v3174_v22 = vpop.xlane.xlu1 %3173 }
 0x498   : > { %v3282_v53 = vadd.f32 %v3160_v50, %v2850_v24  ;;  %v2853_v55 = vadd.f32 %v6145_v34, %v2852_v42 }
 0x499   : > { %v3285_v60 = vadd.f32 %v3166_v21, %v2861_v26  ;;  %v3348_v8 = vsel %vm3273_vm0, %v3284_v12, %v2858_v43 }
 0x49a   : > { %v3283_v62 = vadd.f32 %v3162_v37, %v2853_v55  ;;  %v3346_v5 = vsel %vm3273_vm0, %v3282_v53, %v2850_v24 }
 0x49b   : > { %v3349_v61 = vsel %vm3273_vm0, %v3285_v60, %v2861_v26  ;;  %v3178_v51 = vpop.xlane.xlu1 %3177  ;;  %v3188_v26 = vpop.xlane.xlu0 %3187 }
 0x49c   : > { %v4139_v6 = vpack.c.bf16 %v3349_v61, %v3348_v8  ;;  %v3347_v18 = vsel %vm3273_vm0, %v3283_v62, %v2853_v55 }
 0x49d   : > { %v4134_v41 = vpack.c.bf16 %v3347_v18, %v3346_v5 }
 0x49e   : > { %4275 = vst [vmem:[%s6170_s16 + $0x28] sm:$0xff] %v4139_v6  }
 0x49f   : > { %4274 = vst [vmem:[%s6170_s16 + $0x20] sm:$0xff] %v4134_v41   ;;  %v3182_v31 = vpop.xlane.xlu1 %3181 }
 0x4a3   : > { %v3186_v25 = vpop.xlane.xlu1 %3185 }
 0x4a4   : > { %v4372_v52 = vpop.f32.mrb[76].mxu1 }
 0x4a5   : > { %v2874_v30 = vadd.f32 %v4372_v52, %v6145_v34  ;;  %v2865_v44 = vpop.f32.mrb[77].mxu1 }
 0x4a6   : > { %v2866_v47 = vadd.f32 %v6145_v34, %v2865_v44  ;;  %v4373_v45 = vpop.f32.mrb[78].mxu1  ;;  %v3192_v44 = vpop.xlane.xlu0 %3191 }
 0x4a7   : > { %v3288_v33 = vadd.f32 %v3172_v11, %v2874_v30  ;;  %v2877_v9 = vadd.f32 %v4373_v45, %v6145_v34  ;;  %v2868_v1 = vpop.f32.mrb[79].mxu1  ;;  %v3190_v62 = vpop.xlane.xlu1 %3189 }
 0x4a8   : > { %v3286_v38 = vadd.f32 %v3168_v10, %v2866_v47  ;;  %v2869_v17 = vadd.f32 %v6145_v34, %v2868_v1 }
 0x4a9   : > { %v3289_v4 = vadd.f32 %v3174_v22, %v2877_v9  ;;  %v3352_v46 = vsel %vm3273_vm0, %v3288_v33, %v2874_v30 }
 0x4aa   : > { %v3287_v39 = vadd.f32 %v3170_v57, %v2869_v17  ;;  %v3350_v16 = vsel %vm3273_vm0, %v3286_v38, %v2866_v47 }
 0x4ab   : > { %v3353_v13 = vsel %vm3273_vm0, %v3289_v4, %v2877_v9  ;;  %v3194_v11 = vpop.xlane.xlu1 %3193  ;;  %v3196_v9 = vpop.xlane.xlu0 %3195 }
 0x4ac   : > { %v4149_v48 = vpack.c.bf16 %v3353_v13, %v3352_v46  ;;  %v3351_v29 = vsel %vm3273_vm0, %v3287_v39, %v2869_v17 }
 0x4ad   : > { %v4144_v0 = vpack.c.bf16 %v3351_v29, %v3350_v16 }
 0x4ae   : > { %4277 = vst [vmem:[%s6170_s16 + $0x38] sm:$0xff] %v4149_v48  }
 0x4af   : > { %4276 = vst [vmem:[%s6170_s16 + $0x30] sm:$0xff] %v4144_v0   ;;  %v3198_v39 = vpop.xlane.xlu1 %3197 }
 0x4b4   : > { %v4376_v35 = vpop.f32.mrb[80].mxu1 }
 0x4b5   : > { %v2890_v20 = vadd.f32 %v4376_v35, %v6145_v34  ;;  %v2881_v3 = vpop.f32.mrb[81].mxu1 }
 0x4b6   : > { %v2882_v28 = vadd.f32 %v6145_v34, %v2881_v3  ;;  %v4377_v15 = vpop.f32.mrb[82].mxu1  ;;  %v3200_v3 = vpop.xlane.xlu0 %3199 }
 0x4b7   : > { %v3292_v59 = vadd.f32 %v3180_v58, %v2890_v20  ;;  %v2893_v7 = vadd.f32 %v4377_v15, %v6145_v34  ;;  %v2884_v63 = vpop.f32.mrb[83].mxu1  ;;  %v3202_v58 = vpop.xlane.xlu1 %3201 }
 0x4b8   : > { %v3290_v14 = vadd.f32 %v3176_v32, %v2882_v28  ;;  %v2885_v54 = vadd.f32 %v6145_v34, %v2884_v63 }
 0x4b9   : > { %v3293_v36 = vadd.f32 %v3182_v31, %v2893_v7  ;;  %v3356_v49 = vsel %vm3273_vm0, %v3292_v59, %v2890_v20 }
 0x4ba   : > { %v3291_v27 = vadd.f32 %v3178_v51, %v2885_v54  ;;  %v3354_v50 = vsel %vm3273_vm0, %v3290_v14, %v2882_v28 }
 0x4bb   : > { %v3357_v40 = vsel %vm3273_vm0, %v3293_v36, %v2893_v7  ;;  %v3204_v7 = vpop.xlane.xlu0 %3203 }
 0x4bc   : > { %v4159_v37 = vpack.c.bf16 %v3357_v40, %v3356_v49  ;;  %v3355_v2 = vsel %vm3273_vm0, %v3291_v27, %v2885_v54  ;;  %v3206_v27 = vpop.xlane.xlu1 %3205 }
 0x4bd   : > { %v4154_v43 = vpack.c.bf16 %v3355_v2, %v3354_v50 }
 0x4be   : > { %4279 = vst [vmem:[%s6170_s16 + $0x48] sm:$0xff] %v4159_v37  }
 0x4bf   : > { %4278 = vst [vmem:[%s6170_s16 + $0x40] sm:$0xff] %v4154_v43  }
 0x4c4   : > { %v4380_v24 = vpop.f32.mrb[84].mxu1 }
 0x4c5   : > { %v2906_v56 = vadd.f32 %v4380_v24, %v6145_v34  ;;  %v2897_v12 = vpop.f32.mrb[85].mxu1 }
 0x4c6   : > { %v2898_v42 = vadd.f32 %v6145_v34, %v2897_v12  ;;  %v4381_v21 = vpop.f32.mrb[86].mxu1  ;;  %v3208_v12 = vpop.xlane.xlu0 %3207 }
 0x4c7   : > { %v3296_v53 = vadd.f32 %v3188_v26, %v2906_v56  ;;  %v2909_v55 = vadd.f32 %v4381_v21, %v6145_v34  ;;  %v2900_v60 = vpop.f32.mrb[87].mxu1 }
 0x4c8   : > { %v3294_v8 = vadd.f32 %v3184_v23, %v2898_v42  ;;  %v2901_v61 = vadd.f32 %v6145_v34, %v2900_v60 }
 0x4c9   : > { %v3297_v5 = vadd.f32 %v3190_v62, %v2909_v55  ;;  %v3360_v18 = vsel %vm3273_vm0, %v3296_v53, %v2906_v56 }
 0x4ca   : > { %v3295_v6 = vadd.f32 %v3186_v25, %v2901_v61  ;;  %v3358_v10 = vsel %vm3273_vm0, %v3294_v8, %v2898_v42 }
 0x4cb   : > { %v3361_v41 = vsel %vm3273_vm0, %v3297_v5, %v2909_v55 }
 0x4cc   : > { %v4169_v57 = vpack.c.bf16 %v3361_v41, %v3360_v18  ;;  %v3359_v52 = vsel %vm3273_vm0, %v3295_v6, %v2901_v61 }
 0x4cd   : > { %v4164_v30 = vpack.c.bf16 %v3359_v52, %v3358_v10 }
 0x4ce   : > { %4281 = vst [vmem:[%s6170_s16 + $0x58] sm:$0xff] %v4169_v57  }
 0x4cf   : > { %4280 = vst [vmem:[%s6170_s16 + $0x50] sm:$0xff] %v4164_v30  }
 0x4d4   : > { %v4384_v47 = vpop.f32.mrb[88].mxu1 }
 0x4d5   : > { %v2922_v45 = vadd.f32 %v4384_v47, %v6145_v34  ;;  %v2913_v33 = vpop.f32.mrb[89].mxu1 }
 0x4d6   : > { %v2914_v1 = vadd.f32 %v6145_v34, %v2913_v33  ;;  %v4385_v22 = vpop.f32.mrb[90].mxu1 }
 0x4d7   : > { %v3300_v38 = vadd.f32 %v3196_v9, %v2922_v45  ;;  %v2925_v17 = vadd.f32 %v4385_v22, %v6145_v34  ;;  %v2916_v4 = vpop.f32.mrb[91].mxu1 }
 0x4d8   : > { %v3298_v46 = vadd.f32 %v3192_v44, %v2914_v1  ;;  %v2917_v13 = vadd.f32 %v6145_v34, %v2916_v4 }
 0x4d9   : > { %v3301_v16 = vadd.f32 %v3198_v39, %v2925_v17  ;;  %v3364_v29 = vsel %vm3273_vm0, %v3300_v38, %v2922_v45 }
 0x4da   : > { %v3299_v48 = vadd.f32 %v3194_v11, %v2917_v13  ;;  %v3362_v32 = vsel %vm3273_vm0, %v3298_v46, %v2914_v1 }
 0x4db   : > { %v3365_v0 = vsel %vm3273_vm0, %v3301_v16, %v2925_v17 }
 0x4dc   : > { %v4179_v51 = vpack.c.bf16 %v3365_v0, %v3364_v29  ;;  %v3363_v35 = vsel %vm3273_vm0, %v3299_v48, %v2917_v13 }
 0x4dd   : > { %v4174_v20 = vpack.c.bf16 %v3363_v35, %v3362_v32 }
 0x4de   : > { %4283 = vst [vmem:[%s6170_s16 + $0x68] sm:$0xff] %v4179_v51  }
 0x4df   : > { %4282 = vst [vmem:[%s6170_s16 + $0x60] sm:$0xff] %v4174_v20  }
 0x4e4   : > { %v4388_v28 = vpop.f32.mrb[92].mxu1 }
 0x4e5   : > { %v2938_v15 = vadd.f32 %v4388_v28, %v6145_v34  ;;  %v2929_v59 = vpop.f32.mrb[93].mxu1 }
 0x4e6   : > { %v2930_v63 = vadd.f32 %v6145_v34, %v2929_v59  ;;  %v4389_v31 = vpop.f32.mrb[94].mxu1 }
 0x4e7   : > { %v3304_v14 = vadd.f32 %v3204_v7, %v2938_v15  ;;  %v2941_v54 = vadd.f32 %v4389_v31, %v6145_v34  ;;  %v2932_v36 = vpop.f32.mrb[95].mxu1 }
 0x4e8   : > { %v3302_v49 = vadd.f32 %v3200_v3, %v2930_v63  ;;  %v2933_v40 = vadd.f32 %v6145_v34, %v2932_v36 }
 0x4e9   : > { %v3305_v50 = vadd.f32 %v3206_v27, %v2941_v54  ;;  %v3368_v2 = vsel %vm3273_vm0, %v3304_v14, %v2938_v15 }
 0x4ea   : > { %v3303_v37 = vadd.f32 %v3202_v58, %v2933_v40  ;;  %v3366_v23 = vsel %vm3273_vm0, %v3302_v49, %v2930_v63 }
 0x4eb   : > { %v3369_v43 = vsel %vm3273_vm0, %v3305_v50, %v2941_v54 }
 0x4ec   : > { %v4189_v25 = vpack.c.bf16 %v3369_v43, %v3368_v2  ;;  %v3367_v24 = vsel %vm3273_vm0, %v3303_v37, %v2933_v40 }
 0x4ed   : > { %v4184_v56 = vpack.c.bf16 %v3367_v24, %v3366_v23 }
 0x4ee   : > { %4285 = vst [vmem:[%s6170_s16 + $0x78] sm:$0xff] %v4189_v25  }
 0x4ef   : > { %4284 = vst [vmem:[%s6170_s16 + $0x70] sm:$0xff] %v4184_v56  }
 0x4f0   : > { %4572 = shalt.err (!%p4569_p5)
}
 0x4f1   : > { %s4573_s14 = scalar_lea.hbm %s6299_s12, 4096  ;;  %s4577_s0 = scalar_lea.hbm %s6474_s10, 8192 }
 0x4f2   : > { %p4574_p6 = scmp.ne.s32.totalorder %s6299_s12, %s4573_s14  ;;  %p4578_p10 = scmp.lt.u32.totalorder %s6299_s12, %s6474_s10 }
 0x4f3   : > { %p4579_p11 = scmp.lt.u32.totalorder %s4577_s0, %s4573_s14  ;;  %p4581_p13 = scmp.lt.u32.totalorder %s4573_s14, %s6299_s12 }
 0x4f4   : > { %p4575_p7 = pnand %p4574_p6, %p4745_p4 }
 0x4f5   : > { %p4580_p12 = por %p4579_p11, %p4578_p10 }
 0x4f6   : > { %p4576_p9 = pneg %p4575_p7 }
 0x4f7   : > { %p4582_p0 = por %p4581_p13, %p4580_p12 }
 0x4f9   : > { %p4583_p1 = pnand %p4582_p0, %p4576_p9 }
 0x4fb   : > { %4586 = shalt.err (!%p4583_p1)
}
 0x4fc   : > { %s4643_s28 = smov 256   ;;  %s4644_s15 = smov 16   ;;  %v3210_v26 = vpop.xlane.xlu1 %3209  ;;  %v4392_v42 = vpop.f32.mrb[96].mxu1 }
 0x4fd   : > { %4422 = dma.vmem_to_hbm [thread:$0]  (%p4745_p4), %s6302_s13, 4096, %s6299_s12, %s6306_s24, %s4643_s28, %s4643_s28, %s4644_s15   ;;  %v2954_v21 = vadd.f32 %v4392_v42, %v6145_v34  ;;  %v2945_v53 = vpop.f32.mrb[97].mxu1  ;;  %v3212_v55 = vpop.xlane.xlu0 %3211 }
 0x4fe   : > { %v2946_v60 = vadd.f32 %v6145_v34, %v2945_v53  ;;  %v4393_v62 = vpop.f32.mrb[98].mxu1 }
 0x4ff   : > { %v3308_v8 = vadd.f32 %v3212_v55, %v2954_v21  ;;  %v2957_v61 = vadd.f32 %v4393_v62, %v6145_v34  ;;  %v2948_v5 = vpop.f32.mrb[99].mxu1 }
 0x500   : > { %v3214_v6 = vpop.xlane.xlu1 %3213  ;;  %v3306_v18 = vadd.f32 %v3208_v12, %v2946_v60  ;;  %v2949_v41 = vadd.f32 %v6145_v34, %v2948_v5 }
 0x501   : > { %v3309_v10 = vadd.f32 %v3214_v6, %v2957_v61  ;;  %v3372_v52 = vsel %vm3273_vm0, %v3308_v8, %v2954_v21  ;;  %v3216_v33 = vpop.xlane.xlu0 %3215 }
 0x502   : > { %v3307_v57 = vadd.f32 %v3210_v26, %v2949_v41  ;;  %v3370_v44 = vsel %vm3273_vm0, %v3306_v18, %v2946_v60 }
 0x503   : > { %v3373_v30 = vsel %vm3273_vm0, %v3309_v10, %v2957_v61 }
 0x504   : > { %v4199_v11 = vpack.c.bf16 %v3373_v30, %v3372_v52  ;;  %v3371_v47 = vsel %vm3273_vm0, %v3307_v57, %v2949_v41  ;;  %v3218_v9 = vpop.xlane.xlu1 %3217  ;;  %v4396_v1 = vpop.f32.mrb[100].mxu1 }
 0x505   : > { %v4194_v45 = vpack.c.bf16 %v3371_v47, %v3370_v44  ;;  %v2970_v22 = vadd.f32 %v4396_v1, %v6145_v34  ;;  %v2961_v38 = vpop.f32.mrb[101].mxu1  ;;  %v3220_v17 = vpop.xlane.xlu0 %3219 }
 0x506   : > { %4287 = vst [vmem:[%s6170_s16 + $0x88] sm:$0xff] %v4199_v11   ;;  %v2962_v4 = vadd.f32 %v6145_v34, %v2961_v38  ;;  %v4397_v39 = vpop.f32.mrb[102].mxu1 }
 0x507   : > { %4286 = vst [vmem:[%s6170_s16 + $0x80] sm:$0xff] %v4194_v45   ;;  %v3312_v46 = vadd.f32 %v3220_v17, %v2970_v22  ;;  %v2973_v13 = vadd.f32 %v4397_v39, %v6145_v34  ;;  %v2964_v16 = vpop.f32.mrb[103].mxu1 }
 0x508   : > { %v3222_v48 = vpop.xlane.xlu1 %3221  ;;  %v3310_v29 = vadd.f32 %v3216_v33, %v2962_v4  ;;  %v2965_v0 = vadd.f32 %v6145_v34, %v2964_v16 }
 0x509   : > { %v3313_v32 = vadd.f32 %v3222_v48, %v2973_v13  ;;  %v3376_v35 = vsel %vm3273_vm0, %v3312_v46, %v2970_v22  ;;  %v3224_v59 = vpop.xlane.xlu0 %3223 }
 0x50a   : > { %v3311_v51 = vadd.f32 %v3218_v9, %v2965_v0  ;;  %v3374_v3 = vsel %vm3273_vm0, %v3310_v29, %v2962_v4 }
 0x50b   : > { %v3377_v20 = vsel %vm3273_vm0, %v3313_v32, %v2973_v13 }
 0x50c   : > { %v4209_v58 = vpack.c.bf16 %v3377_v20, %v3376_v35  ;;  %v3375_v28 = vsel %vm3273_vm0, %v3311_v51, %v2965_v0  ;;  %v3226_v7 = vpop.xlane.xlu1 %3225 }
 0x50d   : > { %v4204_v15 = vpack.c.bf16 %v3375_v28, %v3374_v3  ;;  %v3228_v54 = vpop.xlane.xlu0 %3227 }
 0x50e   : > { %4289 = vst [vmem:[%s6170_s16 + $0x98] sm:$0xff] %v4209_v58  }
 0x50f   : > { %4288 = vst [vmem:[%s6170_s16 + $0x90] sm:$0xff] %v4204_v15  }
 0x510   : > { %v3230_v37 = vpop.xlane.xlu1 %3229 }
 0x511   : > { %v3232_v53 = vpop.xlane.xlu0 %3231 }
 0x514   : > { %v4400_v63 = vpop.f32.mrb[104].mxu1  ;;  %v3234_v55 = vpop.xlane.xlu1 %3233 }
 0x515   : > { %v2986_v31 = vadd.f32 %v4400_v63, %v6145_v34  ;;  %v2977_v14 = vpop.f32.mrb[105].mxu1  ;;  %v3236_v61 = vpop.xlane.xlu0 %3235 }
 0x516   : > { %v2978_v36 = vadd.f32 %v6145_v34, %v2977_v14  ;;  %v4401_v27 = vpop.f32.mrb[106].mxu1 }
 0x517   : > { %v3316_v49 = vadd.f32 %v3228_v54, %v2986_v31  ;;  %v2989_v40 = vadd.f32 %v4401_v27, %v6145_v34  ;;  %v2980_v50 = vpop.f32.mrb[107].mxu1 }
 0x518   : > { %v3314_v2 = vadd.f32 %v3224_v59, %v2978_v36  ;;  %v2981_v43 = vadd.f32 %v6145_v34, %v2980_v50  ;;  %v3238_v57 = vpop.xlane.xlu1 %3237 }
 0x519   : > { %v3317_v23 = vadd.f32 %v3230_v37, %v2989_v40  ;;  %v3380_v24 = vsel %vm3273_vm0, %v3316_v49, %v2986_v31  ;;  %v3240_v38 = vpop.xlane.xlu0 %3239 }
 0x51a   : > { %v3315_v25 = vadd.f32 %v3226_v7, %v2981_v43  ;;  %v3378_v12 = vsel %vm3273_vm0, %v3314_v2, %v2978_v36 }
 0x51b   : > { %v3381_v56 = vsel %vm3273_vm0, %v3317_v23, %v2989_v40 }
 0x51c   : > { %v4219_v26 = vpack.c.bf16 %v3381_v56, %v3380_v24  ;;  %v3379_v42 = vsel %vm3273_vm0, %v3315_v25, %v2981_v43  ;;  %v3242_v17 = vpop.xlane.xlu1 %3241 }
 0x51d   : > { %v4214_v21 = vpack.c.bf16 %v3379_v42, %v3378_v12  ;;  %v3244_v13 = vpop.xlane.xlu0 %3243 }
 0x51e   : > { %4291 = vst [vmem:[%s6170_s16 + $0xa8] sm:$0xff] %v4219_v26  }
 0x51f   : > { %4290 = vst [vmem:[%s6170_s16 + $0xa0] sm:$0xff] %v4214_v21  }
 0x520   : > { %v3246_v51 = vpop.xlane.xlu1 %3245 }
 0x521   : > { %v3248_v14 = vpop.xlane.xlu0 %3247 }
 0x524   : > { %v4404_v60 = vpop.f32.mrb[108].mxu1  ;;  %v3250_v54 = vpop.xlane.xlu1 %3249 }
 0x525   : > { %v3002_v62 = vadd.f32 %v4404_v60, %v6145_v34  ;;  %v2993_v8 = vpop.f32.mrb[109].mxu1  ;;  %v3252_v40 = vpop.xlane.xlu0 %3251 }
 0x526   : > { %v2994_v5 = vadd.f32 %v6145_v34, %v2993_v8  ;;  %v4405_v6 = vpop.f32.mrb[110].mxu1 }
 0x527   : > { %v3320_v18 = vadd.f32 %v3236_v61, %v3002_v62  ;;  %v3005_v41 = vadd.f32 %v4405_v6, %v6145_v34  ;;  %v2996_v10 = vpop.f32.mrb[111].mxu1 }
 0x528   : > { %v3318_v52 = vadd.f32 %v3232_v53, %v2994_v5  ;;  %v2997_v30 = vadd.f32 %v6145_v34, %v2996_v10  ;;  %v3254_v25 = vpop.xlane.xlu1 %3253 }
 0x529   : > { %v3321_v44 = vadd.f32 %v3238_v57, %v3005_v41  ;;  %v3384_v47 = vsel %vm3273_vm0, %v3320_v18, %v3002_v62  ;;  %v3256_v8 = vpop.xlane.xlu0 %3255 }
 0x52a   : > { %v3319_v11 = vadd.f32 %v3234_v55, %v2997_v30  ;;  %v3382_v33 = vsel %vm3273_vm0, %v3318_v52, %v2994_v5 }
 0x52b   : > { %v3385_v45 = vsel %vm3273_vm0, %v3321_v44, %v3005_v41 }
 0x52c   : > { %v4229_v9 = vpack.c.bf16 %v3385_v45, %v3384_v47  ;;  %v3383_v1 = vsel %vm3273_vm0, %v3319_v11, %v2997_v30  ;;  %v3258_v61 = vpop.xlane.xlu1 %3257 }
 0x52d   : > { %v4224_v22 = vpack.c.bf16 %v3383_v1, %v3382_v33  ;;  %v3260_v41 = vpop.xlane.xlu0 %3259 }
 0x52e   : > { %4293 = vst [vmem:[%s6170_s16 + $0xb8] sm:$0xff] %v4229_v9  }
 0x52f   : > { %4292 = vst [vmem:[%s6170_s16 + $0xb0] sm:$0xff] %v4224_v22  }
 0x530   : > { %v3262_v11 = vpop.xlane.xlu1 %3261 }
 0x534   : > { %v4408_v4 = vpop.f32.mrb[112].mxu1 }
 0x535   : > { %v3018_v39 = vadd.f32 %v4408_v4, %v6145_v34  ;;  %v3009_v46 = vpop.f32.mrb[113].mxu1 }
 0x536   : > { %v3010_v16 = vadd.f32 %v6145_v34, %v3009_v46  ;;  %v4409_v48 = vpop.f32.mrb[114].mxu1  ;;  %v3264_v46 = vpop.xlane.xlu0 %3263 }
 0x537   : > { %v3324_v29 = vadd.f32 %v3244_v13, %v3018_v39  ;;  %v3021_v0 = vadd.f32 %v4409_v48, %v6145_v34  ;;  %v3012_v32 = vpop.f32.mrb[115].mxu1  ;;  %v3266_v13 = vpop.xlane.xlu1 %3265 }
 0x538   : > { %v3322_v35 = vadd.f32 %v3240_v38, %v3010_v16  ;;  %v3013_v20 = vadd.f32 %v6145_v34, %v3012_v32 }
 0x539   : > { %v3325_v3 = vadd.f32 %v3246_v51, %v3021_v0  ;;  %v3388_v28 = vsel %vm3273_vm0, %v3324_v29, %v3018_v39 }
 0x53a   : > { %v3323_v58 = vadd.f32 %v3242_v17, %v3013_v20  ;;  %v3386_v59 = vsel %vm3273_vm0, %v3322_v35, %v3010_v16 }
 0x53b   : > { %v3389_v15 = vsel %vm3273_vm0, %v3325_v3, %v3021_v0  ;;  %v3268_v0 = vpop.xlane.xlu0 %3267 }
 0x53c   : > { %v4239_v7 = vpack.c.bf16 %v3389_v15, %v3388_v28  ;;  %v3387_v63 = vsel %vm3273_vm0, %v3323_v58, %v3013_v20  ;;  %v3270_v58 = vpop.xlane.xlu1 %3269 }
 0x53d   : > { %v4234_v31 = vpack.c.bf16 %v3387_v63, %v3386_v59 }
 0x53e   : > { %4295 = vst [vmem:[%s6170_s16 + $0xc8] sm:$0xff] %v4239_v7  }
 0x53f   : > { %4294 = vst [vmem:[%s6170_s16 + $0xc0] sm:$0xff] %v4234_v31  }
 0x544   : > { %v4412_v36 = vpop.f32.mrb[116].mxu1 }
 0x545   : > { %v3034_v27 = vadd.f32 %v4412_v36, %v6145_v34  ;;  %v3025_v49 = vpop.f32.mrb[117].mxu1 }
 0x546   : > { %v3026_v50 = vadd.f32 %v6145_v34, %v3025_v49  ;;  %v4413_v37 = vpop.f32.mrb[118].mxu1 }
 0x547   : > { %v3328_v2 = vadd.f32 %v3252_v40, %v3034_v27  ;;  %v3037_v43 = vadd.f32 %v4413_v37, %v6145_v34  ;;  %v3028_v23 = vpop.f32.mrb[119].mxu1 }
 0x548   : > { %v3326_v24 = vadd.f32 %v3248_v14, %v3026_v50  ;;  %v3029_v56 = vadd.f32 %v6145_v34, %v3028_v23 }
 0x549   : > { %v3329_v12 = vadd.f32 %v3254_v25, %v3037_v43  ;;  %v3392_v42 = vsel %vm3273_vm0, %v3328_v2, %v3034_v27 }
 0x54a   : > { %v3327_v26 = vadd.f32 %v3250_v54, %v3029_v56  ;;  %v3390_v53 = vsel %vm3273_vm0, %v3326_v24, %v3026_v50 }
 0x54b   : > { %v3393_v21 = vsel %vm3273_vm0, %v3329_v12, %v3037_v43 }
 0x54c   : > { %v4249_v55 = vpack.c.bf16 %v3393_v21, %v3392_v42  ;;  %v3391_v60 = vsel %vm3273_vm0, %v3327_v26, %v3029_v56 }
 0x54d   : > { %v4244_v62 = vpack.c.bf16 %v3391_v60, %v3390_v53 }
 0x54e   : > { %4297 = vst [vmem:[%s6170_s16 + $0xd8] sm:$0xff] %v4249_v55  }
 0x54f   : > { %4296 = vst [vmem:[%s6170_s16 + $0xd0] sm:$0xff] %v4244_v62  }
 0x554   : > { %v4416_v5 = vpop.f32.mrb[120].mxu1 }
 0x555   : > { %v3050_v6 = vadd.f32 %v4416_v5, %v6145_v34  ;;  %v3041_v18 = vpop.f32.mrb[121].mxu1 }
 0x556   : > { %v3042_v10 = vadd.f32 %v6145_v34, %v3041_v18  ;;  %v4417_v57 = vpop.f32.mrb[122].mxu1 }
 0x557   : > { %v3332_v52 = vadd.f32 %v3260_v41, %v3050_v6  ;;  %v3053_v30 = vadd.f32 %v4417_v57, %v6145_v34  ;;  %v3044_v44 = vpop.f32.mrb[123].mxu1 }
 0x558   : > { %v3330_v47 = vadd.f32 %v3256_v8, %v3042_v10  ;;  %v3045_v45 = vadd.f32 %v6145_v34, %v3044_v44 }
 0x559   : > { %v3333_v33 = vadd.f32 %v3262_v11, %v3053_v30  ;;  %v3396_v1 = vsel %vm3273_vm0, %v3332_v52, %v3050_v6 }
 0x55a   : > { %v3331_v9 = vadd.f32 %v3258_v61, %v3045_v45  ;;  %v3394_v38 = vsel %vm3273_vm0, %v3330_v47, %v3042_v10 }
 0x55b   : > { %v3397_v22 = vsel %vm3273_vm0, %v3333_v33, %v3053_v30 }
 0x55c   : > { %v4259_v17 = vpack.c.bf16 %v3397_v22, %v3396_v1  ;;  %v3395_v4 = vsel %vm3273_vm0, %v3331_v9, %v3045_v45 }
 0x55d   : > { %v4254_v39 = vpack.c.bf16 %v3395_v4, %v3394_v38 }
 0x55e   : > { %4299 = vst [vmem:[%s6170_s16 + $0xe8] sm:$0xff] %v4259_v17  }
 0x55f   : > { %4298 = vst [vmem:[%s6170_s16 + $0xe0] sm:$0xff] %v4254_v39  }
 0x564   : > { %v4420_v16 = vpop.f32.mrb[124].mxu1 }
 0x565   : > { %v3066_v48 = vadd.f32 %v4420_v16, %v6145_v34  ;;  %v3057_v29 = vpop.f32.mrb[125].mxu1 }
 0x566   : > { %v3058_v32 = vadd.f32 %v6145_v34, %v3057_v29  ;;  %v4421_v51 = vpop.f32.mrb[126].mxu1 }
 0x567   : > { %v3336_v35 = vadd.f32 %v3268_v0, %v3066_v48  ;;  %v3069_v20 = vadd.f32 %v4421_v51, %v6145_v34  ;;  %v3060_v3 = vpop.f32.mrb[127].mxu1 }
 0x568   : > { %v3334_v28 = vadd.f32 %v3264_v46, %v3058_v32  ;;  %v3061_v15 = vadd.f32 %v6145_v34, %v3060_v3 }
 0x569   : > { %v3337_v59 = vadd.f32 %v3270_v58, %v3069_v20  ;;  %v3400_v63 = vsel %vm3273_vm0, %v3336_v35, %v3066_v48 }
 0x56a   : > { %v3335_v7 = vadd.f32 %v3266_v13, %v3061_v15  ;;  %v3398_v14 = vsel %vm3273_vm0, %v3334_v28, %v3058_v32 }
 0x56b   : > { %v3401_v31 = vsel %vm3273_vm0, %v3337_v59, %v3069_v20 }
 0x56c   : > { %v4269_v54 = vpack.c.bf16 %v3401_v31, %v3400_v63  ;;  %v3399_v36 = vsel %vm3273_vm0, %v3335_v7, %v3061_v15 }
 0x56d   : > { %v4264_v27 = vpack.c.bf16 %v3399_v36, %v3398_v14 }
 0x56e   : > { %4301 = vst [vmem:[%s6170_s16 + $0xf8] sm:$0xff] %v4269_v54  }
 0x56f   : > { %4300 = vst [vmem:[%s6170_s16 + $0xf0] sm:$0xff] %v4264_v27  }
 0x570 PF: > { %p4428_p4 = scmp.ge.s32.totalorder %s4637_s22, 2  ;;  %s3766_s27 = sand.u32 1, %s4617_s17  }
 0x571   : > { %s3767_s12 = scalar_lea.sflag [#allocation3], %s3766_s27 }
 0x572   : > { %p4425_p2 = pnand %p4428_p4, %p4752_p8 }
 0x574   : > { %4612 = dma.done.wait (!%p4425_p2), %s3767_s12, 4096  }
 0x575   : > { %4614 = vsyncadd (!%p4425_p2), %s3767_s12, 4294963200  ;;  %s25_s22 = sadd.s32 1, %s4637_s22   ;;  %s6542_s17 = smov %s4621_s18 }
 0x576   : > { %p22_p3 = scmp.ge.s32.totalorder %s25_s22, 4   ;;  %s6543_s18 = smov %s4625_s19 }
 0x577   : > { %s6544_s19 = smov %s4758_s30  ;;  %s6545_s20 = smov %s4633_s21 }
 0x578   : > { %s6546_s21 = smov %s6548_s25  ;;  %24 = sbr.rel (!%p22_p3) target bundleno = 7 (0x7), region = 107 }
 0x57f   :  { %3784 = vsyncpa [#allocation3], 1 }
 0x580   :  { %3786 = vsyncpa [#allocation3 + $0x1], 1 }

</bundles_post_ra>
